<compile_context>
chip_gen: v5e
topology: v5e:2x2
jax: 0.10.0
libtpu: 0.0.40
codegen_flags: <defaults>
</compile_context>

<pallas_src>
import functools

import jax
import jax.numpy as jnp
from jax.experimental import pallas as pl
from jax.experimental.pallas import tpu as pltpu


# ----------------------------- Pallas kernels -------------------------------

def _conv_stats_kernel(x_ref, w_ref, y_ref, mean_ref, m2_ref, *,
                       kh, kw, stride, t_h, Wo, rows_in):
    """K-packed implicit-GEMM conv tile + per-tile BN statistics.

    Grid point = (sample n, output-row tile h, Cout tile c).

    x_ref:    (1, Hp, Wp, Cin)     whole padded NHWC image of sample n (compute dtype)
    w_ref:    (kh*kw*Cin, c_tile)  reshaped weight slab                (compute dtype)
    y_ref:    (1, t_h*Wo, c_tile)  conv output tile                    (compute dtype)
    mean_ref: (1, 1, 1, c_tile)    tile channel mean                   (f32)
    m2_ref:   (1, 1, 1, c_tile)    tile sum of squared deviations      (f32)
    """
    h0 = pl.program_id(1) * (t_h * stride)      # first padded input row of this tile
    if (t_h * stride) % 8 == 0:
        h0 = pl.multiple_of(h0, 8)
    xin = x_ref[0, pl.ds(h0, rows_in), :, :]    # (rows_in, Wp, Cin)

    # Build the (t_h*Wo, kh*kw*Cin) im2col LHS once, then ONE deep MXU matmul.
    h_end = (t_h - 1) * stride + 1
    w_end = (Wo - 1) * stride + 1
    cols = []
    for di in range(kh):                        # kh*kw taps, statically unrolled
        for dj in range(kw):
            patch = xin[di:di + h_end:stride, dj:dj + w_end:stride, :]  # (t_h, Wo, Cin)
            cols.append(patch.reshape(t_h * Wo, -1))
    lhs = jnp.concatenate(cols, axis=-1)        # (t_h*Wo, kh*kw*Cin), (di,dj,cin) order

    acc = jnp.dot(lhs, w_ref[...],
                  preferred_element_type=jnp.float32)        # (t_h*Wo, c_tile) f32

    y_ref[...] = acc[None].astype(y_ref.dtype)  # lane-dense bf16 (or f32) writeback

    m = jnp.mean(acc, axis=0, keepdims=True)    # (1, c_tile) f32
    d = acc - m
    mean_ref[...] = m.reshape(mean_ref.shape)
    m2_ref[...] = jnp.sum(d * d, axis=0, keepdims=True).reshape(m2_ref.shape)


def _bn_lrelu_nchw_kernel(y_ref, scale_ref, shift_ref, o_ref, *, cout):
    """Fused BN affine + LeakyReLU(0.1); writes the tile directly in NCHW layout.

    y_ref:     (1, m_tile, C_pad)  conv intermediate (compute dtype)
    scale_ref: (1, C_pad)          fused BN scale (f32)
    shift_ref: (1, C_pad)          fused BN shift (f32)
    o_ref:     (1, cout, m_tile)   final output, channel-major
    """
    y = y_ref[0].astype(jnp.float32)            # (m_tile, C_pad)
    z = y * scale_ref[...] + shift_ref[...]
    z = jnp.where(z > 0, z, 0.1 * z)
    zt = z.T                                    # (C_pad, m_tile), XLU transpose
    o_ref[...] = zt[:cout, :][None].astype(o_ref.dtype)


# ------------------------------- wrapper -------------------------------------

def _pick_row_tile(Ho, Wo, target_rows=512):
    """Output rows per pass-1 tile: a divisor of Ho (equal tiles -> simple equal-count
    Chan stats merge); when actually tiled the flattened row count must be a multiple of
    128 so the pass-2 NCHW store stays lane-dense.  Falls back to one tile per sample."""
    if Ho * Wo <= target_rows:
        return Ho
    for t in range(Ho, 0, -1):
        if Ho % t == 0 and t * Wo <= target_rows and (t * Wo) % 128 == 0:
            return t
    return Ho


def basic_block_forward(x_nchw, w, b, gamma, beta, *, stride, eps=1e-5,
                        compute_dtype=jnp.bfloat16, out_dtype=jnp.float32):
    N, Cin, H, W = x_nchw.shape
    Cout, _, kh, kw = w.shape
    pad = (kh - 1) // 2
    Ho = (H + 2 * pad - kh) // stride + 1
    Wo = (W + 2 * pad - kw) // stride + 1
    del b   # train-mode BN: conv bias is absorbed by the batch mean -> exact no-op

    # ---- small XLA glue: NCHW -> padded NHWC activations; weight -> (K, Cout_pad) ----
    x = jnp.transpose(x_nchw, (0, 2, 3, 1))
    x = jnp.pad(x, ((0, 0), (pad, pad), (pad, pad), (0, 0))).astype(compute_dtype)
    Hp, Wp = H + 2 * pad, W + 2 * pad

    C_pad = ((Cout + 127) // 128) * 128                         # lane-dense channels
    K = kh * kw * Cin
    w_k = jnp.transpose(w, (2, 3, 1, 0)).reshape(K, Cout)       # rows in (di,dj,cin)
    w_k = jnp.pad(w_k, ((0, 0), (0, C_pad - Cout))).astype(compute_dtype)

    # ---- tiling: <=~512 output rows per tile, 128/256-wide Cout tiles ----
    t_h = _pick_row_tile(Ho, Wo)
    n_h = Ho // t_h
    m_tile = t_h * Wo
    M = Ho * Wo
    rows_in = (t_h - 1) * stride + kh
    c_tile = 256 if C_pad % 256 == 0 else 128   # v6e/v7x: 256 fills the 2x256 MXU;
    n_c = C_pad // c_tile                       # v5e would prefer 128 (4x128 MXU)

    # -------------------- pass 1: implicit-GEMM conv + BN stats ------------------
    kern1 = functools.partial(_conv_stats_kernel, kh=kh, kw=kw, stride=stride,
                              t_h=t_h, Wo=Wo, rows_in=rows_in)
    conv_out, smean, sm2 = pl.pallas_call(
        kern1,
        out_shape=(jax.ShapeDtypeStruct((N, M, C_pad), compute_dtype),
                   jax.ShapeDtypeStruct((N, n_h, 1, C_pad), jnp.float32),
                   jax.ShapeDtypeStruct((N, n_h, 1, C_pad), jnp.float32)),
        grid_spec=pltpu.PrefetchScalarGridSpec(
            num_scalar_prefetch=0,
            grid=(N, n_h, n_c),
            in_specs=[
                # Whole padded image per sample: same block index across (h, c), so it
                # is DMA'd once per sample.  TODO(synk): halo-aware H tiling of the
                # image itself for very large spatial extents.
                pl.BlockSpec((1, Hp, Wp, Cin), lambda n, h, c: (n, 0, 0, 0)),
                # Weight slab; grid-invariant along n/h.  (pl.Buffered(1) could single-
                # buffer it to save VMEM on v7x; left at default for portability.)
                pl.BlockSpec((K, c_tile), lambda n, h, c: (0, c)),
            ],
            out_specs=(
                pl.BlockSpec((1, m_tile, c_tile), lambda n, h, c: (n, h, c)),
                pl.BlockSpec((1, 1, 1, c_tile), lambda n, h, c: (n, h, 0, c)),
                pl.BlockSpec((1, 1, 1, c_tile), lambda n, h, c: (n, h, 0, c)),
            )),
        compiler_params=pltpu.CompilerParams(
            dimension_semantics=("parallel", "parallel", "parallel")),
    )(x, w_k)

    # ---- tiny stats combine (equal-count Chan merge) + fused BN scale/shift ----
    means = smean.reshape(N * n_h, C_pad)[:, :Cout]
    m2s = sm2.reshape(N * n_h, C_pad)[:, :Cout]
    mean = jnp.mean(means, axis=0)                                     # (Cout,)
    m2 = jnp.sum(m2s, axis=0) + m_tile * jnp.sum((means - mean[None, :]) ** 2, axis=0)
    var = m2 / (N * M)                                                 # biased (train)
    scale = gamma.astype(jnp.float32) / jnp.sqrt(var + eps)
    shift = beta.astype(jnp.float32) - mean * scale
    scale_row = jnp.pad(scale, (0, C_pad - Cout)).reshape(1, C_pad)
    shift_row = jnp.pad(shift, (0, C_pad - Cout)).reshape(1, C_pad)

    # --------- pass 2: fused BN affine + LeakyReLU, NCHW written in-kernel ---------
    kern2 = functools.partial(_bn_lrelu_nchw_kernel, cout=Cout)
    out_flat = pl.pallas_call(
        kern2,
        out_shape=jax.ShapeDtypeStruct((N, Cout, M), out_dtype),
        grid_spec=pltpu.PrefetchScalarGridSpec(
            num_scalar_prefetch=0,
            grid=(N, n_h),
            in_specs=[pl.BlockSpec((1, m_tile, C_pad), lambda n, h: (n, h, 0)),
                      pl.BlockSpec((1, C_pad), lambda n, h: (0, 0)),
                      pl.BlockSpec((1, C_pad), lambda n, h: (0, 0))],
            out_specs=pl.BlockSpec((1, Cout, m_tile), lambda n, h: (n, 0, h))),
        compiler_params=pltpu.CompilerParams(
            dimension_semantics=("parallel", "parallel")),
    )(conv_out, scale_row, shift_row)

    return out_flat.reshape(N, Cout, Ho, Wo)


# ------------------------------ reference ------------------------------------

def _reference(x, w, b, gamma, beta, *, stride, eps=1e-5):
    k = w.shape[2]
    pad = (k - 1) // 2
    y = jax.lax.conv_general_dilated(
        x.astype(jnp.float32), w.astype(jnp.float32),
        window_strides=(stride, stride),
        padding=[(pad, pad), (pad, pad)],
        dimension_numbers=("NCHW", "OIHW", "NCHW"),
        precision=jax.lax.Precision.HIGHEST)
    y = y + b.reshape(1, -1, 1, 1)
    mean = jnp.mean(y, axis=(0, 2, 3), keepdims=True)
    var = jnp.var(y, axis=(0, 2, 3), keepdims=True)
    yn = (y - mean) / jnp.sqrt(var + eps) * gamma.reshape(1, -1, 1, 1) \
         + beta.reshape(1, -1, 1, 1)
    return jnp.where(yn > 0, yn, 0.1 * yn)


# --------------------------------- main ---------------------------------------

if __name__ == "__main__":
    # param = [in_channels, out_channels, kernel_size, stride, bias]
    param = [4, 8, 3, 1, True]
    Cin, Cout, ksz, stride, use_bias = param
    N, H, W = 2, 16, 16

    key = jax.random.PRNGKey(0)
    kx, kw_, kb = jax.random.split(key, 3)
    x = jax.random.normal(kx, (N, Cin, H, W), dtype=jnp.float32)
    w = 0.1 * jax.random.normal(kw_, (Cout, Cin, ksz, ksz), dtype=jnp.float32)
    b = (0.1 * jax.random.normal(kb, (Cout,), dtype=jnp.float32)
         if use_bias else jnp.zeros((Cout,), jnp.float32))
    gamma = 1.0 + 0.1 * jnp.arange(Cout, dtype=jnp.float32)   # BN weight
    beta = 0.05 * jnp.arange(Cout, dtype=jnp.float32)         # BN bias

    fwd = jax.jit(basic_block_forward,
                  static_argnames=("stride", "eps", "compute_dtype", "out_dtype"))

    ref = _reference(x, w, b, gamma, beta, stride=stride)

    # f32 operands: check against the XLA reference (incl. bias, which must cancel
    # exactly under train-mode BN).  Tolerance covers MXU f32-pass precision.
    out32 = jax.block_until_ready(
        fwd(x, w, b, gamma, beta, stride=stride, compute_dtype=jnp.float32))
    assert out32.shape == ref.shape, (out32.shape, ref.shape)
    assert jnp.allclose(out32, ref, atol=2e-2, rtol=2e-2), \
        float(jnp.max(jnp.abs(out32 - ref)))

    # bf16 operands + bf16 intermediate (production default).
    out16 = jax.block_until_ready(
        fwd(x, w, b, gamma, beta, stride=stride, compute_dtype=jnp.bfloat16))
    assert out16.shape == ref.shape, (out16.shape, ref.shape)
    assert jnp.allclose(out16.astype(jnp.float32), ref, atol=7e-2, rtol=7e-2), \
        float(jnp.max(jnp.abs(out16.astype(jnp.float32) - ref)))

    print("KERNEL_OK")
</pallas_src>

<mosaic_0001>
module attributes {stable_mosaic.version = 11 : i64} {
  func.func @_conv_stats_kernel(%arg0: i32, %arg1: i32, %arg2: i32, %arg3: memref<1x18x18x4xf32, #tpu.memory_space<vmem>>, %arg4: memref<36x128xf32, #tpu.memory_space<vmem>>, %arg5: memref<1x256x128xf32, #tpu.memory_space<vmem>>, %arg6: memref<1x1x1x128xf32, #tpu.memory_space<vmem>>, %arg7: memref<1x1x1x128xf32, #tpu.memory_space<vmem>>) attributes {dimension_semantics = [#tpu.dimension_semantics<parallel>, #tpu.dimension_semantics<parallel>, #tpu.dimension_semantics<parallel>], iteration_bounds = array<i64: 2, 1, 1>, scalar_prefetch = 0 : i64, scratch_operands = 0 : i64, tpu.core_type = #tpu.core_type<tc>, window_params = [{transform_indices = @transform_0, window_bounds = array<i64: 1, 18, 18, 4>}, {transform_indices = @transform_1, window_bounds = array<i64: 36, 128>}, {transform_indices = @transform_2, window_bounds = array<i64: 1, 256, 128>}, {transform_indices = @transform_3, window_bounds = array<i64: 1, 1, 1, 128>}, {transform_indices = @transform_4, window_bounds = array<i64: 1, 1, 1, 128>}]} {
    %c16_i32 = arith.constant 16 : i32
    %0 = arith.muli %arg1, %c16_i32 : i32
    %1 = tpu.assume_multiple %0, 8 : i32
    %c0 = arith.constant 0 : index
    %2 = arith.index_cast %1 : i32 to index
    %c0_0 = arith.constant 0 : index
    %c0_1 = arith.constant 0 : index
    %3 = vector.load %arg3[%c0, %2, %c0_0, %c0_1] : memref<1x18x18x4xf32, #tpu.memory_space<vmem>>, vector<1x18x18x4xf32>
    %4 = vector.shape_cast %3 : vector<1x18x18x4xf32> to vector<18x18x4xf32>
    %5 = vector.extract_strided_slice %4 {offsets = [0, 0, 0], sizes = [16, 16, 4], strides = [1, 1, 1]} : vector<18x18x4xf32> to vector<16x16x4xf32>
    %6 = vector.shape_cast %5 : vector<16x16x4xf32> to vector<256x4xf32>
    %7 = vector.extract_strided_slice %4 {offsets = [0, 1, 0], sizes = [16, 16, 4], strides = [1, 1, 1]} : vector<18x18x4xf32> to vector<16x16x4xf32>
    %8 = vector.shape_cast %7 : vector<16x16x4xf32> to vector<256x4xf32>
    %9 = vector.extract_strided_slice %4 {offsets = [0, 2, 0], sizes = [16, 16, 4], strides = [1, 1, 1]} : vector<18x18x4xf32> to vector<16x16x4xf32>
    %10 = vector.shape_cast %9 : vector<16x16x4xf32> to vector<256x4xf32>
    %11 = vector.extract_strided_slice %4 {offsets = [1, 0, 0], sizes = [16, 16, 4], strides = [1, 1, 1]} : vector<18x18x4xf32> to vector<16x16x4xf32>
    %12 = vector.shape_cast %11 : vector<16x16x4xf32> to vector<256x4xf32>
    %13 = vector.extract_strided_slice %4 {offsets = [1, 1, 0], sizes = [16, 16, 4], strides = [1, 1, 1]} : vector<18x18x4xf32> to vector<16x16x4xf32>
    %14 = vector.shape_cast %13 : vector<16x16x4xf32> to vector<256x4xf32>
    %15 = vector.extract_strided_slice %4 {offsets = [1, 2, 0], sizes = [16, 16, 4], strides = [1, 1, 1]} : vector<18x18x4xf32> to vector<16x16x4xf32>
    %16 = vector.shape_cast %15 : vector<16x16x4xf32> to vector<256x4xf32>
    %17 = vector.extract_strided_slice %4 {offsets = [2, 0, 0], sizes = [16, 16, 4], strides = [1, 1, 1]} : vector<18x18x4xf32> to vector<16x16x4xf32>
    %18 = vector.shape_cast %17 : vector<16x16x4xf32> to vector<256x4xf32>
    %19 = vector.extract_strided_slice %4 {offsets = [2, 1, 0], sizes = [16, 16, 4], strides = [1, 1, 1]} : vector<18x18x4xf32> to vector<16x16x4xf32>
    %20 = vector.shape_cast %19 : vector<16x16x4xf32> to vector<256x4xf32>
    %21 = vector.extract_strided_slice %4 {offsets = [2, 2, 0], sizes = [16, 16, 4], strides = [1, 1, 1]} : vector<18x18x4xf32> to vector<16x16x4xf32>
    %22 = vector.shape_cast %21 : vector<16x16x4xf32> to vector<256x4xf32>
    %23 = tpu.concatenate %6, %8, %10, %12, %14, %16, %18, %20, %22 in 1 : vector<256x4xf32>, vector<256x4xf32>, vector<256x4xf32>, vector<256x4xf32>, vector<256x4xf32>, vector<256x4xf32>, vector<256x4xf32>, vector<256x4xf32>, vector<256x4xf32> -> vector<256x36xf32>
    %c0_2 = arith.constant 0 : index
    %c0_3 = arith.constant 0 : index
    %24 = vector.load %arg4[%c0_2, %c0_3] : memref<36x128xf32, #tpu.memory_space<vmem>>, vector<36x128xf32>
    %cst = arith.constant dense<0.000000e+00> : vector<256x128xf32>
    %25 = tpu.matmul %23, %24, %cst {dimension_numbers = #tpu.dot_dimension_numbers<[1], [0], [0], [1], [0, 0, 1, 1], [], []>} : vector<256x36xf32>, vector<36x128xf32>, vector<256x128xf32> -> vector<256x128xf32>
    %26 = vector.shape_cast %25 : vector<256x128xf32> to vector<1x256x128xf32>
    %c0_4 = arith.constant 0 : index
    %c0_5 = arith.constant 0 : index
    %c0_6 = arith.constant 0 : index
    %27 = vector.load %arg5[%c0_4, %c0_5, %c0_6] : memref<1x256x128xf32, #tpu.memory_space<vmem>>, vector<1x256x128xf32>
    tpu.vector_store %arg5[%c0_4, %c0_5, %c0_6], %26 {strides = array<i32>} : memref<1x256x128xf32, #tpu.memory_space<vmem>>, vector<1x256x128xf32>,
    %cst_7 = arith.constant dense<0.000000e+00> : vector<128xf32>
    %28 = vector.multi_reduction <add>, %25, %cst_7 [0] : vector<256x128xf32> to vector<128xf32>
    %29 = vector.shape_cast %28 : vector<128xf32> to vector<1x128xf32>
    %cst_8 = arith.constant 2.560000e+02 : f32
    %30 = vector.broadcast %cst_8 : f32 to vector<1x128xf32>
    %31 = arith.divf %29, %30 : vector<1x128xf32>
    %32 = vector.broadcast %31 : vector<1x128xf32> to vector<256x128xf32>
    %33 = arith.subf %25, %32 : vector<256x128xf32>
    %34 = vector.shape_cast %31 : vector<1x128xf32> to vector<1x1x1x128xf32>
    %c0_9 = arith.constant 0 : index
    %c0_10 = arith.constant 0 : index
    %c0_11 = arith.constant 0 : index
    %c0_12 = arith.constant 0 : index
    %35 = vector.load %arg6[%c0_9, %c0_10, %c0_11, %c0_12] : memref<1x1x1x128xf32, #tpu.memory_space<vmem>>, vector<1x1x1x128xf32>
    tpu.vector_store %arg6[%c0_9, %c0_10, %c0_11, %c0_12], %34 {strides = array<i32>} : memref<1x1x1x128xf32, #tpu.memory_space<vmem>>, vector<1x1x1x128xf32>,
    %36 = arith.mulf %33, %33 : vector<256x128xf32>
    %cst_13 = arith.constant dense<0.000000e+00> : vector<128xf32>
    %37 = vector.multi_reduction <add>, %36, %cst_13 [0] : vector<256x128xf32> to vector<128xf32>
    %38 = vector.shape_cast %37 : vector<128xf32> to vector<1x128xf32>
    %39 = vector.shape_cast %38 : vector<1x128xf32> to vector<1x1x1x128xf32>
    %c0_14 = arith.constant 0 : index
    %c0_15 = arith.constant 0 : index
    %c0_16 = arith.constant 0 : index
    %c0_17 = arith.constant 0 : index
    %40 = vector.load %arg7[%c0_14, %c0_15, %c0_16, %c0_17] : memref<1x1x1x128xf32, #tpu.memory_space<vmem>>, vector<1x1x1x128xf32>
    tpu.vector_store %arg7[%c0_14, %c0_15, %c0_16, %c0_17], %39 {strides = array<i32>} : memref<1x1x1x128xf32, #tpu.memory_space<vmem>>, vector<1x1x1x128xf32>,
    return
  }
  func.func @transform_0(%arg0: i32, %arg1: i32, %arg2: i32) -> (i32, i32, i32, i32) {
    %c0_i32 = arith.constant 0 : i32
    %c0_i32_0 = arith.constant 0 : i32
    %c0_i32_1 = arith.constant 0 : i32
    %c0_i32_2 = arith.constant 0 : i32
    return %arg0, %c0_i32, %c0_i32_0, %c0_i32_1 : i32, i32, i32, i32
  }
  func.func @transform_1(%arg0: i32, %arg1: i32, %arg2: i32) -> (i32, i32) {
    %c0_i32 = arith.constant 0 : i32
    %c0_i32_0 = arith.constant 0 : i32
    return %c0_i32, %arg2 : i32, i32
  }
  func.func @transform_2(%arg0: i32, %arg1: i32, %arg2: i32) -> (i32, i32, i32) {
    %c0_i32 = arith.constant 0 : i32
    return %arg0, %arg1, %arg2 : i32, i32, i32
  }
  func.func @transform_3(%arg0: i32, %arg1: i32, %arg2: i32) -> (i32, i32, i32, i32) {
    %c0_i32 = arith.constant 0 : i32
    %c0_i32_0 = arith.constant 0 : i32
    return %arg0, %arg1, %c0_i32, %arg2 : i32, i32, i32, i32
  }
  func.func @transform_4(%arg0: i32, %arg1: i32, %arg2: i32) -> (i32, i32, i32, i32) {
    %c0_i32 = arith.constant 0 : i32
    %c0_i32_0 = arith.constant 0 : i32
    return %arg0, %arg1, %c0_i32, %arg2 : i32, i32, i32, i32
  }
}

module attributes {stable_mosaic.version = 11 : i64} {
  func.func @_bn_lrelu_nchw_kernel(%arg0: i32, %arg1: i32, %arg2: memref<1x256x128xf32, #tpu.memory_space<vmem>>, %arg3: memref<1x128xf32, #tpu.memory_space<vmem>>, %arg4: memref<1x128xf32, #tpu.memory_space<vmem>>, %arg5: memref<1x8x256xf32, #tpu.memory_space<vmem>>) attributes {dimension_semantics = [#tpu.dimension_semantics<parallel>, #tpu.dimension_semantics<parallel>], iteration_bounds = array<i64: 2, 1>, scalar_prefetch = 0 : i64, scratch_operands = 0 : i64, tpu.core_type = #tpu.core_type<tc>, window_params = [{transform_indices = @transform_0, window_bounds = array<i64: 1, 256, 128>}, {pipeline_mode = #tpu.pipeline_mode<synchronous>, transform_indices = @transform_1, window_bounds = array<i64: 1, 128>}, {pipeline_mode = #tpu.pipeline_mode<synchronous>, transform_indices = @transform_2, window_bounds = array<i64: 1, 128>}, {transform_indices = @transform_3, window_bounds = array<i64: 1, 8, 256>}]} {
    %c0 = arith.constant 0 : index
    %c0_0 = arith.constant 0 : index
    %c0_1 = arith.constant 0 : index
    %0 = vector.load %arg2[%c0, %c0_0, %c0_1] : memref<1x256x128xf32, #tpu.memory_space<vmem>>, vector<1x256x128xf32>
    %1 = vector.shape_cast %0 : vector<1x256x128xf32> to vector<256x128xf32>
    %c0_2 = arith.constant 0 : index
    %c0_3 = arith.constant 0 : index
    %2 = vector.load %arg3[%c0_2, %c0_3] : memref<1x128xf32, #tpu.memory_space<vmem>>, vector<1x128xf32>
    %3 = vector.broadcast %2 : vector<1x128xf32> to vector<256x128xf32>
    %4 = arith.mulf %1, %3 : vector<256x128xf32>
    %c0_4 = arith.constant 0 : index
    %c0_5 = arith.constant 0 : index
    %5 = vector.load %arg4[%c0_4, %c0_5] : memref<1x128xf32, #tpu.memory_space<vmem>>, vector<1x128xf32>
    %6 = vector.broadcast %5 : vector<1x128xf32> to vector<256x128xf32>
    %7 = arith.addf %4, %6 : vector<256x128xf32>
    %cst = arith.constant 0.000000e+00 : f32
    %8 = vector.broadcast %cst : f32 to vector<256x128xf32>
    %9 = arith.cmpf ogt, %7, %8 : vector<256x128xf32>
    %cst_6 = arith.constant 1.000000e-01 : f32
    %10 = vector.broadcast %cst_6 : f32 to vector<256x128xf32>
    %11 = arith.mulf %10, %7 : vector<256x128xf32>
    %12 = arith.select %9, %7, %11 : vector<256x128xi1>, vector<256x128xf32>
    %13 = tpu.transpose %12, [1, 0] : vector<256x128xf32> -> vector<128x256xf32>
    %14 = vector.extract_strided_slice %13 {offsets = [0, 0], sizes = [8, 256], strides = [1, 1]} : vector<128x256xf32> to vector<8x256xf32>
    %15 = vector.shape_cast %14 : vector<8x256xf32> to vector<1x8x256xf32>
    %c0_7 = arith.constant 0 : index
    %c0_8 = arith.constant 0 : index
    %c0_9 = arith.constant 0 : index
    %16 = vector.load %arg5[%c0_7, %c0_8, %c0_9] : memref<1x8x256xf32, #tpu.memory_space<vmem>>, vector<1x8x256xf32>
    tpu.vector_store %arg5[%c0_7, %c0_8, %c0_9], %15 {strides = array<i32>} : memref<1x8x256xf32, #tpu.memory_space<vmem>>, vector<1x8x256xf32>,
    return
  }
  func.func @transform_0(%arg0: i32, %arg1: i32) -> (i32, i32, i32) {
    %c0_i32 = arith.constant 0 : i32
    %c0_i32_0 = arith.constant 0 : i32
    return %arg0, %arg1, %c0_i32 : i32, i32, i32
  }
  func.func @transform_1(%arg0: i32, %arg1: i32) -> (i32, i32) {
    %c0_i32 = arith.constant 0 : i32
    %c0_i32_0 = arith.constant 0 : i32
    %c0_i32_1 = arith.constant 0 : i32
    return %c0_i32, %c0_i32_0 : i32, i32
  }
  func.func @transform_2(%arg0: i32, %arg1: i32) -> (i32, i32) {
    %c0_i32 = arith.constant 0 : i32
    %c0_i32_0 = arith.constant 0 : i32
    %c0_i32_1 = arith.constant 0 : i32
    return %c0_i32, %c0_i32_0 : i32, i32
  }
  func.func @transform_3(%arg0: i32, %arg1: i32) -> (i32, i32, i32) {
    %c0_i32 = arith.constant 0 : i32
    %c0_i32_0 = arith.constant 0 : i32
    return %arg0, %c0_i32, %arg1 : i32, i32, i32
  }
}

</mosaic_0001>

<bundles_post_ra>
// kernel: basic_block_forward.3
= control target key start
LH: loop header
LB: loop body
LE: loop exit
PB: predicated region body
PF: predicated region fallthrough
CT: control target
= control target key end

     0   :  { %s646_s12 = smov 0   ;;  %s648_s13 = smov 0   ;;  %s791_s0 = inlined_call_operand.vmem [shape: f32[2,256,128], index: 0, kind: input, shape index: {}]   ;;  %s792_s1 = inlined_call_operand.vmem [shape: f32[1,128], index: 1, kind: input, shape index: {}]   ;;  %s793_s2 = inlined_call_operand.vmem [shape: f32[1,128], index: 2, kind: input, shape index: {}]   ;;  %s794_s3 = inlined_call_operand.vmem [shape: f32[2,8,256], index: 3, kind: output, shape index: {}]  }
   0x1   :  { %s650_s14 = smov 0  }
   0x2 LB: > { %s25_s15 = sadd.s32 1, %s620_s13  ;;  %p567_p0 = scmp.ge.s32.totalorder %s624_s14, 1  ;;  %s624_s14 = sphi %s650_s14, %s13_s14   ;;  %s620_s13 = sphi %s648_s13, %s796_s13   ;;  %s616_s12 = sphi %s646_s12, %s795_s12  }
   0x3   : > { %p27_p1 = scmp.ge.s32.totalorder %s25_s15, 2  ;;  %p158_p2 = scmp.lt.s32.totalorder %s624_s14, 3 }
   0x5   : > { %s798_s15 = smov (%p27_p1, %s25_s15), 0  ;;  %p159_p3 = pnand %p567_p0, %p158_p2 }
   0x6   : > { %p191_p4 = scmp.lt.s32.totalorder (!%p159_p3), %s616_s12, 1 }
   0x7   : > { %162 = sbr.rel (%p159_p3) target bundleno = 190 (0xbe), region = 32 }
   0xc   : > { %s800_s12 = smov (!%p191_p4, %s616_s12), 1  ;;  %v669_v0 = vld [vmem:[%s792_s1] ss:$0 sm:$0xff] }
   0xd   : > { %s574_s18 = sshll.u32 %s800_s12, 8  ;;  %v680_v1 = vld [vmem:[%s793_s2] ss:$0 sm:$0xff]  ;;  %s575_s24 = sshll.u32 %s800_s12, 4 }
   0xe   : > { %s675_s21 = scalar_lea.vmem %s791_s0, %s574_s18  ;;  %s208_s27 = scalar_lea.vmem %s794_s3, %s575_s24 }
   0xf   : > { %v226_v2 = vld [vmem:[%s675_s21 + $0x80] sm:$0xff]  ;;  %v227_v4 = vld [vmem:[%s675_s21 + $0x88] sm:$0xff]  ;;  %v228_v16 = vld [vmem:[%s675_s21 + $0x90] sm:$0xff] }
  0x10   : > { %v210_v3 = vld [vmem:[%s675_s21] sm:$0xff]  ;;  %v262_v5 = vmul.f32 %v669_v0, %v226_v2  ;;  %v263_v7 = vmul.f32 %v669_v0, %v227_v4  ;;  %v211_v8 = vld [vmem:[%s675_s21 + $0x8] sm:$0xff]  ;;  %v212_v17 = vld [vmem:[%s675_s21 + $0x10] sm:$0xff]  ;;  %v264_v22 = vmul.f32 %v669_v0, %v228_v16 }
  0x11   : > { %v246_v6 = vmul.f32 %v669_v0, %v210_v3  ;;  %v247_v9 = vmul.f32 %v669_v0, %v211_v8  ;;  %v248_v23 = vmul.f32 %v669_v0, %v212_v17  ;;  %v229_v28 = vld [vmem:[%s675_s21 + $0x98] sm:$0xff]  ;;  %v230_v38 = vld [vmem:[%s675_s21 + $0xa0] sm:$0xff]  ;;  %v231_v48 = vld [vmem:[%s675_s21 + $0xa8] sm:$0xff] }
  0x12   : > { %v298_v10 = vadd.f32 %v680_v1, %v262_v5  ;;  %v299_v12 = vadd.f32 %v680_v1, %v263_v7  ;;  %v300_v26 = vadd.f32 %v680_v1, %v264_v22  ;;  %v213_v29 = vld [vmem:[%s675_s21 + $0x18] sm:$0xff]  ;;  %v265_v32 = vmul.f32 %v669_v0, %v229_v28  ;;  %v214_v39 = vld [vmem:[%s675_s21 + $0x20] sm:$0xff]  ;;  %v215_v49 = vld [vmem:[%s675_s21 + $0x28] sm:$0xff] }
  0x13   : > { %v282_v11 = vadd.f32 %v680_v1, %v246_v6  ;;  %v283_v13 = vadd.f32 %v680_v1, %v247_v9  ;;  %v284_v27 = vadd.f32 %v680_v1, %v248_v23  ;;  %v249_v33 = vmul.f32 %v669_v0, %v213_v29  ;;  %v232_v58 = vld [vmem:[%s675_s21 + $0xb0] sm:$0xff]  ;;  %v233_v6 = vld [vmem:[%s675_s21 + $0xb8] sm:$0xff]  ;;  %v234_v16 = vld [vmem:[%s675_s21 + $0xc0] sm:$0xff] }
  0x14   : > { %vm330_vm0 = vcmp.gt.f32.partialorder %v298_v10, 0.0  ;;  %v362_v14 = vmul.f32 0.1, %v298_v10  ;;  %v363_v20 = vmul.f32 0.1, %v299_v12  ;;  %vm331_vm2 = vcmp.gt.f32.partialorder %v299_v12, 0.0 }
  0x15   : > { %vm314_vm1 = vcmp.gt.f32.partialorder %v282_v11, 0.0  ;;  %v346_v15 = vmul.f32 0.1, %v282_v11  ;;  %v347_v21 = vmul.f32 0.1, %v283_v13  ;;  %vm315_vm3 = vcmp.gt.f32.partialorder %v283_v13, 0.0 }
  0x16   : > { %v394_v18 = vsel %vm330_vm0, %v298_v10, %v362_v14  ;;  %v395_v24 = vsel %vm331_vm2, %v299_v12, %v363_v20  ;;  %v364_v30 = vmul.f32 0.1, %v300_v26  ;;  %v348_v31 = vmul.f32 0.1, %v284_v27  ;;  %v216_v59 = vld [vmem:[%s675_s21 + $0x30] sm:$0xff]  ;;  %v217_v7 = vld [vmem:[%s675_s21 + $0x38] sm:$0xff] }
  0x17   : > { %v378_v19 = vsel %vm314_vm1, %v282_v11, %v346_v15  ;;  %442 = vxpose.xlu1.b32.start [1/16] (narrow) %v394_v18, 8  ;;  %v379_v25 = vsel %vm315_vm3, %v283_v13, %v347_v21  ;;  %vm332_vm4 = vcmp.gt.f32.partialorder %v300_v26, 0.0  ;;  %vm316_vm5 = vcmp.gt.f32.partialorder %v284_v27, 0.0  ;;  %v218_v17 = vld [vmem:[%s675_s21 + $0x40] sm:$0xff] }
  0x18   : > { %410 = vxpose.xlu0.b32.start [1/16] (narrow) %v378_v19, 8  ;;  %v396_v34 = vsel %vm332_vm4, %v300_v26, %v364_v30  ;;  %v380_v35 = vsel %vm316_vm5, %v284_v27, %v348_v31  ;;  %v301_v36 = vadd.f32 %v680_v1, %v265_v32  ;;  %v285_v37 = vadd.f32 %v680_v1, %v249_v33  ;;  %v235_v26 = vld [vmem:[%s675_s21 + $0xc8] sm:$0xff] }
  0x19   : > { %v266_v42 = vmul.f32 %v669_v0, %v230_v38  ;;  %v250_v43 = vmul.f32 %v669_v0, %v214_v39  ;;  %v267_v52 = vmul.f32 %v669_v0, %v231_v48  ;;  %v251_v53 = vmul.f32 %v669_v0, %v215_v49  ;;  %v219_v27 = vld [vmem:[%s675_s21 + $0x48] sm:$0xff] }
  0x1a   : > { %v365_v40 = vmul.f32 0.1, %v301_v36  ;;  %v349_v41 = vmul.f32 0.1, %v285_v37  ;;  %vm333_vm6 = vcmp.gt.f32.partialorder %v301_v36, 0.0  ;;  %vm317_vm7 = vcmp.gt.f32.partialorder %v285_v37, 0.0 }
  0x1b   : > { %v302_v46 = vadd.f32 %v680_v1, %v266_v42  ;;  %v286_v47 = vadd.f32 %v680_v1, %v250_v43  ;;  %v303_v56 = vadd.f32 %v680_v1, %v267_v52  ;;  %v287_v57 = vadd.f32 %v680_v1, %v251_v53 }
  0x1c   : > { %v397_v44 = vsel %vm333_vm6, %v301_v36, %v365_v40  ;;  %v381_v45 = vsel %vm317_vm7, %v285_v37, %v349_v41  ;;  %v268_v62 = vmul.f32 %v669_v0, %v232_v58  ;;  %v252_v63 = vmul.f32 %v669_v0, %v216_v59  ;;  %v236_v36 = vld [vmem:[%s675_s21 + $0xd0] sm:$0xff] }
  0x1d   : > { %v366_v50 = vmul.f32 0.1, %v302_v46  ;;  %v350_v51 = vmul.f32 0.1, %v286_v47  ;;  %vm334_vm8 = vcmp.gt.f32.partialorder %v302_v46, 0.0  ;;  %vm318_vm9 = vcmp.gt.f32.partialorder %v286_v47, 0.0 }
  0x1e   : > { %v367_v60 = vmul.f32 0.1, %v303_v56  ;;  %v351_v61 = vmul.f32 0.1, %v287_v57  ;;  %vm335_vm10 = vcmp.gt.f32.partialorder %v303_v56, 0.0  ;;  %vm319_vm11 = vcmp.gt.f32.partialorder %v287_v57, 0.0 }
  0x1f   : > { %443 = vxpose.xlu1.b32.cont [2/16] (narrow) %v395_v24, 8  ;;  %v398_v54 = vsel %vm334_vm8, %v302_v46, %v366_v50  ;;  %v382_v55 = vsel %vm318_vm9, %v286_v47, %v350_v51  ;;  %v304_v4 = vadd.f32 %v680_v1, %v268_v62  ;;  %v288_v5 = vadd.f32 %v680_v1, %v252_v63  ;;  %v220_v37 = vld [vmem:[%s675_s21 + $0x50] sm:$0xff]  ;;  %v237_v46 = vld [vmem:[%s675_s21 + $0xd8] sm:$0xff] }
  0x20   : > { %411 = vxpose.xlu0.b32.cont [2/16] (narrow) %v379_v25, 8  ;;  %v399_v2 = vsel %vm335_vm10, %v303_v56, %v367_v60  ;;  %v383_v3 = vsel %vm319_vm11, %v287_v57, %v351_v61  ;;  %v269_v10 = vmul.f32 %v669_v0, %v233_v6  ;;  %v253_v11 = vmul.f32 %v669_v0, %v217_v7  ;;  %v221_v47 = vld [vmem:[%s675_s21 + $0x58] sm:$0xff]  ;;  %v238_v56 = vld [vmem:[%s675_s21 + $0xe0] sm:$0xff] }
  0x21   : > { %v368_v8 = vmul.f32 0.1, %v304_v4  ;;  %v352_v9 = vmul.f32 0.1, %v288_v5  ;;  %vm336_vm12 = vcmp.gt.f32.partialorder %v304_v4, 0.0  ;;  %vm320_vm13 = vcmp.gt.f32.partialorder %v288_v5, 0.0 }
  0x22   : > { %v305_v14 = vadd.f32 %v680_v1, %v269_v10  ;;  %v289_v15 = vadd.f32 %v680_v1, %v253_v11  ;;  %v270_v20 = vmul.f32 %v669_v0, %v234_v16  ;;  %v254_v21 = vmul.f32 %v669_v0, %v218_v17  ;;  %v222_v57 = vld [vmem:[%s675_s21 + $0x60] sm:$0xff] }
  0x23   : > { %v400_v12 = vsel %vm336_vm12, %v304_v4, %v368_v8  ;;  %v384_v13 = vsel %vm320_vm13, %v288_v5, %v352_v9  ;;  %v271_v30 = vmul.f32 %v669_v0, %v235_v26  ;;  %v255_v31 = vmul.f32 %v669_v0, %v219_v27  ;;  %v239_v4 = vld [vmem:[%s675_s21 + $0xe8] sm:$0xff] }
  0x24   : > { %v369_v18 = vmul.f32 0.1, %v305_v14  ;;  %v353_v19 = vmul.f32 0.1, %v289_v15  ;;  %vm337_vm14 = vcmp.gt.f32.partialorder %v305_v14, 0.0  ;;  %vm321_vm15 = vcmp.gt.f32.partialorder %v289_v15, 0.0 }
  0x25   : > { %v306_v24 = vadd.f32 %v680_v1, %v270_v20  ;;  %v290_v25 = vadd.f32 %v680_v1, %v254_v21  ;;  %v272_v40 = vmul.f32 %v669_v0, %v236_v36  ;;  %v256_v41 = vmul.f32 %v669_v0, %v220_v37  ;;  %v223_v5 = vld [vmem:[%s675_s21 + $0x68] sm:$0xff] }
  0x26   : > { %v401_v22 = vsel %vm337_vm14, %v305_v14, %v369_v18  ;;  %v385_v23 = vsel %vm321_vm15, %v289_v15, %v353_v19  ;;  %v273_v50 = vmul.f32 %v669_v0, %v237_v46  ;;  %v257_v51 = vmul.f32 %v669_v0, %v221_v47  ;;  %v240_v14 = vld [vmem:[%s675_s21 + $0xf0] sm:$0xff] }
  0x27   : > { %444 = vxpose.xlu1.b32.cont [3/16] (narrow) %v396_v34, 8  ;;  %v370_v28 = vmul.f32 0.1, %v306_v24  ;;  %v354_v29 = vmul.f32 0.1, %v290_v25  ;;  %vm338_vm0 = vcmp.gt.f32.partialorder %v306_v24, 0.0  ;;  %v307_v34 = vadd.f32 %v680_v1, %v271_v30 }
  0x28   : > { %412 = vxpose.xlu0.b32.cont [3/16] (narrow) %v380_v35, 8  ;;  %vm322_vm1 = vcmp.gt.f32.partialorder %v290_v25, 0.0  ;;  %v291_v35 = vadd.f32 %v680_v1, %v255_v31  ;;  %v274_v60 = vmul.f32 %v669_v0, %v238_v56  ;;  %v258_v61 = vmul.f32 %v669_v0, %v222_v57  ;;  %v224_v15 = vld [vmem:[%s675_s21 + $0x70] sm:$0xff] }
  0x29   : > { %v402_v32 = vsel %vm338_vm0, %v306_v24, %v370_v28  ;;  %v386_v33 = vsel %vm322_vm1, %v290_v25, %v354_v29  ;;  %v371_v38 = vmul.f32 0.1, %v307_v34  ;;  %vm339_vm2 = vcmp.gt.f32.partialorder %v307_v34, 0.0  ;;  %v241_v24 = vld [vmem:[%s675_s21 + $0xf8] sm:$0xff] }
  0x2a   : > { %v355_v39 = vmul.f32 0.1, %v291_v35  ;;  %vm323_vm3 = vcmp.gt.f32.partialorder %v291_v35, 0.0  ;;  %v275_v8 = vmul.f32 %v669_v0, %v239_v4  ;;  %v259_v9 = vmul.f32 %v669_v0, %v223_v5  ;;  %v225_v25 = vld [vmem:[%s675_s21 + $0x78] sm:$0xff] }
  0x2b   : > { %v403_v42 = vsel %vm339_vm2, %v307_v34, %v371_v38  ;;  %v276_v18 = vmul.f32 %v669_v0, %v240_v14  ;;  %v260_v19 = vmul.f32 %v669_v0, %v224_v15  ;;  %v277_v28 = vmul.f32 %v669_v0, %v241_v24 }
  0x2c   : > { %v387_v43 = vsel %vm323_vm3, %v291_v35, %v355_v39  ;;  %v261_v29 = vmul.f32 %v669_v0, %v225_v25 }
  0x2f   : > { %445 = vxpose.xlu1.b32.cont [4/16] (narrow) %v397_v44, 8  ;;  %v308_v44 = vadd.f32 %v680_v1, %v272_v40 }
  0x30   : > { %413 = vxpose.xlu0.b32.cont [4/16] (narrow) %v381_v45, 8  ;;  %v292_v45 = vadd.f32 %v680_v1, %v256_v41 }
  0x31   : > { %v372_v48 = vmul.f32 0.1, %v308_v44  ;;  %vm340_vm4 = vcmp.gt.f32.partialorder %v308_v44, 0.0 }
  0x32   : > { %v356_v49 = vmul.f32 0.1, %v292_v45  ;;  %vm324_vm5 = vcmp.gt.f32.partialorder %v292_v45, 0.0 }
  0x33   : > { %v404_v52 = vsel %vm340_vm4, %v308_v44, %v372_v48 }
  0x34   : > { %v388_v53 = vsel %vm324_vm5, %v292_v45, %v356_v49 }
  0x37   : > { %446 = vxpose.xlu1.b32.cont [5/16] (narrow) %v398_v54, 8  ;;  %v309_v54 = vadd.f32 %v680_v1, %v273_v50 }
  0x38   : > { %414 = vxpose.xlu0.b32.cont [5/16] (narrow) %v382_v55, 8  ;;  %v293_v55 = vadd.f32 %v680_v1, %v257_v51 }
  0x39   : > { %v373_v58 = vmul.f32 0.1, %v309_v54  ;;  %vm341_vm6 = vcmp.gt.f32.partialorder %v309_v54, 0.0 }
  0x3a   : > { %v357_v59 = vmul.f32 0.1, %v293_v55  ;;  %vm325_vm7 = vcmp.gt.f32.partialorder %v293_v55, 0.0 }
  0x3b   : > { %v405_v62 = vsel %vm341_vm6, %v309_v54, %v373_v58 }
  0x3c   : > { %v389_v63 = vsel %vm325_vm7, %v293_v55, %v357_v59 }
  0x3f   : > { %447 = vxpose.xlu1.b32.cont [6/16] (narrow) %v399_v2, 8  ;;  %v310_v2 = vadd.f32 %v680_v1, %v274_v60 }
  0x40   : > { %415 = vxpose.xlu0.b32.cont [6/16] (narrow) %v383_v3, 8  ;;  %v294_v3 = vadd.f32 %v680_v1, %v258_v61 }
  0x41   : > { %v374_v6 = vmul.f32 0.1, %v310_v2  ;;  %vm342_vm8 = vcmp.gt.f32.partialorder %v310_v2, 0.0 }
  0x42   : > { %v358_v7 = vmul.f32 0.1, %v294_v3  ;;  %vm326_vm9 = vcmp.gt.f32.partialorder %v294_v3, 0.0 }
  0x43   : > { %v406_v10 = vsel %vm342_vm8, %v310_v2, %v374_v6 }
  0x44   : > { %v390_v11 = vsel %vm326_vm9, %v294_v3, %v358_v7 }
  0x47   : > { %448 = vxpose.xlu1.b32.cont [7/16] (narrow) %v400_v12, 8  ;;  %v311_v12 = vadd.f32 %v680_v1, %v275_v8 }
  0x48   : > { %416 = vxpose.xlu0.b32.cont [7/16] (narrow) %v384_v13, 8  ;;  %v295_v13 = vadd.f32 %v680_v1, %v259_v9 }
  0x49   : > { %v375_v16 = vmul.f32 0.1, %v311_v12  ;;  %vm343_vm10 = vcmp.gt.f32.partialorder %v311_v12, 0.0 }
  0x4a   : > { %v359_v17 = vmul.f32 0.1, %v295_v13  ;;  %vm327_vm11 = vcmp.gt.f32.partialorder %v295_v13, 0.0 }
  0x4b   : > { %v407_v20 = vsel %vm343_vm10, %v311_v12, %v375_v16 }
  0x4c   : > { %v391_v21 = vsel %vm327_vm11, %v295_v13, %v359_v17 }
  0x4f   : > { %449 = vxpose.xlu1.b32.cont [8/16] (narrow) %v401_v22, 8  ;;  %v312_v22 = vadd.f32 %v680_v1, %v276_v18 }
  0x50   : > { %417 = vxpose.xlu0.b32.cont [8/16] (narrow) %v385_v23, 8  ;;  %v296_v23 = vadd.f32 %v680_v1, %v260_v19 }
  0x51   : > { %v376_v26 = vmul.f32 0.1, %v312_v22  ;;  %vm344_vm12 = vcmp.gt.f32.partialorder %v312_v22, 0.0 }
  0x52   : > { %v360_v27 = vmul.f32 0.1, %v296_v23  ;;  %vm328_vm13 = vcmp.gt.f32.partialorder %v296_v23, 0.0 }
  0x53   : > { %v408_v30 = vsel %vm344_vm12, %v312_v22, %v376_v26 }
  0x54   : > { %v392_v31 = vsel %vm328_vm13, %v296_v23, %v360_v27 }
  0x57   : > { %450 = vxpose.xlu1.b32.cont [9/16] (narrow) %v402_v32, 8  ;;  %v313_v32 = vadd.f32 %v680_v1, %v277_v28 }
  0x58   : > { %418 = vxpose.xlu0.b32.cont [9/16] (narrow) %v386_v33, 8  ;;  %v297_v33 = vadd.f32 %v680_v1, %v261_v29 }
  0x59   : > { %v377_v34 = vmul.f32 0.1, %v313_v32  ;;  %vm345_vm14 = vcmp.gt.f32.partialorder %v313_v32, 0.0 }
  0x5a   : > { %v361_v35 = vmul.f32 0.1, %v297_v33  ;;  %vm329_vm15 = vcmp.gt.f32.partialorder %v297_v33, 0.0 }
  0x5b   : > { %v409_v36 = vsel %vm345_vm14, %v313_v32, %v377_v34 }
  0x5c   : > { %v393_v37 = vsel %vm329_vm15, %v297_v33, %v361_v35 }
  0x5f   : > { %451 = vxpose.xlu1.b32.cont [10/16] (narrow) %v403_v42, 8 }
  0x60   : > { %419 = vxpose.xlu0.b32.cont [10/16] (narrow) %v387_v43, 8 }
  0x67   : > { %452 = vxpose.xlu1.b32.cont [11/16] (narrow) %v404_v52, 8 }
  0x68   : > { %420 = vxpose.xlu0.b32.cont [11/16] (narrow) %v388_v53, 8 }
  0x6f   : > { %453 = vxpose.xlu1.b32.cont [12/16] (narrow) %v405_v62, 8 }
  0x70   : > { %421 = vxpose.xlu0.b32.cont [12/16] (narrow) %v389_v63, 8 }
  0x77   : > { %454 = vxpose.xlu1.b32.cont [13/16] (narrow) %v406_v10, 8 }
  0x78   : > { %422 = vxpose.xlu0.b32.cont [13/16] (narrow) %v390_v11, 8 }
  0x7f   : > { %455 = vxpose.xlu1.b32.cont [14/16] (narrow) %v407_v20, 8 }
  0x80   : > { %423 = vxpose.xlu0.b32.cont [14/16] (narrow) %v391_v21, 8 }
  0x87   : > { %456 = vxpose.xlu1.b32.cont [15/16] (narrow) %v408_v30, 8 }
  0x88   : > { %424 = vxpose.xlu0.b32.cont [15/16] (narrow) %v392_v31, 8 }
  0x8f   : > { %457 = vxpose.xlu1.b32.end [16/16] (narrow) %v409_v36, 8 }
  0x90   : > { %425 = vxpose.xlu0.b32.end [16/16] (narrow) %v393_v37, 8 }
  0xbb   : > { %v458_v0 = vpop.trf.xlu1 }
  0xbc   : > { %v426_v38 = vpop.trf.xlu0  ;;  %475 = vst [vmem:[%s208_s27 + $0x8] sm:$0xff] %v458_v0 }
  0xbd   : > { %474 = vst [vmem:[%s208_s27] sm:$0xff] %v426_v38 }
  0xbe PF: > { %s13_s14 = sadd.s32 1, %s624_s14   ;;  %s795_s12 = smov %s620_s13 }
  0xbf   : > { %p10_p5 = scmp.ge.s32.totalorder %s13_s14, 4   ;;  %s796_s13 = smov %s798_s15 }
  0xc1   :  { %12 = sbr.rel (!%p10_p5) target bundleno = 2 (0x2), region = 62 }

// kernel: basic_block_forward.2
= control target key start
LH: loop header
LB: loop body
LE: loop exit
PB: predicated region body
PF: predicated region fallthrough
CT: control target
= control target key end

     0   :  { %s2414_s15 = smov 0   ;;  %s2416_s16 = smov 0   ;;  %s4459_s0 = inlined_call_operand.vmem [shape: f32[2,18,18,4], index: 0, kind: input, shape index: {}]   ;;  %s4460_s1 = inlined_call_operand.vmem [shape: f32[36,128], index: 1, kind: input, shape index: {}]   ;;  %s4461_s2 = inlined_call_operand.vmem [shape: f32[2,256,128], index: 2, kind: output, shape index: {0}]   ;;  %s4462_s3 = inlined_call_operand.vmem [shape: f32[2,1,1,128], index: 3, kind: output, shape index: {1}]   ;;  %s4463_s4 = inlined_call_operand.vmem [shape: f32[2,1,1,128], index: 4, kind: output, shape index: {2}]  }
   0x1   :  { %s2418_s17 = smov 0  }
   0x2 LB: > { %s34_s18 = sadd.s32 1, %s2374_s16  ;;  %p2232_p0 = scmp.ge.s32.totalorder %s2378_s17, 1  ;;  %s2378_s17 = sphi %s2418_s17, %s15_s17   ;;  %s2374_s16 = sphi %s2416_s16, %s4854_s16   ;;  %s2370_s15 = sphi %s2414_s15, %s4853_s15  }
   0x3   : > { %p36_p1 = scmp.ge.s32.totalorder %s34_s18, 2  ;;  %p207_p2 = scmp.lt.s32.totalorder %s2378_s17, 3 }
   0x5   : > { %s4856_s18 = smov (%p36_p1, %s34_s18), 0  ;;  %p208_p3 = pnand %p2232_p0, %p207_p2 }
   0x7   : > { %211 = sbr.rel (%p208_p3) target bundleno = 1048 (0x418), region = 28 }
   0xc   : > { %p262_p4 = scmp.lt.s32.totalorder %s2370_s15, 1  ;;  %vm407_vm0 = vcmask 1046528   ;;  %s2380_s23 = smov 4   ;;  %vm488_vm1 = vcmask 1045504   ;;  %vm1729_vm2 = vcmask 1043456   ;;  %vm1363_vm3 = vcmask 31744  }
   0xd   : > { %s2381_s24 = smov 8   ;;  %s2382_s25 = smov 12   ;;  %vm1396_vm4 = vcmask 64512   ;;  %vm1429_vm5 = vcmask 97280   ;;  %vm1495_vm6 = vcmask 162816   ;;  %vm1462_vm7 = vcmask 130048  }
   0xe   : > { %s4858_s15 = smov (!%p262_p4, %s2370_s15), 1  ;;  %s2383_s26 = smov 16   ;;  %vm1528_vm8 = vcmask 195584   ;;  %vm1561_vm9 = vcmask 228352   ;;  %vm1594_vm10 = vcmask 261120   ;;  %vm1632_vm11 = vcmask 293888  }
   0xf   : > { %s2287_s19 = smul.u32 432, %s4858_s15  ;;  %s2384_s27 = smov 20  }
  0x10   : > { %s2385_s28 = smov 24   ;;  %s2386_s29 = smov 32  }
  0x11   : > { %s2438_s22 = scalar_lea.vmem %s4459_s0, %s2287_s19  ;;  %s2387_s30 = smov 28  }
  0x12   : > { %v2441_v0 = vld [vmem:[%s2438_s22 + $0x30] sm:$0xff]  ;;  %v2444_v1 = vld [vmem:[%s2438_s22 + $0x38] sm:$0xff]  ;;  %v2452_v5 = vld [vmem:[%s2438_s22 + $0x20] sm:$0xff]  ;;  %s2271_s19 = sshll.u32 %s4858_s15, 8 }
  0x13   : > { %v2447_v2 = vld [vmem:[%s2438_s22 + $0x18] sm:$0xff]  ;;  %v418_v3 = vrot.slane %v2441_v0, 1  ;;  %v419_v4 = vrot.slane %v2444_v1, 1  ;;  %v2456_v7 = vld [vmem:[%s2438_s22] sm:$0xff]  ;;  %v2459_v8 = vld [vmem:[%s2438_s22 + $0x8] sm:$0xff]  ;;  %v414_v9 = vrot.slane %v2452_v5, 1 }
  0x14   : > { %v413_v6 = vrot.slane %v2447_v2, 1  ;;  %v408_v10 = vrot.slane %v2456_v7, 1  ;;  %v409_v11 = vrot.slane %v2459_v8, 1  ;;  %v2465_v12 = vld [vmem:[%s2438_s22 + $0x40] sm:$0x3]  ;;  %v2499_v25 = vld [vmem:[%s2438_s22 + $0x68] sm:$0xff] }
  0x15   : > { %v2468_v13 = vsel %vm407_vm0, %v418_v3, %v419_v4  ;;  %v2471_v14 = vld [vmem:[%s2438_s22 + $0x28] sm:$0x3]  ;;  %v2474_v15 = vld [vmem:[%s2438_s22 + $0x10] sm:$0x3]  ;;  %v421_v18 = vrot.slane %v2465_v12, 1  ;;  %v2496_v24 = vld [vmem:[%s2438_s22 + $0x60] sm:$0xff] }
  0x16   : > { %603 = vrot.lane.b32.xlu2 %v2468_v13, %s2380_s23  ;;  %v2479_v16 = vsel %vm407_vm0, %v413_v6, %v414_v9  ;;  %v410_v17 = vsel %vm407_vm0, %v408_v10, %v409_v11  ;;  %v416_v19 = vrot.slane %v2471_v14, 1  ;;  %v411_v20 = vrot.slane %v2474_v15, 1  ;;  %v2502_v26 = vld [vmem:[%s2438_s22 + $0x50] sm:$0xff]  ;;  %v2505_v27 = vld [vmem:[%s2438_s22 + $0x58] sm:$0x3]  ;;  %v2508_v28 = vld [vmem:[%s2438_s22 + $0x48] sm:$0xff] }
  0x17   : > { %599 = vrot.lane.b32.xlu1 %v2479_v16, %s2380_s23  ;;  %595 = vrot.lane.b32.xlu0 %v410_v17, %s2380_s23  ;;  %v2489_v21 = vsel %vm407_vm0, %v419_v4, %v421_v18  ;;  %v428_v29 = vrot.slane %v2496_v24, 1  ;;  %v429_v30 = vrot.slane %v2499_v25, 1  ;;  %v424_v31 = vrot.slane %v2502_v26, 1  ;;  %v2530_v37 = vld [vmem:[%s2438_s22 + $0x80] sm:$0xff]  ;;  %v2533_v38 = vld [vmem:[%s2438_s22 + $0x88] sm:$0x3] }
  0x18   : > { %v2492_v22 = vsel %vm407_vm0, %v414_v9, %v416_v19  ;;  %v412_v23 = vsel %vm407_vm0, %v409_v11, %v411_v20  ;;  %v426_v32 = vrot.slane %v2505_v27, 1  ;;  %v423_v33 = vrot.slane %v2508_v28, 1  ;;  %v2536_v39 = vld [vmem:[%s2438_s22 + $0x78] sm:$0xff]  ;;  %v2539_v40 = vld [vmem:[%s2438_s22 + $0x70] sm:$0x3]  ;;  %v2561_v48 = vld [vmem:[%s2438_s22 + $0xa8] sm:$0xff] }
  0x19   : > { %v2521_v34 = vsel %vm407_vm0, %v428_v29, %v429_v30  ;;  %v434_v41 = vrot.slane %v2530_v37, 1  ;;  %v436_v42 = vrot.slane %v2533_v38, 1  ;;  %v433_v43 = vrot.slane %v2536_v39, 1  ;;  %v2564_v49 = vld [vmem:[%s2438_s22 + $0xb0] sm:$0xff]  ;;  %v2567_v50 = vld [vmem:[%s2438_s22 + $0x98] sm:$0xff]  ;;  %v2596_v61 = vld [vmem:[%s2438_s22 + $0xc8] sm:$0xff] }
  0x1a   : > { %4550 = vst [vmem:[#allocation2_spill] sm:$0xff] %v2521_v34  ;;  %v2524_v35 = vsel %vm407_vm0, %v424_v31, %v426_v32  ;;  %v2527_v36 = vsel %vm407_vm0, %v423_v33, %v424_v31  ;;  %v431_v44 = vrot.slane %v2539_v40, 1  ;;  %v2570_v51 = vld [vmem:[%s2438_s22 + $0xa0] sm:$0x3]  ;;  %v2573_v52 = vld [vmem:[%s2438_s22 + $0x90] sm:$0xff]  ;;  %v443_v53 = vrot.slane %v2561_v48, 1 }
  0x1b   : > { %v2552_v45 = vsel %vm407_vm0, %v434_v41, %v436_v42  ;;  %v2555_v46 = vsel %vm407_vm0, %v433_v43, %v434_v41  ;;  %v444_v54 = vrot.slane %v2564_v49, 1  ;;  %v439_v55 = vrot.slane %v2567_v50, 1  ;;  %v2599_v62 = vld [vmem:[%s2438_s22 + $0xd0] sm:$0x3]  ;;  %v2602_v63 = vld [vmem:[%s2438_s22 + $0xc0] sm:$0xff]  ;;  %v2630_v20 = vld [vmem:[%s2438_s22 + $0xf8] sm:$0xff] }
  0x1c   : > { %4551 = vst [vmem:[#allocation3_spill] sm:$0xff] %v2552_v45  ;;  %v2558_v47 = vsel %vm407_vm0, %v429_v30, %v431_v44  ;;  %v441_v56 = vrot.slane %v2570_v51, 1  ;;  %v438_v57 = vrot.slane %v2573_v52, 1  ;;  %v2605_v3 = vld [vmem:[%s2438_s22 + $0xb8] sm:$0x3]  ;;  %v449_v4 = vrot.slane %v2596_v61, 1 }
  0x1d   : > { %4552 = vst [vmem:[#allocation4_spill] sm:$0xff] %v2558_v47  ;;  %v2587_v58 = vsel %vm407_vm0, %v443_v53, %v444_v54  ;;  %v451_v6 = vrot.slane %v2599_v62, 1  ;;  %v448_v9 = vrot.slane %v2602_v63, 1  ;;  %v446_v10 = vrot.slane %v2605_v3, 1  ;;  %v2627_v19 = vld [vmem:[%s2438_s22 + $0xf0] sm:$0xff]  ;;  %v2639_v30 = vld [vmem:[%s2438_s22 + $0xd8] sm:$0xff] }
  0x1e   : > { %605 = vrot.lane.b32.xlu2 %v2489_v21, %s2380_s23  ;;  %4553 = vst [vmem:[#allocation5_spill] sm:$0xff] %v2587_v58  ;;  %v2590_v59 = vsel %vm407_vm0, %v439_v55, %v441_v56  ;;  %v2593_v60 = vsel %vm407_vm0, %v438_v57, %v439_v55  ;;  %v2636_v29 = vld [vmem:[%s2438_s22 + $0xe8] sm:$0x3]  ;;  %v458_v31 = vrot.slane %v2627_v19, 1  ;;  %v459_v32 = vrot.slane %v2630_v20, 1 }
  0x1f   : > { %601 = vrot.lane.b32.xlu1 %v2492_v22, %s2380_s23  ;;  %597 = vrot.lane.b32.xlu0 %v412_v23, %s2380_s23  ;;  %4554 = vst [vmem:[#allocation6_spill] sm:$0xff] %v2590_v59  ;;  %v2618_v11 = vsel %vm407_vm0, %v449_v4, %v451_v6  ;;  %v2621_v17 = vsel %vm407_vm0, %v448_v9, %v449_v4  ;;  %v2633_v23 = vld [vmem:[%s2438_s22 + $0xe0] sm:$0xff]  ;;  %v456_v41 = vrot.slane %v2636_v29, 1  ;;  %v453_v42 = vrot.slane %v2639_v30, 1  ;;  %v2665_v55 = vld [vmem:[%s2438_s22 + $0x118] sm:$0x3] }
  0x20   : > { %4555 = vst [vmem:[#allocation7_spill] sm:$0xff] %v2593_v60  ;;  %v2624_v18 = vsel %vm407_vm0, %v444_v54, %v446_v10  ;;  %v454_v33 = vrot.slane %v2633_v23, 1  ;;  %v2653_v43 = vsel %vm407_vm0, %v458_v31, %v459_v32  ;;  %v2662_v54 = vld [vmem:[%s2438_s22 + $0x110] sm:$0xff]  ;;  %v2668_v56 = vld [vmem:[%s2438_s22 + $0x108] sm:$0xff]  ;;  %v2671_v57 = vld [vmem:[%s2438_s22 + $0x100] sm:$0x3] }
  0x21   : > { %4556 = vst [vmem:[#allocation8_spill] sm:$0xff] %v2618_v11  ;;  %v464_v4 = vrot.slane %v2662_v54, 1  ;;  %v466_v6 = vrot.slane %v2665_v55, 1  ;;  %v463_v9 = vrot.slane %v2668_v56, 1  ;;  %v461_v10 = vrot.slane %v2671_v57, 1 }
  0x22   : > { %4557 = vst [vmem:[#allocation9_spill] sm:$0xff] %v2621_v17  ;;  %v2656_v44 = vsel %vm407_vm0, %v454_v33, %v456_v41  ;;  %v2659_v53 = vsel %vm407_vm0, %v453_v42, %v454_v33  ;;  %v2693_v42 = vld [vmem:[%s2438_s22 + $0x138] sm:$0xff] }
  0x23   : > { %4558 = vst [vmem:[#allocation10_spill] sm:$0xff] %v2624_v18  ;;  %v2684_v31 = vsel %vm407_vm0, %v464_v4, %v466_v6  ;;  %v2687_v33 = vsel %vm407_vm0, %v463_v9, %v464_v4  ;;  %v2690_v41 = vsel %vm407_vm0, %v459_v32, %v461_v10  ;;  %v2705_v6 = vld [vmem:[%s2438_s22 + $0x120] sm:$0xff]  ;;  %v473_v32 = vrot.slane %v2693_v42, 1 }
  0x24   : > { %4559 = vst [vmem:[#allocation11_spill] sm:$0xff] %v2653_v43 }
  0x25   : > { %4560 = vst [vmem:[#allocation12_spill] sm:$0xff] %v2656_v44 }
  0x26   : > { %611 = vrot.lane.b32.xlu2 %v2521_v34, %s2380_s23  ;;  %4561 = vst [vmem:[#allocation13_spill] sm:$0xff] %v2659_v53  ;;  %v2765_v34 = vld [vmem:[%s2438_s22 + $0x168] sm:$0xff] }
  0x27   : > { %609 = vrot.lane.b32.xlu1 %v2524_v35, %s2380_s23  ;;  %607 = vrot.lane.b32.xlu0 %v2527_v36, %s2380_s23  ;;  %4562 = vst [vmem:[#allocation14_spill] sm:$0xff] %v2684_v31 }
  0x28   : > { %4563 = vst [vmem:[#allocation15_spill] sm:$0xff] %v2687_v33 }
  0x29   : > { %4564 = vst [vmem:[#allocation16_spill] sm:$0xff] %v2690_v41 }
  0x2e   : > { %617 = vrot.lane.b32.xlu2 %v2552_v45, %s2380_s23  ;;  %v2737_v45 = vld [vmem:[%s2438_s22 + $0x148] sm:$0x3] }
  0x2f   : > { %615 = vrot.lane.b32.xlu1 %v2555_v46, %s2380_s23  ;;  %613 = vrot.lane.b32.xlu0 %v2558_v47, %s2380_s23 }
  0x36   : > { %623 = vrot.lane.b32.xlu2 %v2587_v58, %s2380_s23 }
  0x37   : > { %621 = vrot.lane.b32.xlu1 %v2590_v59, %s2380_s23  ;;  %619 = vrot.lane.b32.xlu0 %v2593_v60, %s2380_s23 }
  0x3e   : > { %629 = vrot.lane.b32.xlu2 %v2618_v11, %s2380_s23  ;;  %v2699_v11 = vld [vmem:[%s2438_s22 + $0x128] sm:$0xff] }
  0x3f   : > { %627 = vrot.lane.b32.xlu1 %v2621_v17, %s2380_s23  ;;  %625 = vrot.lane.b32.xlu0 %v2624_v18, %s2380_s23  ;;  %v469_v9 = vrot.slane %v2699_v11, 1  ;;  %v2731_v18 = vld [vmem:[%s2438_s22 + $0x160] sm:$0x3]  ;;  %v2734_v17 = vld [vmem:[%s2438_s22 + $0x150] sm:$0xff] }
  0x46   : > { %635 = vrot.lane.b32.xlu2 %v2653_v43, %s2380_s23  ;;  %v2696_v43 = vld [vmem:[%s2438_s22 + $0x140] sm:$0xff] }
  0x47   : > { %633 = vrot.lane.b32.xlu1 %v2656_v44, %s2380_s23  ;;  %631 = vrot.lane.b32.xlu0 %v2659_v53, %s2380_s23  ;;  %v2702_v53 = vld [vmem:[%s2438_s22 + $0x130] sm:$0x3]  ;;  %v474_v4 = vrot.slane %v2696_v43, 1  ;;  %v468_v44 = vrot.slane %v2705_v6, 1 }
  0x48   : > { %v471_v10 = vrot.slane %v2702_v53, 1 }
  0x49   : > { %v2719_v58 = vsel %vm407_vm0, %v473_v32, %v474_v4  ;;  %v481_v32 = vrot.slane %v2731_v18, 1 }
  0x4a   : > { %4565 = vst [vmem:[#allocation17_spill] sm:$0xff] %v2719_v58 }
  0x4e   : > { %641 = vrot.lane.b32.xlu2 %v2684_v31, %s2380_s23  ;;  %v2722_v31 = vsel %vm407_vm0, %v469_v9, %v471_v10  ;;  %v476_v10 = vrot.slane %v2737_v45, 1 }
  0x4f   : > { %639 = vrot.lane.b32.xlu1 %v2687_v33, %s2380_s23  ;;  %637 = vrot.lane.b32.xlu0 %v2690_v41, %s2380_s23  ;;  %4566 = vst [vmem:[#allocation18_spill] sm:$0xff] %v2722_v31  ;;  %v2725_v33 = vsel %vm407_vm0, %v468_v44, %v469_v9  ;;  %v2728_v41 = vld [vmem:[%s2438_s22 + $0x158] sm:$0xff]  ;;  %v478_v9 = vrot.slane %v2734_v17, 1 }
  0x50   : > { %4567 = vst [vmem:[#allocation19_spill] sm:$0xff] %v2725_v33  ;;  %v479_v44 = vrot.slane %v2728_v41, 1 }
  0x52   : > { %v2750_v60 = vsel %vm407_vm0, %v479_v44, %v481_v32  ;;  %v2753_v59 = vsel %vm407_vm0, %v478_v9, %v479_v44  ;;  %v489_v44 = vrot.slane %v2456_v7, 2  ;;  %v495_v7 = vrot.slane %v2452_v5, 2 }
  0x53   : > { %4568 = vst [vmem:[#allocation20_spill] sm:$0xff] %v2750_v60 }
  0x54   : > { %4569 = vst [vmem:[#allocation21_spill] sm:$0xff] %v2753_v59 }
  0x56   : > { %647 = vrot.lane.b32.xlu2 %v2719_v58, %s2380_s23  ;;  %v2756_v58 = vsel %vm407_vm0, %v474_v4, %v476_v10  ;;  %v490_v4 = vrot.slane %v2459_v8, 2  ;;  %v483_v10 = vrot.slane %v2765_v34, 1  ;;  %v497_v8 = vrot.slane %v2471_v14, 2 }
  0x57   : > { %645 = vrot.lane.b32.xlu1 %v2722_v31, %s2380_s23  ;;  %643 = vrot.lane.b32.xlu0 %v2725_v33, %s2380_s23  ;;  %4570 = vst [vmem:[#allocation22_spill] sm:$0xff] %v2756_v58  ;;  %v2759_v31 = vld [vmem:[%s2438_s22 + $0x170] sm:$0xff]  ;;  %v2762_v33 = vld [vmem:[%s2438_s22 + $0x178] sm:$0x3]  ;;  %v504_v14 = vrot.slane %v2508_v28, 2 }
  0x58   : > { %v484_v32 = vrot.slane %v2759_v31, 1  ;;  %v486_v9 = vrot.slane %v2762_v33, 1  ;;  %v491_v47 = vsel %vm488_vm1, %v489_v44, %v490_v4  ;;  %v494_v44 = vrot.slane %v2447_v2, 2 }
  0x5e   : > { %653 = vrot.lane.b32.xlu2 %v2750_v60, %s2380_s23  ;;  %v2780_v60 = vsel %vm407_vm0, %v484_v32, %v486_v9  ;;  %v492_v9 = vrot.slane %v2474_v15, 2  ;;  %v505_v15 = vrot.slane %v2502_v26, 2 }
  0x5f   : > { %651 = vrot.lane.b32.xlu1 %v2753_v59, %s2380_s23  ;;  %649 = vrot.lane.b32.xlu0 %v2756_v58, %s2380_s23  ;;  %4571 = vst [vmem:[#allocation23_spill] sm:$0xff] %v2780_v60  ;;  %v2783_v59 = vsel %vm407_vm0, %v483_v10, %v484_v32  ;;  %v2795_v32 = vsel %vm488_vm1, %v495_v7, %v497_v8  ;;  %v500_v8 = vrot.slane %v2444_v1, 2 }
  0x60   : > { %4572 = vst [vmem:[#allocation24_spill] sm:$0xff] %v2783_v59  ;;  %v2798_v10 = vsel %vm488_vm1, %v494_v44, %v495_v7  ;;  %v502_v7 = vrot.slane %v2465_v12, 2  ;;  %v2814_v44 = vsel %vm488_vm1, %v504_v14, %v505_v15  ;;  %v510_v12 = vrot.slane %v2499_v25, 2 }
  0x61   : > { %4573 = vst [vmem:[#allocation25_spill] sm:$0xff] %v2795_v32  ;;  %v512_v14 = vrot.slane %v2539_v40, 2  ;;  %v520_v40 = vrot.slane %v2567_v50, 2 }
  0x62   : > { %4575 = vst [vmem:[#allocation27_spill] sm:$0xff] %v2814_v44 }
  0x66   : > { %691 = vrot.lane.b32.xlu2 %v491_v47, %s2381_s24  ;;  %v493_v47 = vsel %vm488_vm1, %v490_v4, %v492_v9  ;;  %v499_v4 = vrot.slane %v2441_v0, 2  ;;  %v2817_v9 = vsel %vm488_vm1, %v500_v8, %v502_v7  ;;  %v509_v7 = vrot.slane %v2496_v24, 2 }
  0x67   : > { %657 = vrot.lane.b32.xlu1 %v2780_v60, %s2380_s23  ;;  %655 = vrot.lane.b32.xlu0 %v2783_v59, %s2380_s23  ;;  %s3864_s23 = scalar_lea.vmem %s4461_s2, %s2271_s19 }
  0x6e   : > { %697 = vrot.lane.b32.xlu2 %v2795_v32, %s2381_s24 }
  0x6f   : > { %695 = vrot.lane.b32.xlu1 %v2798_v10, %s2381_s24  ;;  %693 = vrot.lane.b32.xlu0 %v493_v47, %s2381_s24  ;;  %v2820_v47 = vsel %vm488_vm1, %v499_v4, %v500_v8  ;;  %v507_v8 = vrot.slane %v2505_v27, 2  ;;  %v2835_v4 = vsel %vm488_vm1, %v510_v12, %v512_v14  ;;  %v519_v27 = vrot.slane %v2573_v52, 2 }
  0x70   : > { %v2808_v59 = vpop.permute.xlu2 %603  ;;  %4577 = vst [vmem:[#allocation29_spill] sm:$0xff] %v2835_v4 }
  0x71   : > { %4574 = vst [vmem:[#allocation26_spill] sm:$0xff] %v2808_v59  ;;  %v2841_v32 = vsel %vm488_vm1, %v505_v15, %v507_v8  ;;  %v517_v15 = vrot.slane %v2533_v38, 2  ;;  %v2857_v8 = vsel %vm488_vm1, %v519_v27, %v520_v40  ;;  %v525_v38 = vrot.slane %v2564_v49, 2 }
  0x72   : > { %4580 = vst [vmem:[#allocation32_spill] sm:$0xff] %v2857_v8  ;;  %v527_v27 = vrot.slane %v2605_v3, 2  ;;  %v535_v3 = vrot.slane %v2633_v23, 2 }
  0x76   : > { %703 = vrot.lane.b32.xlu2 %v2814_v44, %s2381_s24  ;;  %v2838_v44 = vsel %vm488_vm1, %v509_v7, %v510_v12  ;;  %v515_v12 = vrot.slane %v2530_v37, 2  ;;  %v514_v7 = vrot.slane %v2536_v39, 2 }
  0x77   : > { %701 = vrot.lane.b32.xlu1 %v2817_v9, %s2381_s24  ;;  %699 = vrot.lane.b32.xlu0 %v2820_v47, %s2381_s24  ;;  %4578 = vst [vmem:[#allocation30_spill] sm:$0xff] %v2838_v44 }
  0x78   : > { %v2830_v59 = vpop.permute.xlu2 %605 }
  0x79   : > { %4576 = vst [vmem:[#allocation28_spill] sm:$0xff] %v2830_v59  ;;  %v2860_v59 = vsel %vm488_vm1, %v515_v12, %v517_v15  ;;  %v524_v15 = vrot.slane %v2561_v48, 2 }
  0x7a   : > { %4581 = vst [vmem:[#allocation33_spill] sm:$0xff] %v2860_v59 }
  0x7e   : > { %709 = vrot.lane.b32.xlu2 %v2835_v4, %s2381_s24  ;;  %v2863_v4 = vsel %vm488_vm1, %v514_v7, %v515_v12  ;;  %v522_v12 = vrot.slane %v2570_v51, 2  ;;  %v534_v51 = vrot.slane %v2639_v30, 2 }
  0x7f   : > { %707 = vrot.lane.b32.xlu1 %v2838_v44, %s2381_s24  ;;  %705 = vrot.lane.b32.xlu0 %v2841_v32, %s2381_s24  ;;  %4582 = vst [vmem:[#allocation34_spill] sm:$0xff] %v2863_v4 }
  0x80   : > { %v2851_v14 = vpop.permute.xlu2 %611 }
  0x81   : > { %4579 = vst [vmem:[#allocation31_spill] sm:$0xff] %v2851_v14 }
  0x86   : > { %715 = vrot.lane.b32.xlu2 %v2857_v8, %s2381_s24  ;;  %v2882_v8 = vsel %vm488_vm1, %v525_v38, %v527_v27 }
  0x87   : > { %713 = vrot.lane.b32.xlu1 %v2860_v59, %s2381_s24  ;;  %711 = vrot.lane.b32.xlu0 %v2863_v4, %s2381_s24  ;;  %4586 = vst [vmem:[#allocation38_spill] sm:$0xff] %v2882_v8  ;;  %v2885_v59 = vsel %vm488_vm1, %v524_v15, %v525_v38  ;;  %v2888_v4 = vsel %vm488_vm1, %v520_v40, %v522_v12  ;;  %v530_v38 = vrot.slane %v2596_v61, 2  ;;  %v532_v40 = vrot.slane %v2599_v62, 2 }
  0x88   : > { %v2873_v14 = vpop.permute.xlu2 %617  ;;  %v529_v15 = vrot.slane %v2602_v63, 2  ;;  %v540_v62 = vrot.slane %v2630_v20, 2 }
  0x89   : > { %4583 = vst [vmem:[#allocation35_spill] sm:$0xff] %v2873_v14  ;;  %v2877_v7 = vpop.permute.xlu1 %599  ;;  %v2879_v44 = vpop.permute.xlu0 %595 }
  0x8a   : > { %4584 = vst [vmem:[#allocation36_spill] sm:$0xff] %v2877_v7  ;;  %v2908_v7 = vsel %vm488_vm1, %v534_v51, %v535_v3  ;;  %v542_v51 = vrot.slane %v2671_v57, 2  ;;  %v550_v57 = vrot.slane %v2699_v11, 2 }
  0x8b   : > { %4585 = vst [vmem:[#allocation37_spill] sm:$0xff] %v2879_v44  ;;  %v2914_v44 = vsel %vm488_vm1, %v529_v15, %v530_v38 }
  0x8c   : > { %4591 = vst [vmem:[#allocation43_spill] sm:$0xff] %v2914_v44 }
  0x8e   : > { %721 = vrot.lane.b32.xlu2 %v2882_v8, %s2381_s24  ;;  %v2911_v8 = vsel %vm488_vm1, %v530_v38, %v532_v40  ;;  %v539_v40 = vrot.slane %v2627_v19, 2  ;;  %v537_v38 = vrot.slane %v2636_v29, 2  ;;  %v549_v29 = vrot.slane %v2705_v6, 2 }
  0x8f   : > { %719 = vrot.lane.b32.xlu1 %v2885_v59, %s2381_s24  ;;  %717 = vrot.lane.b32.xlu0 %v2888_v4, %s2381_s24  ;;  %4590 = vst [vmem:[#allocation42_spill] sm:$0xff] %v2911_v8 }
  0x90   : > { %v2898_v27 = vpop.permute.xlu2 %623 }
  0x91   : > { %4587 = vst [vmem:[#allocation39_spill] sm:$0xff] %v2898_v27  ;;  %v2903_v12 = vpop.permute.xlu1 %601  ;;  %v2905_v14 = vpop.permute.xlu0 %597 }
  0x92   : > { %4588 = vst [vmem:[#allocation40_spill] sm:$0xff] %v2903_v12 }
  0x93   : > { %4589 = vst [vmem:[#allocation41_spill] sm:$0xff] %v2905_v14  ;;  %v2933_v14 = vsel %vm488_vm1, %v540_v62, %v542_v51 }
  0x94   : > { %4595 = vst [vmem:[#allocation47_spill] sm:$0xff] %v2933_v14 }
  0x96   : > { %727 = vrot.lane.b32.xlu2 %v2908_v7, %s2381_s24 }
  0x97   : > { %725 = vrot.lane.b32.xlu1 %v2911_v8, %s2381_s24  ;;  %723 = vrot.lane.b32.xlu0 %v2914_v44, %s2381_s24  ;;  %v2936_v8 = vsel %vm488_vm1, %v539_v40, %v540_v62  ;;  %v2939_v44 = vsel %vm488_vm1, %v535_v3, %v537_v38  ;;  %v545_v62 = vrot.slane %v2662_v54, 2  ;;  %v547_v3 = vrot.slane %v2665_v55, 2 }
  0x98   : > { %v2924_v27 = vpop.permute.xlu2 %629  ;;  %4596 = vst [vmem:[#allocation48_spill] sm:$0xff] %v2939_v44  ;;  %v544_v40 = vrot.slane %v2668_v56, 2  ;;  %v555_v55 = vrot.slane %v2696_v43, 2 }
  0x99   : > { %4592 = vst [vmem:[#allocation44_spill] sm:$0xff] %v2924_v27  ;;  %v2928_v15 = vpop.permute.xlu1 %609  ;;  %v2930_v12 = vpop.permute.xlu0 %607  ;;  %v2962_v27 = vsel %vm488_vm1, %v545_v62, %v547_v3  ;;  %v554_v3 = vrot.slane %v2693_v42, 2 }
  0x9a   : > { %4593 = vst [vmem:[#allocation45_spill] sm:$0xff] %v2928_v15 }
  0x9b   : > { %4594 = vst [vmem:[#allocation46_spill] sm:$0xff] %v2930_v12  ;;  %v2959_v12 = vsel %vm488_vm1, %v549_v29, %v550_v57  ;;  %v557_v29 = vrot.slane %v2737_v45, 2  ;;  %v564_v45 = vrot.slane %v2765_v34, 2 }
  0x9c   : > { %4600 = vst [vmem:[#allocation52_spill] sm:$0xff] %v2959_v12 }
  0x9d   : > { %4601 = vst [vmem:[#allocation53_spill] sm:$0xff] %v2962_v27 }
  0x9e   : > { %733 = vrot.lane.b32.xlu2 %v2933_v14, %s2381_s24  ;;  %v2965_v14 = vsel %vm488_vm1, %v544_v40, %v545_v62  ;;  %v552_v62 = vrot.slane %v2702_v53, 2  ;;  %v565_v53 = vrot.slane %v2759_v31, 2 }
  0x9f   : > { %731 = vrot.lane.b32.xlu1 %v2936_v8, %s2381_s24  ;;  %729 = vrot.lane.b32.xlu0 %v2939_v44, %s2381_s24 }
  0xa0   : > { %v2949_v51 = vpop.permute.xlu2 %635 }
  0xa1   : > { %4597 = vst [vmem:[#allocation49_spill] sm:$0xff] %v2949_v51  ;;  %v2954_v38 = vpop.permute.xlu1 %615  ;;  %v2956_v15 = vpop.permute.xlu0 %613 }
  0xa2   : > { %4598 = vst [vmem:[#allocation50_spill] sm:$0xff] %v2954_v38 }
  0xa3   : > { %4599 = vst [vmem:[#allocation51_spill] sm:$0xff] %v2956_v15  ;;  %v2990_v15 = vsel %vm488_vm1, %v550_v57, %v552_v62  ;;  %v562_v57 = vrot.slane %v2731_v18, 2 }
  0xa4   : > { %4606 = vst [vmem:[#allocation58_spill] sm:$0xff] %v2990_v15 }
  0xa6   : > { %739 = vrot.lane.b32.xlu2 %v2959_v12, %s2381_s24  ;;  %v2984_v12 = vsel %vm488_vm1, %v555_v55, %v557_v29 }
  0xa7   : > { %737 = vrot.lane.b32.xlu1 %v2962_v27, %s2381_s24  ;;  %735 = vrot.lane.b32.xlu0 %v2965_v14, %s2381_s24  ;;  %v2987_v27 = vsel %vm488_vm1, %v554_v3, %v555_v55  ;;  %v560_v55 = vrot.slane %v2728_v41, 2  ;;  %v559_v3 = vrot.slane %v2734_v17, 2 }
  0xa8   : > { %v2975_v51 = vpop.permute.xlu2 %641  ;;  %4605 = vst [vmem:[#allocation57_spill] sm:$0xff] %v2987_v27 }
  0xa9   : > { %4602 = vst [vmem:[#allocation54_spill] sm:$0xff] %v2975_v51  ;;  %v2979_v40 = vpop.permute.xlu1 %621  ;;  %v2981_v38 = vpop.permute.xlu0 %619 }
  0xaa   : > { %4603 = vst [vmem:[#allocation55_spill] sm:$0xff] %v2979_v40  ;;  %v3010_v40 = vsel %vm488_vm1, %v564_v45, %v565_v53  ;;  %v567_v45 = vrot.slane %v2762_v33, 2 }
  0xab   : > { %4604 = vst [vmem:[#allocation56_spill] sm:$0xff] %v2981_v38  ;;  %v3013_v38 = vsel %vm488_vm1, %v560_v55, %v562_v57 }
  0xac   : > { %4610 = vst [vmem:[#allocation62_spill] sm:$0xff] %v3010_v40 }
  0xad   : > { %4611 = vst [vmem:[#allocation63_spill] sm:$0xff] %v3013_v38 }
  0xae   : > { %745 = vrot.lane.b32.xlu2 %v2984_v12, %s2381_s24 }
  0xaf   : > { %743 = vrot.lane.b32.xlu1 %v2987_v27, %s2381_s24  ;;  %741 = vrot.lane.b32.xlu0 %v2990_v15, %s2381_s24  ;;  %v3016_v15 = vsel %vm488_vm1, %v559_v3, %v560_v55  ;;  %v3032_v55 = vsel %vm488_vm1, %v565_v53, %v567_v45 }
  0xb0   : > { %v3000_v29 = vpop.permute.xlu2 %647  ;;  %4615 = vst [vmem:[#allocation67_spill] sm:$0xff] %v3032_v55 }
  0xb1   : > { %4607 = vst [vmem:[#allocation59_spill] sm:$0xff] %v3000_v29  ;;  %v3005_v62 = vpop.permute.xlu1 %627  ;;  %v3007_v51 = vpop.permute.xlu0 %625 }
  0xb2   : > { %4608 = vst [vmem:[#allocation60_spill] sm:$0xff] %v3005_v62 }
  0xb3   : > { %4609 = vst [vmem:[#allocation61_spill] sm:$0xff] %v3007_v51 }
  0xb6   : > { %751 = vrot.lane.b32.xlu2 %v3010_v40, %s2381_s24  ;;  %v4666_v40 = vld [vmem:[#allocation12_spill] sm:$0xff] }
  0xb7   : > { %749 = vrot.lane.b32.xlu1 %v3013_v38, %s2381_s24  ;;  %747 = vrot.lane.b32.xlu0 %v3016_v15, %s2381_s24  ;;  %v4678_v38 = vld [vmem:[#allocation14_spill] sm:$0xff] }
  0xb8   : > { %v3024_v18 = vpop.permute.xlu2 %653 }
  0xb9   : > { %4612 = vst [vmem:[#allocation64_spill] sm:$0xff] %v3024_v18  ;;  %v3027_v51 = vpop.permute.xlu1 %633  ;;  %v3029_v57 = vpop.permute.xlu0 %631 }
  0xba   : > { %4613 = vst [vmem:[#allocation65_spill] sm:$0xff] %v3027_v51 }
  0xbb   : > { %4614 = vst [vmem:[#allocation66_spill] sm:$0xff] %v3029_v57 }
  0xbe   : > { %789 = vrot.lane.b32.xlu2 %v2452_v5, %s2382_s25 }
  0xbf   : > { %787 = vrot.lane.b32.xlu1 %v2447_v2, %s2382_s25  ;;  %753 = vrot.lane.b32.xlu0 %v3032_v55, %s2381_s24  ;;  %v4656_v55 = vld [vmem:[#allocation6_spill] sm:$0xff] }
  0xc0   : > { %v3040_v3 = vpop.permute.xlu2 %691 }
  0xc1   : > { %v3042_v33 = vpop.permute.xlu1 %639  ;;  %v3044_v18 = vpop.permute.xlu0 %637 }
  0xc2   : > { %4616 = vst [vmem:[#allocation68_spill] sm:$0xff] %v3042_v33 }
  0xc3   : > { %4617 = vst [vmem:[#allocation69_spill] sm:$0xff] %v3044_v18 }
  0xc6   : > { %795 = vrot.lane.b32.xlu2 %v2508_v28, %s2382_s25 }
  0xc7   : > { %793 = vrot.lane.b32.xlu1 %v2444_v1, %s2382_s25  ;;  %791 = vrot.lane.b32.xlu0 %v2441_v0, %s2382_s25 }
  0xc8   : > { %v3052_v5 = vpop.permute.xlu2 %697 }
  0xc9   : > { %4618 = vst [vmem:[#allocation70_spill] sm:$0xff] %v3052_v5  ;;  %v3054_v2 = vpop.permute.xlu1 %645  ;;  %v3056_v53 = vpop.permute.xlu0 %643 }
  0xca   : > { %4619 = vst [vmem:[#allocation71_spill] sm:$0xff] %v3054_v2 }
  0xcb   : > { %4620 = vst [vmem:[#allocation72_spill] sm:$0xff] %v3056_v53 }
  0xce   : > { %801 = vrot.lane.b32.xlu2 %v2499_v25, %s2382_s25 }
  0xcf   : > { %799 = vrot.lane.b32.xlu1 %v2496_v24, %s2382_s25  ;;  %797 = vrot.lane.b32.xlu0 %v2502_v26, %s2382_s25 }
  0xd0   : > { %v3064_v45 = vpop.permute.xlu2 %703 }
  0xd1   : > { %4621 = vst [vmem:[#allocation73_spill] sm:$0xff] %v3064_v45  ;;  %v3066_v33 = vpop.permute.xlu1 %651  ;;  %v3068_v18 = vpop.permute.xlu0 %649 }
  0xd2   : > { %4622 = vst [vmem:[#allocation74_spill] sm:$0xff] %v3066_v33 }
  0xd3   : > { %4623 = vst [vmem:[#allocation75_spill] sm:$0xff] %v3068_v18 }
  0xd6   : > { %807 = vrot.lane.b32.xlu2 %v2573_v52, %s2382_s25 }
  0xd7   : > { %805 = vrot.lane.b32.xlu1 %v2530_v37, %s2382_s25  ;;  %803 = vrot.lane.b32.xlu0 %v2536_v39, %s2382_s25 }
  0xd8   : > { %v3076_v25 = vpop.permute.xlu2 %709 }
  0xd9   : > { %v3078_v29 = vpop.permute.xlu1 %657  ;;  %v3080_v51 = vpop.permute.xlu0 %655 }
  0xda   : > { %4624 = vst [vmem:[#allocation76_spill] sm:$0xff] %v3078_v29 }
  0xdb   : > { %4625 = vst [vmem:[#allocation77_spill] sm:$0xff] %v3080_v51 }
  0xde   : > { %813 = vrot.lane.b32.xlu2 %v2564_v49, %s2382_s25 }
  0xdf   : > { %811 = vrot.lane.b32.xlu1 %v2561_v48, %s2382_s25  ;;  %809 = vrot.lane.b32.xlu0 %v2567_v50, %s2382_s25 }
  0xe0   : > { %v3088_v33 = vpop.permute.xlu2 %715 }
  0xe1   : > { %4626 = vst [vmem:[#allocation78_spill] sm:$0xff] %v3088_v33  ;;  %v3090_v37 = vpop.permute.xlu1 %695  ;;  %v3092_v39 = vpop.permute.xlu0 %693 }
  0xe6   : > { %819 = vrot.lane.b32.xlu2 %v2639_v30, %s2382_s25 }
  0xe7   : > { %817 = vrot.lane.b32.xlu1 %v2596_v61, %s2382_s25  ;;  %815 = vrot.lane.b32.xlu0 %v2602_v63, %s2382_s25 }
  0xe8   : > { %v3100_v29 = vpop.permute.xlu2 %721 }
  0xe9   : > { %4627 = vst [vmem:[#allocation79_spill] sm:$0xff] %v3100_v29  ;;  %v3102_v51 = vpop.permute.xlu1 %701  ;;  %v3104_v18 = vpop.permute.xlu0 %699 }
  0xea   : > { %4628 = vst [vmem:[#allocation80_spill] sm:$0xff] %v3102_v51 }
  0xeb   : > { %4629 = vst [vmem:[#allocation81_spill] sm:$0xff] %v3104_v18  ;;  %v4673_v18 = vld [vmem:[#allocation16_spill] sm:$0xff] }
  0xee   : > { %825 = vrot.lane.b32.xlu2 %v2630_v20, %s2382_s25 }
  0xef   : > { %823 = vrot.lane.b32.xlu1 %v2627_v19, %s2382_s25  ;;  %821 = vrot.lane.b32.xlu0 %v2633_v23, %s2382_s25 }
  0xf0   : > { %v3112_v30 = vpop.permute.xlu2 %727 }
  0xf1   : > { %4630 = vst [vmem:[#allocation82_spill] sm:$0xff] %v3112_v30  ;;  %v3114_v61 = vpop.permute.xlu1 %707  ;;  %v3116_v63 = vpop.permute.xlu0 %705 }
  0xf2   : > { %4631 = vst [vmem:[#allocation83_spill] sm:$0xff] %v3116_v63 }
  0xf6   : > { %831 = vrot.lane.b32.xlu2 %v2705_v6, %s2382_s25 }
  0xf7   : > { %829 = vrot.lane.b32.xlu1 %v2662_v54, %s2382_s25  ;;  %827 = vrot.lane.b32.xlu0 %v2668_v56, %s2382_s25 }
  0xf8   : > { %v3124_v29 = vpop.permute.xlu2 %733 }
  0xf9   : > { %4632 = vst [vmem:[#allocation84_spill] sm:$0xff] %v3124_v29  ;;  %v3126_v23 = vpop.permute.xlu1 %713  ;;  %v3128_v2 = vpop.permute.xlu0 %711  ;;  %v3155_v29 = vld [vmem:[%s2438_s22 + $0x188] sm:$0xff] }
  0xfa   : > { %4633 = vst [vmem:[#allocation85_spill] sm:$0xff] %v3126_v23 }
  0xfb   : > { %4634 = vst [vmem:[#allocation86_spill] sm:$0xff] %v3128_v2 }
  0xfc   : > { %4641 = vst [vmem:[#allocation93_spill] sm:$0xff] %v3155_v29 }
  0xfe   : > { %837 = vrot.lane.b32.xlu2 %v2696_v43, %s2382_s25 }
  0xff   : > { %835 = vrot.lane.b32.xlu1 %v2693_v42, %s2382_s25  ;;  %833 = vrot.lane.b32.xlu0 %v2699_v11, %s2382_s25 }
 0x100   : > { %v3136_v54 = vpop.permute.xlu2 %739 }
 0x101   : > { %4635 = vst [vmem:[#allocation87_spill] sm:$0xff] %v3136_v54  ;;  %v3138_v6 = vpop.permute.xlu1 %719  ;;  %v3140_v63 = vpop.permute.xlu0 %717 }
 0x102   : > { %4636 = vst [vmem:[#allocation88_spill] sm:$0xff] %v3138_v6  ;;  %v3158_v6 = vld [vmem:[%s2438_s22 + $0x180] sm:$0xff] }
 0x103   : > { %4637 = vst [vmem:[#allocation89_spill] sm:$0xff] %v3140_v63 }
 0x104   : > { %4642 = vst [vmem:[#allocation94_spill] sm:$0xff] %v3158_v6 }
 0x106   : > { %843 = vrot.lane.b32.xlu2 %v2765_v34, %s2382_s25 }
 0x107   : > { %841 = vrot.lane.b32.xlu1 %v2728_v41, %s2382_s25  ;;  %839 = vrot.lane.b32.xlu0 %v2734_v17, %s2382_s25 }
 0x108   : > { %v3148_v43 = vpop.permute.xlu2 %745 }
 0x109   : > { %4638 = vst [vmem:[#allocation90_spill] sm:$0xff] %v3148_v43  ;;  %v3150_v42 = vpop.permute.xlu1 %725  ;;  %v3152_v11 = vpop.permute.xlu0 %723 }
 0x10a   : > { %4639 = vst [vmem:[#allocation91_spill] sm:$0xff] %v3150_v42  ;;  %v4668_v42 = vld [vmem:[#allocation8_spill] sm:$0xff] }
 0x10b   : > { %4640 = vst [vmem:[#allocation92_spill] sm:$0xff] %v3152_v11 }
 0x10e   : > { %849 = vrot.lane.b32.xlu2 %v3155_v29, %s2382_s25 }
 0x10f   : > { %847 = vrot.lane.b32.xlu1 %v3158_v6, %s2382_s25  ;;  %845 = vrot.lane.b32.xlu0 %v2759_v31, %s2382_s25  ;;  %s292_s25 = scalar_lea.vmem %s4462_s3, %s4858_s15 }
 0x110   : > { %v3166_v34 = vpop.permute.xlu2 %751 }
 0x111   : > { %4643 = vst [vmem:[#allocation95_spill] sm:$0xff] %v3166_v34  ;;  %v3168_v41 = vpop.permute.xlu1 %731  ;;  %v3170_v43 = vpop.permute.xlu0 %729 }
 0x112   : > { %4644 = vst [vmem:[#allocation96_spill] sm:$0xff] %v3168_v41 }
 0x113   : > { %4645 = vst [vmem:[#allocation97_spill] sm:$0xff] %v3170_v43 }
 0x116   : > { %887 = vrot.lane.b32.xlu2 %v2468_v13, %s2383_s26 }
 0x117   : > { %885 = vrot.lane.b32.xlu1 %v2492_v22, %s2383_s26  ;;  %883 = vrot.lane.b32.xlu0 %v2479_v16, %s2383_s26 }
 0x118   : > { %v3178_v63 = vpop.permute.xlu2 %789 }
 0x119   : > { %v3180_v33 = vpop.permute.xlu1 %737  ;;  %v3182_v31 = vpop.permute.xlu0 %735 }
 0x11a   : > { %4646 = vst [vmem:[#allocation98_spill] sm:$0xff] %v3180_v33  ;;  %v4651_v33 = vld [vmem:[#allocation4_spill] sm:$0xff] }
 0x11b   : > { %4647 = vst [vmem:[#allocation99_spill] sm:$0xff] %v3182_v31  ;;  %v4652_v31 = vld [vmem:[#allocation2_spill] sm:$0xff] }
 0x11e   : > { %893 = vrot.lane.b32.xlu2 %v2524_v35, %s2383_s26 }
 0x11f   : > { %891 = vrot.lane.b32.xlu1 %v2527_v36, %s2383_s26  ;;  %889 = vrot.lane.b32.xlu0 %v2489_v21, %s2383_s26 }
 0x120   : > { %v3190_v34 = vpop.permute.xlu2 %795 }
 0x121   : > { %4648 = vst [vmem:[#allocation100_spill] sm:$0xff] %v3190_v34  ;;  %v3192_v22 = vpop.permute.xlu1 %743  ;;  %v3194_v16 = vpop.permute.xlu0 %741 }
 0x122   : > { %4649 = vst [vmem:[#allocation101_spill] sm:$0xff] %v3192_v22  ;;  %v4657_v22 = vld [vmem:[#allocation7_spill] sm:$0xff] }
 0x123   : > { %4650 = vst [vmem:[#allocation102_spill] sm:$0xff] %v3194_v16  ;;  %v4658_v16 = vld [vmem:[#allocation3_spill] sm:$0xff] }
 0x126   : > { %899 = vrot.lane.b32.xlu2 %v2555_v46, %s2383_s26 }
 0x127   : > { %897 = vrot.lane.b32.xlu1 %v4651_v33, %s2383_s26  ;;  %895 = vrot.lane.b32.xlu0 %v4652_v31, %s2383_s26 }
 0x128   : > { %v3202_v41 = vpop.permute.xlu2 %801 }
 0x129   : > { %4653 = vst [vmem:[#allocation4_spill] sm:$0xff] %v3202_v41  ;;  %v3204_v43 = vpop.permute.xlu1 %749  ;;  %v3206_v45 = vpop.permute.xlu0 %747  ;;  %v4661_v41 = vld [vmem:[#allocation9_spill] sm:$0xff] }
 0x12a   : > { %4654 = vst [vmem:[#allocation2_spill] sm:$0xff] %v3204_v43  ;;  %v4662_v43 = vld [vmem:[#allocation10_spill] sm:$0xff] }
 0x12b   : > { %4655 = vst [vmem:[#allocation103_spill] sm:$0xff] %v3206_v45  ;;  %v4663_v45 = vld [vmem:[#allocation5_spill] sm:$0xff] }
 0x12e   : > { %905 = vrot.lane.b32.xlu2 %v4656_v55, %s2383_s26 }
 0x12f   : > { %903 = vrot.lane.b32.xlu1 %v4657_v22, %s2383_s26  ;;  %901 = vrot.lane.b32.xlu0 %v4658_v16, %s2383_s26 }
 0x130   : > { %v3214_v54 = vpop.permute.xlu2 %807 }
 0x131   : > { %4659 = vst [vmem:[#allocation6_spill] sm:$0xff] %v3214_v54  ;;  %v3216_v53 = vpop.permute.xlu1 %787  ;;  %v3218_v30 = vpop.permute.xlu0 %753 }
 0x132   : > { %4660 = vst [vmem:[#allocation7_spill] sm:$0xff] %v3218_v30  ;;  %v4667_v30 = vld [vmem:[#allocation13_spill] sm:$0xff] }
 0x136   : > { %911 = vrot.lane.b32.xlu2 %v4661_v41, %s2383_s26 }
 0x137   : > { %909 = vrot.lane.b32.xlu1 %v4662_v43, %s2383_s26  ;;  %907 = vrot.lane.b32.xlu0 %v4663_v45, %s2383_s26 }
 0x138   : > { %v3226_v57 = vpop.permute.xlu2 %813 }
 0x139   : > { %4664 = vst [vmem:[#allocation9_spill] sm:$0xff] %v3226_v57  ;;  %v3228_v51 = vpop.permute.xlu1 %793  ;;  %v3230_v23 = vpop.permute.xlu0 %791  ;;  %v4672_v57 = vld [vmem:[#allocation15_spill] sm:$0xff] }
 0x13a   : > { %4665 = vst [vmem:[#allocation10_spill] sm:$0xff] %v3228_v51 }
 0x13e   : > { %917 = vrot.lane.b32.xlu2 %v4666_v40, %s2383_s26  ;;  %v4674_v40 = vld [vmem:[#allocation11_spill] sm:$0xff] }
 0x13f   : > { %915 = vrot.lane.b32.xlu1 %v4667_v30, %s2383_s26  ;;  %913 = vrot.lane.b32.xlu0 %v4668_v42, %s2383_s26 }
 0x140   : > { %v3238_v54 = vpop.permute.xlu2 %819 }
 0x141   : > { %4669 = vst [vmem:[#allocation5_spill] sm:$0xff] %v3238_v54  ;;  %v3240_v34 = vpop.permute.xlu1 %799  ;;  %v3242_v2 = vpop.permute.xlu0 %797 }
 0x142   : > { %4670 = vst [vmem:[#allocation104_spill] sm:$0xff] %v3240_v34  ;;  %v4676_v34 = vld [vmem:[#allocation18_spill] sm:$0xff] }
 0x143   : > { %4671 = vst [vmem:[#allocation105_spill] sm:$0xff] %v3242_v2  ;;  %v4677_v2 = vld [vmem:[#allocation19_spill] sm:$0xff] }
 0x146   : > { %923 = vrot.lane.b32.xlu2 %v4672_v57, %s2383_s26 }
 0x147   : > { %921 = vrot.lane.b32.xlu1 %v4673_v18, %s2383_s26  ;;  %919 = vrot.lane.b32.xlu0 %v4674_v40, %s2383_s26 }
 0x148   : > { %v3250_v30 = vpop.permute.xlu2 %825 }
 0x149   : > { %4675 = vst [vmem:[#allocation15_spill] sm:$0xff] %v3250_v30  ;;  %v3252_v16 = vpop.permute.xlu1 %805  ;;  %v3254_v42 = vpop.permute.xlu0 %803  ;;  %v4682_v30 = vld [vmem:[#allocation21_spill] sm:$0xff] }
 0x14e   : > { %929 = vrot.lane.b32.xlu2 %v4676_v34, %s2383_s26  ;;  %v4683_v34 = vld [vmem:[#allocation17_spill] sm:$0xff] }
 0x14f   : > { %927 = vrot.lane.b32.xlu1 %v4677_v2, %s2383_s26  ;;  %925 = vrot.lane.b32.xlu0 %v4678_v38, %s2383_s26 }
 0x150   : > { %v3262_v54 = vpop.permute.xlu2 %831 }
 0x151   : > { %4679 = vst [vmem:[#allocation16_spill] sm:$0xff] %v3262_v54  ;;  %v3264_v11 = vpop.permute.xlu1 %811  ;;  %v3266_v62 = vpop.permute.xlu0 %809  ;;  %v3281_v54 = vld [vmem:[%s2438_s22 + $0x190] sm:$0x3] }
 0x152   : > { %4680 = vst [vmem:[#allocation11_spill] sm:$0xff] %v3264_v11  ;;  %v4688_v11 = vld [vmem:[#allocation24_spill] sm:$0xff] }
 0x153   : > { %4681 = vst [vmem:[#allocation106_spill] sm:$0xff] %v3266_v62  ;;  %v4689_v62 = vld [vmem:[#allocation20_spill] sm:$0xff] }
 0x154   : > { %4687 = vst [vmem:[#allocation109_spill] sm:$0xff] %v3281_v54 }
 0x156   : > { %935 = vrot.lane.b32.xlu2 %v4682_v30, %s2383_s26 }
 0x157   : > { %933 = vrot.lane.b32.xlu1 %v2756_v58, %s2383_s26  ;;  %931 = vrot.lane.b32.xlu0 %v4683_v34, %s2383_s26  ;;  %v573_v34 = vrot.slane %v3155_v29, 1 }
 0x158   : > { %v3274_v51 = vpop.permute.xlu2 %837 }
 0x159   : > { %4684 = vst [vmem:[#allocation21_spill] sm:$0xff] %v3274_v51  ;;  %v3276_v2 = vpop.permute.xlu1 %817  ;;  %v3278_v38 = vpop.permute.xlu0 %815  ;;  %v575_v51 = vrot.slane %v3281_v54, 1 }
 0x15a   : > { %4685 = vst [vmem:[#allocation107_spill] sm:$0xff] %v3276_v2  ;;  %v572_v2 = vrot.slane %v3158_v6, 1 }
 0x15b   : > { %4686 = vst [vmem:[#allocation108_spill] sm:$0xff] %v3278_v38 }
 0x15e   : > { %941 = vrot.lane.b32.xlu2 %v2780_v60, %s2383_s26  ;;  %v3299_v60 = vsel %vm407_vm0, %v573_v34, %v575_v51 }
 0x15f   : > { %939 = vrot.lane.b32.xlu1 %v4688_v11, %s2383_s26  ;;  %937 = vrot.lane.b32.xlu0 %v4689_v62, %s2383_s26  ;;  %4691 = vst [vmem:[#allocation110_spill] sm:$0xff] %v3299_v60  ;;  %v3302_v11 = vsel %vm407_vm0, %v572_v2, %v573_v34 }
 0x160   : > { %v3289_v58 = vpop.permute.xlu2 %843  ;;  %4692 = vst [vmem:[#allocation111_spill] sm:$0xff] %v3302_v11 }
 0x161   : > { %4690 = vst [vmem:[#allocation20_spill] sm:$0xff] %v3289_v58  ;;  %v3294_v38 = vpop.permute.xlu1 %823  ;;  %v3296_v5 = vpop.permute.xlu0 %821 }
 0x166   : > { %979 = vrot.lane.b32.xlu2 %v2798_v10, %s2384_s27  ;;  %v4696_v10 = vld [vmem:[#allocation25_spill] sm:$0xff] }
 0x167   : > { %945 = vrot.lane.b32.xlu1 %v3299_v60, %s2383_s26  ;;  %943 = vrot.lane.b32.xlu0 %v3302_v11, %s2383_s26 }
 0x168   : > { %v3310_v58 = vpop.permute.xlu2 %849 }
 0x169   : > { %4693 = vst [vmem:[#allocation112_spill] sm:$0xff] %v3310_v58  ;;  %v3312_v54 = vpop.permute.xlu1 %829  ;;  %v3314_v29 = vpop.permute.xlu0 %827  ;;  %v4698_v58 = vld [vmem:[#allocation27_spill] sm:$0xff] }
 0x16a   : > { %4694 = vst [vmem:[#allocation113_spill] sm:$0xff] %v3312_v54 }
 0x16b   : > { %4695 = vst [vmem:[#allocation114_spill] sm:$0xff] %v3314_v29 }
 0x16e   : > { %985 = vrot.lane.b32.xlu2 %v2817_v9, %s2384_s27 }
 0x16f   : > { %983 = vrot.lane.b32.xlu1 %v2820_v47, %s2384_s27  ;;  %981 = vrot.lane.b32.xlu0 %v4696_v10, %s2384_s27 }
 0x170   : > { %v3322_v51 = vpop.permute.xlu2 %887 }
 0x171   : > { %v3324_v2 = vpop.permute.xlu1 %835  ;;  %v3326_v34 = vpop.permute.xlu0 %833 }
 0x172   : > { %4697 = vst [vmem:[#allocation25_spill] sm:$0xff] %v3326_v34 }
 0x176   : > { %1075 = vrot.lane.b32.xlu2 %v2441_v0, %s2385_s28 }
 0x177   : > { %989 = vrot.lane.b32.xlu1 %v2841_v32, %s2384_s27  ;;  %987 = vrot.lane.b32.xlu0 %v4698_v58, %s2384_s27 }
 0x178   : > { %v3334_v54 = vpop.permute.xlu2 %893 }
 0x179   : > { %v3336_v29 = vpop.permute.xlu1 %841  ;;  %v3338_v10 = vpop.permute.xlu0 %839 }
 0x17a   : > { %4699 = vst [vmem:[#allocation27_spill] sm:$0xff] %v3336_v29  ;;  %v4703_v29 = vld [vmem:[#allocation34_spill] sm:$0xff] }
 0x17b   : > { %4700 = vst [vmem:[#allocation115_spill] sm:$0xff] %v3338_v10 }
 0x17e   : > { %1077 = vrot.lane.b32.xlu2 %v2444_v1, %s2385_s28 }
 0x17f   : > { %1267 = vrot.lane.b32.xlu1 %v2820_v47, %s2386_s29  ;;  %1171 = vrot.lane.b32.xlu0 %v2468_v13, %s2387_s30 }
 0x180   : > { %v3346_v0 = vpop.permute.xlu2 %899 }
 0x181   : > { %v3348_v34 = vpop.permute.xlu1 %847  ;;  %v3350_v60 = vpop.permute.xlu0 %845 }
 0x182   : > { %4701 = vst [vmem:[#allocation116_spill] sm:$0xff] %v3348_v34 }
 0x183   : > { %4702 = vst [vmem:[#allocation117_spill] sm:$0xff] %v3350_v60  ;;  %v4705_v60 = vld [vmem:[#allocation32_spill] sm:$0xff] }
 0x186   : > { %995 = vrot.lane.b32.xlu2 %v4703_v29, %s2384_s27 }
 0x187   : > { %1269 = vrot.lane.b32.xlu1 %v2817_v9, %s2386_s29  ;;  %1173 = vrot.lane.b32.xlu0 %v2489_v21, %s2387_s30 }
 0x188   : > { %v3358_v1 = vpop.permute.xlu2 %905 }
 0x189   : > { %v3360_v47 = vpop.permute.xlu1 %885  ;;  %v3362_v13 = vpop.permute.xlu0 %883 }
 0x18e   : > { %1175 = vrot.lane.b32.xlu2 %v2527_v36, %s2387_s30 }
 0x18f   : > { %1091 = vrot.lane.b32.xlu1 %v2573_v52, %s2385_s28  ;;  %1079 = vrot.lane.b32.xlu0 %v2508_v28, %s2385_s28 }
 0x190   : > { %v3370_v34 = vpop.permute.xlu2 %911 }
 0x191   : > { %4704 = vst [vmem:[#allocation34_spill] sm:$0xff] %v3370_v34  ;;  %v3372_v9 = vpop.permute.xlu1 %891  ;;  %v3374_v21 = vpop.permute.xlu0 %889  ;;  %v4707_v34 = vld [vmem:[#allocation33_spill] sm:$0xff] }
 0x196   : > { %1283 = vrot.lane.b32.xlu2 %v4705_v60, %s2386_s29 }
 0x197   : > { %1271 = vrot.lane.b32.xlu1 %v4698_v58, %s2386_s29  ;;  %1187 = vrot.lane.b32.xlu0 %v4657_v22, %s2387_s30 }
 0x198   : > { %v3382_v36 = vpop.permute.xlu2 %917 }
 0x199   : > { %v3384_v52 = vpop.permute.xlu1 %897  ;;  %v3386_v28 = vpop.permute.xlu0 %895 }
 0x19a   : > { %4706 = vst [vmem:[#allocation32_spill] sm:$0xff] %v3384_v52 }
 0x19e   : > { %1093 = vrot.lane.b32.xlu2 %v2567_v50, %s2385_s28 }
 0x19f   : > { %1081 = vrot.lane.b32.xlu1 %v2502_v26, %s2385_s28  ;;  %997 = vrot.lane.b32.xlu0 %v4707_v34, %s2384_s27 }
 0x1a0   : > { %v3394_v10 = vpop.permute.xlu2 %923 }
 0x1a1   : > { %4708 = vst [vmem:[#allocation33_spill] sm:$0xff] %v3394_v10  ;;  %v3396_v58 = vpop.permute.xlu1 %903  ;;  %v3398_v22 = vpop.permute.xlu0 %901 }
 0x1a6   : > { %1189 = vrot.lane.b32.xlu2 %v4656_v55, %s2387_s30 }
 0x1a7   : > { %1177 = vrot.lane.b32.xlu1 %v2524_v35, %s2387_s30  ;;  %1011 = vrot.lane.b32.xlu0 %v2908_v7, %s2384_s27 }
 0x1a8   : > { %v3406_v50 = vpop.permute.xlu2 %929 }
 0x1a9   : > { %4709 = vst [vmem:[#allocation118_spill] sm:$0xff] %v3406_v50  ;;  %v3408_v26 = vpop.permute.xlu1 %909  ;;  %v3410_v52 = vpop.permute.xlu0 %907 }
 0x1aa   : > { %4710 = vst [vmem:[#allocation119_spill] sm:$0xff] %v3408_v26 }
 0x1ab   : > { %4711 = vst [vmem:[#allocation120_spill] sm:$0xff] %v3410_v52  ;;  %v4727_v52 = vld [vmem:[#allocation29_spill] sm:$0xff] }
 0x1ae   : > { %1285 = vrot.lane.b32.xlu2 %v2888_v4, %s2386_s29 }
 0x1af   : > { %1273 = vrot.lane.b32.xlu1 %v2841_v32, %s2386_s29  ;;  %1107 = vrot.lane.b32.xlu0 %v2627_v19, %s2385_s28 }
 0x1b0   : > { %v3418_v55 = vpop.permute.xlu2 %935 }
 0x1b1   : > { %4712 = vst [vmem:[#allocation121_spill] sm:$0xff] %v3418_v55  ;;  %v3420_v35 = vpop.permute.xlu1 %915  ;;  %v3422_v10 = vpop.permute.xlu0 %913 }
 0x1b2   : > { %4713 = vst [vmem:[#allocation122_spill] sm:$0xff] %v3422_v10 }
 0x1b6   : > { %999 = vrot.lane.b32.xlu2 %v4705_v60, %s2384_s27 }
 0x1b7   : > { %1299 = vrot.lane.b32.xlu1 %v2936_v8, %s2386_s29  ;;  %1203 = vrot.lane.b32.xlu0 %v4674_v40, %s2387_s30 }
 0x1b8   : > { %v3430_v50 = vpop.permute.xlu2 %941 }
 0x1b9   : > { %4714 = vst [vmem:[#allocation123_spill] sm:$0xff] %v3430_v50  ;;  %v3432_v32 = vpop.permute.xlu1 %921  ;;  %v3434_v19 = vpop.permute.xlu0 %919 }
 0x1ba   : > { %4715 = vst [vmem:[#allocation124_spill] sm:$0xff] %v3432_v32  ;;  %v3486_v32 = vld [vmem:[%s2438_s22 + $0x68] sm:$0xff] }
 0x1be   : > { %1013 = vrot.lane.b32.xlu2 %v2939_v44, %s2384_s27  ;;  %v4728_v44 = vld [vmem:[#allocation41_spill] sm:$0xff] }
 0x1bf   : > { %1095 = vrot.lane.b32.xlu1 %v2561_v48, %s2385_s28  ;;  %1083 = vrot.lane.b32.xlu0 %v2496_v24, %s2385_s28 }
 0x1c0   : > { %v3442_v60 = vpop.permute.xlu2 %979 }
 0x1c1   : > { %v3444_v10 = vpop.permute.xlu1 %927  ;;  %v3446_v40 = vpop.permute.xlu0 %925 }
 0x1c2   : > { %4716 = vst [vmem:[#allocation125_spill] sm:$0xff] %v3444_v10  ;;  %v1631_v10 = vld [vmem:[%s4460_s1 + $0x20] sm:$0xf] }
 0x1c3   : > { %4717 = vst [vmem:[#allocation126_spill] sm:$0xff] %v3446_v40  ;;  %2236 = vmatpush.msk.msra.mxu0 %vm1729_vm2, %v1631_v10  ;;  %2272 = vmatpush.msk.msra.mxu1 %vm1729_vm2, %v1631_v10 }
 0x1c4   : > { %2273 = vmatpush.msk.msra.mxu2 %vm1729_vm2, %v1631_v10  ;;  %2274 = vmatpush.msk.msra.mxu3 %vm1729_vm2, %v1631_v10  ;;  %v1628_v10 = vld [vmem:[%s4460_s1 + $0x8] sm:$0xff] }
 0x1c6   : > { %1109 = vrot.lane.b32.xlu2 %v2630_v20, %s2385_s28  ;;  %v1630_v20 = vld [vmem:[%s4460_s1 + $0x18] sm:$0xff] }
 0x1c7   : > { %1191 = vrot.lane.b32.xlu1 %v4663_v45, %s2387_s30  ;;  %1179 = vrot.lane.b32.xlu0 %v4652_v31, %s2387_s30  ;;  %v1629_v45 = vld [vmem:[%s4460_s1 + $0x10] sm:$0xff]  ;;  %v4719_v31 = vld [vmem:[#allocation30_spill] sm:$0xff] }
 0x1c8   : > { %v3454_v50 = vpop.permute.xlu2 %985  ;;  %1745 = vmatpush.msra.mxu0 %v1630_v20  ;;  %2275 = vmatpush.msra.mxu1 %v1630_v20 }
 0x1c9   : > { %v3456_v48 = vpop.permute.xlu1 %933  ;;  %v3458_v24 = vpop.permute.xlu0 %931  ;;  %2276 = vmatpush.msra.mxu2 %v1630_v20  ;;  %2277 = vmatpush.msra.mxu3 %v1630_v20  ;;  %v4722_v20 = vld [vmem:[#allocation47_spill] sm:$0xff] }
 0x1ca   : > { %4718 = vst [vmem:[#allocation127_spill] sm:$0xff] %v3456_v48  ;;  %1746 = vmatpush.msra.mxu0 %v1629_v45  ;;  %2278 = vmatpush.msra.mxu1 %v1629_v45 }
 0x1cb   : > { %2279 = vmatpush.msra.mxu2 %v1629_v45  ;;  %2280 = vmatpush.msra.mxu3 %v1629_v45 }
 0x1cc   : > { %1747 = vmatpush.msra.mxu0 %v1628_v10  ;;  %2281 = vmatpush.msra.mxu1 %v1628_v10 }
 0x1cd   : > { %2282 = vmatpush.msra.mxu2 %v1628_v10  ;;  %2283 = vmatpush.msra.mxu3 %v1628_v10 }
 0x1ce   : > { %1205 = vrot.lane.b32.xlu2 %v4673_v18, %s2387_s30  ;;  %v1627_v18 = vld [vmem:[%s4460_s1] sm:$0xff] }
 0x1cf   : > { %1287 = vrot.lane.b32.xlu1 %v2885_v59, %s2386_s29  ;;  %1275 = vrot.lane.b32.xlu0 %v4719_v31, %s2386_s29 }
 0x1d0   : > { %v1076_v40 = vpop.permute.xlu2 %1075  ;;  %1748 = vmatpush.msra.mxu0 %v1627_v18  ;;  %2284 = vmatpush.msra.mxu1 %v1627_v18 }
 0x1d1   : > { %v3478_v55 = vpop.permute.xlu1 %939  ;;  %v3480_v26 = vpop.permute.xlu0 %937  ;;  %2285 = vmatpush.msra.mxu2 %v1627_v18  ;;  %2286 = vmatpush.msra.mxu3 %v1627_v18 }
 0x1d2   : > { %4720 = vst [vmem:[#allocation30_spill] sm:$0xff] %v3478_v55 }
 0x1d3   : > { %4721 = vst [vmem:[#allocation128_spill] sm:$0xff] %v3480_v26 }
 0x1d6   : > { %1085 = vrot.lane.b32.xlu2 %v3486_v32, %s2385_s28 }
 0x1d7   : > { %1001 = vrot.lane.b32.xlu1 %v2888_v4, %s2384_s27  ;;  %1301 = vrot.lane.b32.xlu0 %v4722_v20, %s2386_s29 }
 0x1d8   : > { %v1078_v55 = vpop.permute.xlu2 %1077 }
 0x1d9   : > { %v3494_v26 = vpop.permute.xlu1 %945  ;;  %v3496_v45 = vpop.permute.xlu0 %943 }
 0x1da   : > { %4723 = vst [vmem:[#allocation47_spill] sm:$0xff] %v3494_v26  ;;  %v2324_v26 = vld [vmem:[%s2438_s22] sm:$0xff] }
 0x1db   : > { %4724 = vst [vmem:[#allocation129_spill] sm:$0xff] %v3496_v45  ;;  %v4725_v45 = vld [vmem:[#allocation37_spill] sm:$0xff] }
 0x1dc   : > { %v1364_v11 = vsel %vm1363_vm3, %v2324_v26, %v4725_v45 }
 0x1de   : > { %1027 = vrot.lane.b32.xlu2 %v2987_v27, %s2384_s27 }
 0x1df   : > { %1015 = vrot.lane.b32.xlu1 %v2936_v8, %s2384_s27  ;;  %1097 = vrot.lane.b32.xlu0 %v2564_v49, %s2385_s28 }
 0x1e0   : > { %v3504_v4 = vpop.permute.xlu2 %995 }
 0x1e1   : > { %v3506_v10 = vpop.permute.xlu1 %983  ;;  %v982_v48 = vpop.permute.xlu0 %981 }
 0x1e6   : > { %1111 = vrot.lane.b32.xlu2 %v2668_v56, %s2385_s28  ;;  %v1397_v56 = vsel %vm1396_vm4, %v1364_v11, %v3040_v3 }
 0x1e7   : > { %1193 = vrot.lane.b32.xlu1 %v4662_v43, %s2387_s30  ;;  %1181 = vrot.lane.b32.xlu0 %v4651_v33, %s2387_s30  ;;  %v1430_v33 = vsel %vm1429_vm5, %v1397_v56, %v3216_v53  ;;  %v4726_v43 = vld [vmem:[#allocation38_spill] sm:$0xff]  ;;  %v2325_v56 = vld [vmem:[%s2438_s22 + $0x8] sm:$0xff] }
 0x1e8   : > { %v3514_v18 = vpop.permute.xlu2 %1175  ;;  %v1463_v27 = vsel %vm1462_vm7, %v1430_v33, %v3362_v13  ;;  %v1365_v13 = vsel %vm1363_vm3, %v2325_v56, %v4728_v44  ;;  %v2327_v56 = vld [vmem:[%s2438_s22 + $0x60] sm:$0xff] }
 0x1e9   : > { %v3516_v8 = vpop.permute.xlu1 %989  ;;  %v3518_v49 = vpop.permute.xlu0 %987  ;;  %v1496_v3 = vsel %vm1495_vm6, %v1463_v27, %v3442_v60 }
 0x1ea   : > { %v1529_v53 = vsel %vm1528_vm8, %v1496_v3, %v1076_v40 }
 0x1ee   : > { %1289 = vrot.lane.b32.xlu2 %v4726_v43, %s2386_s29 }
 0x1ef   : > { %1277 = vrot.lane.b32.xlu1 %v4727_v52, %s2386_s29  ;;  %1123 = vrot.lane.b32.xlu0 %v2734_v17, %s2385_s28  ;;  %v1398_v17 = vsel %vm1396_vm4, %v1365_v13, %v3092_v39 }
 0x1f0   : > { %v1284_v11 = vpop.permute.xlu2 %1283  ;;  %v1431_v27 = vsel %vm1429_vm5, %v1398_v17, %v3178_v63 }
 0x1f1   : > { %v1268_v26 = vpop.permute.xlu1 %1267  ;;  %v1172_v45 = vpop.permute.xlu0 %1171  ;;  %v1464_v60 = vsel %vm1462_vm7, %v1431_v27, %v3360_v47 }
 0x1f2   : > { %v1562_v33 = vsel %vm1561_vm9, %v1529_v53, %v1172_v45  ;;  %v1497_v40 = vsel %vm1495_vm6, %v1464_v60, %v982_v48 }
 0x1f3   : > { %v1595_v6 = vsel %vm1594_vm10, %v1562_v33, %v1268_v26  ;;  %v1530_v63 = vsel %vm1528_vm8, %v1497_v40, %v1078_v55  ;;  %v4729_v55 = vld [vmem:[#allocation36_spill] sm:$0xff]  ;;  %v2328_v40 = vld [vmem:[%s2438_s22 + $0xc0] sm:$0xff] }
 0x1f4   : > { %2237 = vmatmul.msk.f32.vlgmr.msra.gmra.mxu0 %vm1632_vm11, %v1595_v6 }
 0x1f6   : > { %1303 = vrot.lane.b32.xlu2 %v2965_v14, %s2386_s29 }
 0x1f7   : > { %1219 = vrot.lane.b32.xlu1 %v4682_v30, %s2387_s30  ;;  %1207 = vrot.lane.b32.xlu0 %v4672_v57, %s2387_s30  ;;  %v2326_v30 = vld [vmem:[%s2438_s22 + $0x18] sm:$0xff] }
 0x1f8   : > { %v1094_v44 = vpop.permute.xlu2 %1093  ;;  %v1366_v48 = vsel %vm1363_vm3, %v2326_v30, %v4729_v55 }
 0x1f9   : > { %v1270_v39 = vpop.permute.xlu1 %1269  ;;  %v1174_v6 = vpop.permute.xlu0 %1173  ;;  %v1399_v45 = vsel %vm1396_vm4, %v1366_v48, %v3090_v37 }
 0x1fa   : > { %v1563_v47 = vsel %vm1561_vm9, %v1530_v63, %v1174_v6 }
 0x1fb   : > { %v1596_v3 = vsel %vm1594_vm10, %v1563_v47, %v1270_v39 }
 0x1fc   : > { %2238 = vmatmul.msk.f32.gmra.mxu0 %vm1632_vm11, %v1596_v3  ;;  %v4731_v3 = vld [vmem:[#allocation51_spill] sm:$0xff] }
 0x1fe   : > { %1003 = vrot.lane.b32.xlu2 %v2885_v59, %s2384_s27  ;;  %v1432_v59 = vsel %vm1429_vm5, %v1399_v45, %v3230_v23  ;;  %v2332_v45 = vld [vmem:[%s2438_s22 + $0x20] sm:$0xff] }
 0x1ff   : > { %991 = vrot.lane.b32.xlu1 %v4719_v31, %s2384_s27  ;;  %1315 = vrot.lane.b32.xlu0 %v3016_v15, %s2386_s29  ;;  %v4730_v31 = vld [vmem:[#allocation31_spill] sm:$0xff]  ;;  %v1465_v33 = vsel %vm1462_vm7, %v1432_v59, %v3322_v51  ;;  %v3593_v51 = vld [vmem:[%s2438_s22 + $0x78] sm:$0xff]  ;;  %v4732_v59 = vld [vmem:[#allocation40_spill] sm:$0xff] }
 0x200   : > { %v1190_v57 = vpop.permute.xlu2 %1189  ;;  %v1372_v13 = vsel %vm1363_vm3, %v2327_v56, %v4730_v31  ;;  %v1498_v27 = vsel %vm1495_vm6, %v1465_v33, %v3506_v10  ;;  %v1367_v56 = vsel %vm1363_vm3, %v2332_v45, %v4732_v59  ;;  %v4733_v31 = vld [vmem:[#allocation70_spill] sm:$0xff] }
 0x201   : > { %v1092_v53 = vpop.permute.xlu1 %1091  ;;  %v1080_v26 = vpop.permute.xlu0 %1079  ;;  %v1405_v17 = vsel %vm1396_vm4, %v1372_v13, %v3114_v61  ;;  %v4734_v13 = vld [vmem:[#allocation10_spill] sm:$0xff] }
 0x202   : > { %v1438_v60 = vsel %vm1429_vm5, %v1405_v17, %v3254_v42  ;;  %v1531_v37 = vsel %vm1528_vm8, %v1498_v27, %v1080_v26 }
 0x203   : > { %v1471_v23 = vsel %vm1462_vm7, %v1438_v60, %v3346_v0  ;;  %v4735_v60 = vld [vmem:[#allocation14_spill] sm:$0xff] }
 0x204   : > { %v1504_v61 = vsel %vm1495_vm6, %v1471_v23, %v3504_v4  ;;  %v1373_v4 = vsel %vm1363_vm3, %v3486_v32, %v4731_v3  ;;  %v4740_v3 = vld [vmem:[#allocation63_spill] sm:$0xff] }
 0x205   : > { %v1537_v10 = vsel %vm1528_vm8, %v1504_v61, %v1092_v53 }
 0x206   : > { %1017 = vrot.lane.b32.xlu2 %v4722_v20, %s2384_s27  ;;  %v1564_v20 = vsel %vm1561_vm9, %v1531_v37, %v3514_v18  ;;  %v1406_v18 = vsel %vm1396_vm4, %v1373_v4, %v3076_v25  ;;  %v4736_v37 = vld [vmem:[#allocation43_spill] sm:$0xff]  ;;  %v4741_v4 = vld [vmem:[#allocation53_spill] sm:$0xff] }
 0x207   : > { %1099 = vrot.lane.b32.xlu1 %v2328_v40, %s2385_s28  ;;  %1087 = vrot.lane.b32.xlu0 %v3593_v51, %s2385_s28 }
 0x208   : > { %v1286_v42 = vpop.permute.xlu2 %1285 }
 0x209   : > { %v1272_v39 = vpop.permute.xlu1 %1271  ;;  %v1188_v63 = vpop.permute.xlu0 %1187 }
 0x20a   : > { %v1570_v0 = vsel %vm1561_vm9, %v1537_v10, %v1188_v63  ;;  %v1597_v6 = vsel %vm1594_vm10, %v1564_v20, %v1272_v39  ;;  %v4738_v63 = vld [vmem:[#allocation92_spill] sm:$0xff] }
 0x20b   : > { %2239 = vmatmul.msk.f32.gmra.mxu0 %vm1632_vm11, %v1597_v6  ;;  %v1603_v47 = vsel %vm1594_vm10, %v1570_v0, %v1284_v11  ;;  %v1439_v11 = vsel %vm1429_vm5, %v1406_v18, %v3252_v16  ;;  %v3632_v16 = vld [vmem:[%s2438_s22 + $0x158] sm:$0xff] }
 0x20c   : > { %2245 = vmatmul.msk.f32.vlgmr.msra.gmra.mxu1 %vm1632_vm11, %v1603_v47  ;;  %v1472_v32 = vsel %vm1462_vm7, %v1439_v11, %v3398_v22  ;;  %v3637_v22 = vld [vmem:[%s2438_s22 + $0x110] sm:$0xff]  ;;  %v4739_v0 = vld [vmem:[#allocation5_spill] sm:$0xff] }
 0x20e   : > { %1195 = vrot.lane.b32.xlu2 %v4661_v41, %s2387_s30 }
 0x20f   : > { %1183 = vrot.lane.b32.xlu1 %v2555_v46, %s2387_s30  ;;  %1029 = vrot.lane.b32.xlu0 %v2984_v12, %s2384_s27 }
 0x210   : > { %v3620_v30 = vpop.permute.xlu2 %999 }
 0x211   : > { %v1082_v41 = vpop.permute.xlu1 %1081  ;;  %v998_v55 = vpop.permute.xlu0 %997 }
 0x212   : > { %v1505_v25 = vsel %vm1495_vm6, %v1472_v32, %v998_v55 }
 0x213   : > { %v1538_v48 = vsel %vm1528_vm8, %v1505_v25, %v1094_v44  ;;  %v2334_v25 = vld [vmem:[%s2438_s22 + $0x80] sm:$0xff] }
 0x214   : > { %v1571_v46 = vsel %vm1561_vm9, %v1538_v48, %v1190_v57 }
 0x215   : > { %v1604_v53 = vsel %vm1594_vm10, %v1571_v46, %v1286_v42 }
 0x216   : > { %2246 = vmatmul.msk.f32.gmra.mxu1 %vm1632_vm11, %v1604_v53  ;;  %1279 = vrot.lane.b32.xlu2 %v4703_v29, %s2386_s29  ;;  %v1400_v29 = vsel %vm1396_vm4, %v1367_v56, %v4733_v31  ;;  %v4743_v56 = vld [vmem:[#allocation26_spill] sm:$0xff] }
 0x217   : > { %1125 = vrot.lane.b32.xlu1 %v3632_v16, %s2385_s28  ;;  %1113 = vrot.lane.b32.xlu0 %v3637_v22, %s2385_s28  ;;  %v1433_v33 = vsel %vm1429_vm5, %v1400_v29, %v4734_v13  ;;  %v4744_v29 = vld [vmem:[#allocation50_spill] sm:$0xff] }
 0x218   : > { %v3641_v44 = vpop.permute.xlu2 %1013  ;;  %v1466_v17 = vsel %vm1462_vm7, %v1433_v33, %v3374_v21  ;;  %v1374_v13 = vsel %vm1363_vm3, %v3593_v51, %v4744_v29  ;;  %v4745_v33 = vld [vmem:[#allocation81_spill] sm:$0xff] }
 0x219   : > { %v1178_v57 = vpop.permute.xlu1 %1177  ;;  %v1012_v26 = vpop.permute.xlu0 %1011  ;;  %v1499_v27 = vsel %vm1495_vm6, %v1466_v17, %v3454_v50 }
 0x21a   : > { %v1532_v23 = vsel %vm1528_vm8, %v1499_v27, %v1082_v41 }
 0x21b   : > { %v1565_v42 = vsel %vm1561_vm9, %v1532_v23, %v1178_v57  ;;  %v4742_v57 = vld [vmem:[#allocation3_spill] sm:$0xff]  ;;  %v4748_v23 = vld [vmem:[#allocation6_spill] sm:$0xff] }
 0x21e   : > { %1221 = vrot.lane.b32.xlu2 %v4689_v62, %s2387_s30  ;;  %v4737_v62 = vld [vmem:[#allocation60_spill] sm:$0xff] }
 0x21f   : > { %1209 = vrot.lane.b32.xlu1 %v4735_v60, %s2387_s30  ;;  %1291 = vrot.lane.b32.xlu0 %v4736_v37, %s2386_s29  ;;  %v1380_v50 = vsel %vm1363_vm3, %v2328_v40, %v4737_v62 }
 0x220   : > { %v3661_v61 = vpop.permute.xlu2 %1109  ;;  %v1413_v20 = vsel %vm1396_vm4, %v1380_v50, %v4738_v63  ;;  %v3729_v50 = vld [vmem:[%s2438_s22 + $0x120] sm:$0xff] }
 0x221   : > { %v1274_v10 = vpop.permute.xlu1 %1273  ;;  %v1108_v21 = vpop.permute.xlu0 %1107  ;;  %v1446_v6 = vsel %vm1429_vm5, %v1413_v20, %v4739_v0 }
 0x222   : > { %v1598_v39 = vsel %vm1594_vm10, %v1565_v42, %v1274_v10  ;;  %v1479_v47 = vsel %vm1462_vm7, %v1446_v6, %v3420_v35  ;;  %v2333_v35 = vld [vmem:[%s2438_s22 + $0xc8] sm:$0xff] }
 0x223   : > { %2240 = vmatmul.msk.f32.gmra.mxu0 %vm1632_vm11, %v1598_v39  ;;  %v1512_v40 = vsel %vm1495_vm6, %v1479_v47, %v1012_v26  ;;  %v3720_v39 = vld [vmem:[%s2438_s22 + $0x168] sm:$0xff] }
 0x224   : > { %v1545_v11 = vsel %vm1528_vm8, %v1512_v40, %v1108_v21 }
 0x226   : > { %993 = vrot.lane.b32.xlu2 %v4727_v52, %s2384_s27 }
 0x227   : > { %1317 = vrot.lane.b32.xlu1 %v4740_v3, %s2386_s29  ;;  %1305 = vrot.lane.b32.xlu0 %v4741_v4, %s2386_s29 }
 0x228   : > { %v1206_v18 = vpop.permute.xlu2 %1205 }
 0x229   : > { %v1300_v32 = vpop.permute.xlu1 %1299  ;;  %v1204_v41 = vpop.permute.xlu0 %1203 }
 0x22a   : > { %v1578_v55 = vsel %vm1561_vm9, %v1545_v11, %v1204_v41  ;;  %v4750_v11 = vld [vmem:[#allocation44_spill] sm:$0xff]  ;;  %v4751_v41 = vld [vmem:[#allocation91_spill] sm:$0xff] }
 0x22b   : > { %v1611_v52 = vsel %vm1594_vm10, %v1578_v55, %v1300_v32  ;;  %v1381_v32 = vsel %vm1363_vm3, %v2333_v35, %v4750_v11 }
 0x22c   : > { %2253 = vmatmul.msk.f32.vlgmr.msra.gmra.mxu2 %vm1632_vm11, %v1611_v52  ;;  %v1414_v55 = vsel %vm1396_vm4, %v1381_v32, %v4751_v41 }
 0x22d   : > { %v1447_v52 = vsel %vm1429_vm5, %v1414_v55, %v3296_v5 }
 0x22e   : > { %1101 = vrot.lane.b32.xlu2 %v2333_v35, %s2385_s28  ;;  %v4753_v35 = vld [vmem:[#allocation42_spill] sm:$0xff] }
 0x22f   : > { %1089 = vrot.lane.b32.xlu1 %v2334_v25, %s2385_s28  ;;  %1005 = vrot.lane.b32.xlu0 %v4726_v43, %s2384_s27  ;;  %v2335_v43 = vld [vmem:[%s2438_s22 + $0x30] sm:$0xff] }
 0x230   : > { %v3691_v48 = vpop.permute.xlu2 %1085  ;;  %v1368_v31 = vsel %vm1363_vm3, %v2335_v43, %v4743_v56 }
 0x231   : > { %v1096_v46 = vpop.permute.xlu1 %1095  ;;  %v1084_v53 = vpop.permute.xlu0 %1083  ;;  %v1401_v17 = vsel %vm1396_vm4, %v1368_v31, %v4745_v33  ;;  %v4755_v31 = vld [vmem:[#allocation52_spill] sm:$0xff] }
 0x236   : > { %1185 = vrot.lane.b32.xlu2 %v4742_v57, %s2387_s30 }
 0x237   : > { %1031 = vrot.lane.b32.xlu1 %v3016_v15, %s2384_s27  ;;  %1019 = vrot.lane.b32.xlu0 %v2965_v14, %s2384_s27  ;;  %v4746_v15 = vld [vmem:[#allocation86_spill] sm:$0xff]  ;;  %v4747_v14 = vld [vmem:[#allocation100_spill] sm:$0xff] }
 0x238   : > { %v3699_v26 = vpop.permute.xlu2 %1027  ;;  %v1407_v27 = vsel %vm1396_vm4, %v1374_v13, %v4746_v15  ;;  %v1434_v60 = vsel %vm1429_vm5, %v1401_v17, %v4747_v14  ;;  %v4757_v13 = vld [vmem:[#allocation35_spill] sm:$0xff]  ;;  %v4758_v17 = vld [vmem:[#allocation85_spill] sm:$0xff] }
 0x239   : > { %v1192_v45 = vpop.permute.xlu1 %1191  ;;  %v1180_v59 = vpop.permute.xlu0 %1179  ;;  %v1440_v42 = vsel %vm1429_vm5, %v1407_v27, %v4748_v23  ;;  %v1467_v10 = vsel %vm1462_vm7, %v1434_v60, %v3372_v9  ;;  %v4749_v9 = vld [vmem:[#allocation8_spill] sm:$0xff]  ;;  %v1375_v33 = vsel %vm1363_vm3, %v2334_v25, %v4757_v13  ;;  %v4759_v27 = vld [vmem:[#allocation106_spill] sm:$0xff]  ;;  %v2338_v23 = vld [vmem:[%s2438_s22 + $0xd8] sm:$0xff] }
 0x23a   : > { %v1473_v21 = vsel %vm1462_vm7, %v1440_v42, %v3396_v58  ;;  %v1500_v51 = vsel %vm1495_vm6, %v1467_v10, %v3518_v49  ;;  %v1408_v15 = vsel %vm1396_vm4, %v1375_v33, %v4758_v17  ;;  %v4770_v17 = vld [vmem:[#allocation58_spill] sm:$0xff] }
 0x23b   : > { %v1506_v62 = vsel %vm1495_vm6, %v1473_v21, %v3620_v30  ;;  %v1533_v63 = vsel %vm1528_vm8, %v1500_v51, %v1084_v53  ;;  %v4752_v53 = vld [vmem:[#allocation19_spill] sm:$0xff]  ;;  %v1441_v14 = vsel %vm1429_vm5, %v1408_v15, %v4759_v27 }
 0x23c   : > { %v1539_v58 = vsel %vm1528_vm8, %v1506_v62, %v1096_v46  ;;  %v1566_v49 = vsel %vm1561_vm9, %v1533_v63, %v1180_v59  ;;  %v1480_v46 = vsel %vm1462_vm7, %v1447_v52, %v3382_v36  ;;  %v1474_v60 = vsel %vm1462_vm7, %v1441_v14, %v3358_v1  ;;  %v2339_v62 = vld [vmem:[%s2438_s22 + $0x38] sm:$0xff]  ;;  %v4761_v63 = vld [vmem:[#allocation80_spill] sm:$0xff]  ;;  %v4764_v52 = vld [vmem:[#allocation66_spill] sm:$0xff] }
 0x23d   : > { %v1572_v0 = vsel %vm1561_vm9, %v1539_v58, %v1192_v45  ;;  %v1513_v57 = vsel %vm1495_vm6, %v1480_v46, %v3641_v44  ;;  %v4754_v44 = vld [vmem:[#allocation62_spill] sm:$0xff]  ;;  %v1382_v46 = vsel %vm1363_vm3, %v2338_v23, %v4764_v52 }
 0x23e   : > { %1127 = vrot.lane.b32.xlu2 %v3720_v39, %s2385_s28  ;;  %v1546_v45 = vsel %vm1528_vm8, %v1513_v57, %v3661_v61 }
 0x23f   : > { %1115 = vrot.lane.b32.xlu1 %v3729_v50, %s2385_s28  ;;  %1197 = vrot.lane.b32.xlu0 %v4749_v9, %s2387_s30  ;;  %v1579_v5 = vsel %vm1561_vm9, %v1546_v45, %v1206_v18  ;;  %v4760_v9 = vld [vmem:[#allocation28_spill] sm:$0xff] }
 0x240   : > { %v3737_v20 = vpop.permute.xlu2 %1111  ;;  %v1369_v1 = vsel %vm1363_vm3, %v2339_v62, %v4760_v9  ;;  %v2343_v62 = vld [vmem:[%s2438_s22 + $0x48] sm:$0xff]  ;;  %v4772_v9 = vld [vmem:[#allocation46_spill] sm:$0xff] }
 0x241   : > { %v1288_v6 = vpop.permute.xlu1 %1287  ;;  %v1276_v30 = vpop.permute.xlu0 %1275 }
 0x242   : > { %v1599_v47 = vsel %vm1594_vm10, %v1566_v49, %v1276_v30  ;;  %v1605_v40 = vsel %vm1594_vm10, %v1572_v0, %v1288_v6  ;;  %v1402_v0 = vsel %vm1396_vm4, %v1369_v1, %v4761_v63  ;;  %v3803_v30 = vld [vmem:[%s2438_s22 + $0x128] sm:$0xff]  ;;  %v1370_v1 = vsel %vm1363_vm3, %v2343_v62, %v4772_v9  ;;  %v4774_v63 = vld [vmem:[#allocation104_spill] sm:$0xff]  ;;  %v4788_v62 = vld [vmem:[#allocation21_spill] sm:$0xff] }
 0x243   : > { %2241 = vmatmul.msk.f32.gmra.mxu0 %vm1632_vm11, %v1599_v47  ;;  %2247 = vmatmul.msk.f32.gmra.mxu1 %vm1632_vm11, %v1605_v40  ;;  %v4763_v40 = vld [vmem:[#allocation13_spill] sm:$0xff] }
 0x246   : > { %1211 = vrot.lane.b32.xlu2 %v4752_v53, %s2387_s30  ;;  %v4765_v53 = vld [vmem:[#allocation82_spill] sm:$0xff] }
 0x247   : > { %1293 = vrot.lane.b32.xlu1 %v4753_v35, %s2386_s29  ;;  %1281 = vrot.lane.b32.xlu0 %v4707_v34, %s2386_s29  ;;  %v4756_v34 = vld [vmem:[#allocation24_spill] sm:$0xff]  ;;  %v1415_v57 = vsel %vm1396_vm4, %v1382_v46, %v4765_v53  ;;  %v4778_v46 = vld [vmem:[#allocation93_spill] sm:$0xff] }
 0x248   : > { %v1290_v59 = vpop.permute.xlu2 %1289  ;;  %v4779_v53 = vld [vmem:[#allocation48_spill] sm:$0xff] }
 0x249   : > { %v1002_v36 = vpop.permute.xlu1 %1001  ;;  %v1302_v43 = vpop.permute.xlu0 %1301 }
 0x24a   : > { %v1612_v56 = vsel %vm1594_vm10, %v1579_v5, %v1302_v43  ;;  %v1507_v25 = vsel %vm1495_vm6, %v1474_v60, %v1002_v36  ;;  %v3834_v5 = vld [vmem:[%s2438_s22 + $0x170] sm:$0xff] }
 0x24b   : > { %2254 = vmatmul.msk.f32.gmra.mxu2 %vm1632_vm11, %v1612_v56 }
 0x24e   : > { %1319 = vrot.lane.b32.xlu2 %v4754_v44, %s2386_s29 }
 0x24f   : > { %1307 = vrot.lane.b32.xlu1 %v4755_v31, %s2386_s29  ;;  %1223 = vrot.lane.b32.xlu0 %v4756_v34, %s2387_s30 }
 0x250   : > { %v1304_v61 = vpop.permute.xlu2 %1303 }
 0x251   : > { %v1016_v29 = vpop.permute.xlu1 %1015  ;;  %v1098_v18 = vpop.permute.xlu0 %1097 }
 0x252   : > { %v1540_v10 = vsel %vm1528_vm8, %v1507_v25, %v1098_v18  ;;  %v4768_v18 = vld [vmem:[#allocation87_spill] sm:$0xff] }
 0x256   : > { %1021 = vrot.lane.b32.xlu2 %v4741_v4, %s2384_s27 }
 0x257   : > { %1103 = vrot.lane.b32.xlu1 %v2338_v23, %s2385_s28  ;;  %1007 = vrot.lane.b32.xlu0 %v4736_v37, %s2384_s27  ;;  %v4762_v37 = vld [vmem:[#allocation105_spill] sm:$0xff] }
 0x258   : > { %v3787_v42 = vpop.permute.xlu2 %1003  ;;  %v1435_v49 = vsel %vm1429_vm5, %v1402_v0, %v4762_v37  ;;  %v3896_v37 = vld [vmem:[%s2438_s22 + $0x138] sm:$0xff] }
 0x259   : > { %v1194_v21 = vpop.permute.xlu1 %1193  ;;  %v1182_v51 = vpop.permute.xlu0 %1181  ;;  %v1468_v6 = vsel %vm1462_vm7, %v1435_v49, %v3334_v54  ;;  %v4775_v49 = vld [vmem:[#allocation12_spill] sm:$0xff] }
 0x25a   : > { %v1573_v4 = vsel %vm1561_vm9, %v1540_v10, %v1194_v21  ;;  %v1501_v47 = vsel %vm1495_vm6, %v1468_v6, %v3516_v8 }
 0x25b   : > { %v1606_v58 = vsel %vm1594_vm10, %v1573_v4, %v1290_v59  ;;  %v1534_v11 = vsel %vm1528_vm8, %v1501_v47, %v3691_v48  ;;  %v4766_v59 = vld [vmem:[#allocation18_spill] sm:$0xff] }
 0x25c   : > { %2248 = vmatmul.msk.f32.gmra.mxu1 %vm1632_vm11, %v1606_v58  ;;  %v1567_v54 = vsel %vm1561_vm9, %v1534_v11, %v1182_v51  ;;  %v4773_v58 = vld [vmem:[#allocation73_spill] sm:$0xff] }
 0x25e   : > { %1117 = vrot.lane.b32.xlu2 %v3803_v30, %s2385_s28 }
 0x25f   : > { %1199 = vrot.lane.b32.xlu1 %v4763_v40, %s2387_s30  ;;  %1033 = vrot.lane.b32.xlu0 %v4740_v3, %s2384_s27  ;;  %v1448_v3 = vsel %vm1429_vm5, %v1415_v57, %v3294_v38 }
 0x260   : > { %v3815_v32 = vpop.permute.xlu2 %1017  ;;  %v1481_v48 = vsel %vm1462_vm7, %v1448_v3, %v3434_v19 }
 0x261   : > { %v1278_v41 = vpop.permute.xlu1 %1277  ;;  %v1124_v55 = vpop.permute.xlu0 %1123  ;;  %v1514_v45 = vsel %vm1495_vm6, %v1481_v48, %v1016_v29  ;;  %v4767_v29 = vld [vmem:[#allocation72_spill] sm:$0xff] }
 0x262   : > { %v1600_v8 = vsel %vm1594_vm10, %v1567_v54, %v1278_v41  ;;  %v1547_v38 = vsel %vm1528_vm8, %v1514_v45, %v3737_v20  ;;  %v4769_v20 = vld [vmem:[#allocation67_spill] sm:$0xff] }
 0x263   : > { %2242 = vmatmul.msk.f32.gmra.mxu0 %vm1632_vm11, %v1600_v8  ;;  %v578_v8 = vrot.slane %v4778_v46, 2 }
 0x266   : > { %1213 = vrot.lane.b32.xlu2 %v4766_v59, %s2387_s30  ;;  %v2345_v59 = vld [vmem:[%s2438_s22 + $0x90] sm:$0xff] }
 0x267   : > { %1295 = vrot.lane.b32.xlu1 %v2908_v7, %s2386_s29  ;;  %1129 = vrot.lane.b32.xlu0 %v3834_v5, %s2385_s28  ;;  %v1388_v7 = vsel %vm1363_vm3, %v3729_v50, %v4767_v29  ;;  %v4771_v50 = vld [vmem:[#allocation23_spill] sm:$0xff] }
 0x268   : > { %v3838_v36 = vpop.permute.xlu2 %1195  ;;  %v1421_v13 = vsel %vm1396_vm4, %v1388_v7, %v4768_v18  ;;  %v4782_v7 = vld [vmem:[#allocation11_spill] sm:$0xff] }
 0x269   : > { %v1220_v43 = vpop.permute.xlu1 %1219  ;;  %v1208_v19 = vpop.permute.xlu0 %1207  ;;  %v1454_v33 = vsel %vm1429_vm5, %v1421_v13, %v3324_v2  ;;  %v4783_v13 = vld [vmem:[#allocation120_spill] sm:$0xff] }
 0x26a   : > { %v1580_v56 = vsel %vm1561_vm9, %v1547_v38, %v1208_v19 }
 0x26b   : > { %v1613_v34 = vsel %vm1594_vm10, %v1580_v56, %v1304_v61  ;;  %v1487_v61 = vsel %vm1462_vm7, %v1454_v33, %v3458_v24  ;;  %v4781_v56 = vld [vmem:[#allocation78_spill] sm:$0xff] }
 0x26c   : > { %2255 = vmatmul.msk.f32.gmra.mxu2 %vm1632_vm11, %v1613_v34  ;;  %v1520_v2 = vsel %vm1495_vm6, %v1487_v61, %v3699_v26  ;;  %v2342_v26 = vld [vmem:[%s2438_s22 + $0xe0] sm:$0xff] }
 0x26d   : > { %v1553_v27 = vsel %vm1528_vm8, %v1520_v2, %v1124_v55  ;;  %v4776_v55 = vld [vmem:[#allocation17_spill] sm:$0xff] }
 0x26e   : > { %1321 = vrot.lane.b32.xlu2 %v4769_v20, %s2386_s29  ;;  %v1586_v60 = vsel %vm1561_vm9, %v1553_v27, %v1220_v43  ;;  %v4780_v43 = vld [vmem:[#allocation56_spill] sm:$0xff]  ;;  %v4784_v2 = vld [vmem:[#allocation57_spill] sm:$0xff] }
 0x26f   : > { %1309 = vrot.lane.b32.xlu1 %v4770_v17, %s2386_s29  ;;  %1225 = vrot.lane.b32.xlu0 %v4771_v50, %s2387_s30  ;;  %v1376_v38 = vsel %vm1363_vm3, %v2345_v59, %v4780_v43  ;;  %v4795_v43 = vld [vmem:[#allocation22_spill] sm:$0xff] }
 0x270   : > { %v1280_v15 = vpop.permute.xlu2 %1279  ;;  %v1409_v34 = vsel %vm1396_vm4, %v1376_v38, %v4781_v56 }
 0x271   : > { %v992_v24 = vpop.permute.xlu1 %991  ;;  %v3869_v14 = vpop.f32.mrf.mxu0  ;;  %v1442_v18 = vsel %vm1429_vm5, %v1409_v34, %v4782_v7 }
 0x272   : > { %1846 = vst [vmem:[%s3864_s23] sm:$0xff] %v3869_v14  ;;  %v1316_v23 = vpop.permute.xlu0 %1315  ;;  %v1475_v33 = vsel %vm1462_vm7, %v1442_v18, %v4783_v13 }
 0x273   : > { %v1619_v25 = vsel %vm1594_vm10, %v1586_v60, %v1316_v23  ;;  %v1508_v61 = vsel %vm1495_vm6, %v1475_v33, %v3787_v42  ;;  %v4787_v42 = vld [vmem:[#allocation102_spill] sm:$0xff]  ;;  %v356_v33 = vld [vmem:[%s2438_s22 + $0x198] sm:$0xff] }
 0x274   : > { %2261 = vmatmul.msk.f32.vlgmr.msra.gmra.mxu3 %vm1632_vm11, %v1619_v25 }
 0x276   : > { %1023 = vrot.lane.b32.xlu2 %v4755_v31, %s2384_s27  ;;  %v1403_v31 = vsel %vm1396_vm4, %v1370_v1, %v4773_v58 }
 0x277   : > { %1105 = vrot.lane.b32.xlu1 %v2342_v26, %s2385_s28  ;;  %1009 = vrot.lane.b32.xlu0 %v4753_v35, %s2384_s27  ;;  %v1436_v0 = vsel %vm1429_vm5, %v1403_v31, %v4774_v63  ;;  %v4789_v31 = vld [vmem:[#allocation65_spill] sm:$0xff] }
 0x278   : > { %v3882_v10 = vpop.permute.xlu2 %1221  ;;  %v1469_v35 = vsel %vm1462_vm7, %v1436_v0, %v3386_v28  ;;  %v1383_v63 = vsel %vm1363_vm3, %v2342_v26, %v4789_v31  ;;  %v4793_v26 = vld [vmem:[#allocation124_spill] sm:$0xff]  ;;  %v4798_v31 = vld [vmem:[#allocation45_spill] sm:$0xff] }
 0x279   : > { %v1100_v21 = vpop.permute.xlu1 %1099  ;;  %v3884_v51 = vpop.f32.mrf.mxu0  ;;  %v1502_v6 = vsel %vm1495_vm6, %v1469_v35, %v992_v24  ;;  %v4786_v24 = vld [vmem:[#allocation71_spill] sm:$0xff]  ;;  %v4791_v35 = vld [vmem:[#allocation97_spill] sm:$0xff] }
 0x27a   : > { %1847 = vst [vmem:[%s3864_s23 + $0x8] sm:$0xff] %v3884_v51  ;;  %v1088_v4 = vpop.permute.xlu0 %1087  ;;  %v1541_v50 = vsel %vm1528_vm8, %v1508_v61, %v1100_v21  ;;  %v1389_v60 = vsel %vm1363_vm3, %v3803_v30, %v4786_v24  ;;  %v4790_v30 = vld [vmem:[#allocation127_spill] sm:$0xff]  ;;  %v357_v61 = vld [vmem:[%s2438_s22 + $0x1a0] sm:$0xff] }
 0x27b   : > { %v1535_v40 = vsel %vm1528_vm8, %v1502_v6, %v1088_v4  ;;  %v1422_v25 = vsel %vm1396_vm4, %v1389_v60, %v4787_v42  ;;  %v1574_v21 = vsel %vm1561_vm9, %v1541_v50, %v3838_v36  ;;  %v1416_v36 = vsel %vm1396_vm4, %v1383_v63, %v4791_v35  ;;  %v4792_v6 = vld [vmem:[#allocation15_spill] sm:$0xff] }
 0x27c   : > { %v1455_v9 = vsel %vm1429_vm5, %v1422_v25, %v4788_v62  ;;  %v590_v50 = vrot.slane %v356_v33, 2  ;;  %v591_v46 = vrot.slane %v357_v61, 2  ;;  %v358_v42 = vld [vmem:[%s2438_s22 + $0x1a8] sm:$0x3] }
 0x27d   : > { %v1488_v0 = vsel %vm1462_vm7, %v1455_v9, %v4790_v30  ;;  %v588_v25 = vrot.slane %v358_v42, 1  ;;  %v4799_v30 = vld [vmem:[#allocation89_spill] sm:$0xff] }
 0x27e   : > { %1119 = vrot.lane.b32.xlu2 %v3896_v37, %s2385_s28 }
 0x27f   : > { %1201 = vrot.lane.b32.xlu1 %v4775_v49, %s2387_s30  ;;  %1035 = vrot.lane.b32.xlu0 %v4754_v44, %s2384_s27  ;;  %v4777_v44 = vld [vmem:[#allocation94_spill] sm:$0xff] }
 0x280   : > { %v3907_v47 = vpop.permute.xlu2 %993  ;;  %v577_v52 = vrot.slane %v4777_v44, 2 }
 0x281   : > { %v1184_v11 = vpop.permute.xlu1 %1183 }
 0x282   : > { %v1568_v54 = vsel %vm1561_vm9, %v1535_v40, %v1184_v11  ;;  %v1030_v41 = vpop.permute.xlu0 %1029  ;;  %v579_v29 = vsel %vm488_vm1, %v577_v52, %v578_v8  ;;  %v1449_v40 = vsel %vm1429_vm5, %v1416_v36, %v4792_v6  ;;  %v4800_v36 = vld [vmem:[#allocation83_spill] sm:$0xff]  ;;  %v4801_v6 = vld [vmem:[#allocation9_spill] sm:$0xff] }
 0x283   : > { %v1601_v28 = vsel %vm1594_vm10, %v1568_v54, %v1280_v15  ;;  %v4785_v15 = vld [vmem:[#allocation111_spill] sm:$0xff]  ;;  %v1521_v49 = vsel %vm1495_vm6, %v1488_v0, %v1030_v41  ;;  %v3979_v54 = vld [vmem:[%s2438_s22 + $0x140] sm:$0xff] }
 0x284   : > { %2243 = vmatmul.msk.f32.gmra.mxu0 %vm1632_vm11, %v1601_v28  ;;  %v1482_v28 = vsel %vm1462_vm7, %v1449_v40, %v4793_v26  ;;  %v4802_v26 = vld [vmem:[#allocation4_spill] sm:$0xff] }
 0x285   : > { %v1515_v41 = vsel %vm1495_vm6, %v1482_v28, %v3815_v32  ;;  %v4794_v32 = vld [vmem:[#allocation110_spill] sm:$0xff] }
 0x286   : > { %1215 = vrot.lane.b32.xlu2 %v4776_v55, %s2387_s30 }
 0x287   : > { %1297 = vrot.lane.b32.xlu1 %v4779_v53, %s2386_s29  ;;  %1131 = vrot.lane.b32.xlu0 %v4777_v44, %s2385_s28 }
 0x288   : > { %v3921_v57 = vpop.f32.mrf.mxu0  ;;  %v3923_v3 = vpop.permute.xlu2 %1101 }
 0x289   : > { %1848 = vst [vmem:[%s3864_s23 + $0x10] sm:$0xff] %v3921_v57  ;;  %v1126_v48 = vpop.permute.xlu1 %1125  ;;  %v3927_v45 = vpop.f32.mrf.mxu1 }
 0x28a   : > { %1854 = vst [vmem:[%s3864_s23 + $0x40] sm:$0xff] %v3927_v45  ;;  %v1114_v19 = vpop.permute.xlu0 %1113  ;;  %v1554_v11 = vsel %vm1528_vm8, %v1521_v49, %v1126_v48 }
 0x28b   : > { %v1548_v44 = vsel %vm1528_vm8, %v1515_v41, %v1114_v19  ;;  %v1587_v53 = vsel %vm1561_vm9, %v1554_v11, %v3882_v10  ;;  %v2347_v10 = vld [vmem:[%s2438_s22 + $0x188] sm:$0xff]  ;;  %v4796_v19 = vld [vmem:[#allocation109_spill] sm:$0xff] }
 0x28c   : > { %v580_v56 = vrot.slane %v4796_v19, 2  ;;  %v4803_v41 = vld [vmem:[#allocation119_spill] sm:$0xff]  ;;  %v4805_v19 = vld [vmem:[#allocation49_spill] sm:$0xff] }
 0x28e   : > { %1323 = vrot.lane.b32.xlu2 %v579_v29, %s2386_s29  ;;  %v581_v13 = vsel %vm488_vm1, %v578_v8, %v580_v56  ;;  %v592_v8 = vsel %vm488_vm1, %v590_v50, %v591_v46 }
 0x28f   : > { %1311 = vrot.lane.b32.xlu1 %v4784_v2, %s2386_s29  ;;  %1227 = vrot.lane.b32.xlu0 %v4785_v15, %s2387_s30  ;;  %v585_v2 = vrot.slane %v356_v33, 1  ;;  %v586_v15 = vrot.slane %v357_v61, 1 }
 0x290   : > { %v3951_v27 = vpop.permute.xlu2 %1185 }
 0x291   : > { %v1210_v23 = vpop.permute.xlu1 %1209  ;;  %v589_v11 = vsel %vm407_vm0, %v586_v15, %v588_v25 }
 0x292   : > { %v1292_v4 = vpop.permute.xlu0 %1291  ;;  %v1581_v48 = vsel %vm1561_vm9, %v1548_v44, %v1210_v23 }
 0x293   : > { %v3962_v1 = vpop.f32.mrf.mxu1  ;;  %v1607_v58 = vsel %vm1594_vm10, %v1574_v21, %v1292_v4  ;;  %v2348_v4 = vld [vmem:[%s2438_s22 + $0x98] sm:$0xff]  ;;  %v4797_v21 = vld [vmem:[#allocation55_spill] sm:$0xff] }
 0x294   : > { %1855 = vst [vmem:[%s3864_s23 + $0x48] sm:$0xff] %v3962_v1  ;;  %2249 = vmatmul.msk.f32.gmra.mxu1 %vm1632_vm11, %v1607_v58  ;;  %v1377_v62 = vsel %vm1363_vm3, %v2348_v4, %v4797_v21  ;;  %v2349_v58 = vld [vmem:[%s2438_s22 + $0x50] sm:$0xff]  ;;  %v4810_v4 = vld [vmem:[#allocation33_spill] sm:$0xff] }
 0x295   : > { %v1371_v63 = vsel %vm1363_vm3, %v2349_v58, %v4798_v31  ;;  %v1410_v0 = vsel %vm1396_vm4, %v1377_v62, %v4799_v30  ;;  %v4812_v31 = vld [vmem:[#allocation121_spill] sm:$0xff] }
 0x296   : > { %1121 = vrot.lane.b32.xlu2 %v3979_v54, %s2385_s28  ;;  %v1404_v49 = vsel %vm1396_vm4, %v1371_v63, %v4800_v36  ;;  %v1443_v40 = vsel %vm1429_vm5, %v1410_v0, %v4801_v6 }
 0x297   : > { %1037 = vrot.lane.b32.xlu1 %v4769_v20, %s2384_s27  ;;  %1025 = vrot.lane.b32.xlu0 %v4770_v17, %s2384_s27  ;;  %v1437_v28 = vsel %vm1429_vm5, %v1404_v49, %v4802_v26  ;;  %v1476_v44 = vsel %vm1462_vm7, %v1443_v40, %v4803_v41 }
 0x298   : > { %v3991_v55 = vpop.permute.xlu2 %1127 }
 0x299   : > { %v1318_v52 = vpop.permute.xlu1 %1317 }
 0x29a   : > { %v1306_v59 = vpop.permute.xlu0 %1305  ;;  %v1620_v20 = vsel %vm1594_vm10, %v1587_v53, %v1318_v52  ;;  %v4804_v52 = vld [vmem:[#allocation32_spill] sm:$0xff] }
 0x29b   : > { %v1614_v17 = vsel %vm1594_vm10, %v1581_v48, %v1306_v59  ;;  %2262 = vmatmul.msk.f32.gmra.mxu3 %vm1632_vm11, %v1620_v20  ;;  %v1470_v53 = vsel %vm1462_vm7, %v1437_v28, %v4804_v52 }
 0x29c   : > { %2256 = vmatmul.msk.f32.gmra.mxu2 %vm1632_vm11, %v1614_v17  ;;  %v1503_v20 = vsel %vm1495_vm6, %v1470_v53, %v3907_v47  ;;  %v4806_v47 = vld [vmem:[#allocation96_spill] sm:$0xff] }
 0x29e   : > { %1229 = vrot.lane.b32.xlu2 %v4794_v32, %s2387_s30 }
 0x29f   : > { %1217 = vrot.lane.b32.xlu1 %v4795_v43, %s2387_s30  ;;  %1133 = vrot.lane.b32.xlu0 %v2347_v10, %s2385_s28  ;;  %v593_v43 = vrot.slane %v358_v42, 2  ;;  %v2350_v10 = vld [vmem:[%s2438_s22 + $0xf0] sm:$0xff]  ;;  %v4809_v42 = vld [vmem:[#allocation101_spill] sm:$0xff] }
 0x2a0   : > { %v4007_v38 = vpop.f32.mrf.mxu0  ;;  %v4012_v7 = vpop.permute.xlu2 %1211  ;;  %v1384_v56 = vsel %vm1363_vm3, %v2350_v10, %v4805_v19 }
 0x2a1   : > { %1849 = vst [vmem:[%s3864_s23 + $0x18] sm:$0xff] %v4007_v38  ;;  %v1090_v34 = vpop.permute.xlu1 %1089  ;;  %v1417_v50 = vsel %vm1396_vm4, %v1384_v56, %v4806_v47  ;;  %v594_v21 = vsel %vm488_vm1, %v591_v46, %v593_v43  ;;  %v4816_v43 = vld [vmem:[#allocation34_spill] sm:$0xff] }
 0x2a2   : > { %v1006_v18 = vpop.permute.xlu0 %1005  ;;  %v1536_v17 = vsel %vm1528_vm8, %v1503_v20, %v1090_v34 }
 0x2a3   : > { %v1509_v48 = vsel %vm1495_vm6, %v1476_v44, %v1006_v18  ;;  %v1569_v34 = vsel %vm1561_vm9, %v1536_v17, %v3951_v27  ;;  %v4813_v44 = vld [vmem:[#allocation39_spill] sm:$0xff]  ;;  %v4815_v17 = vld [vmem:[#allocation108_spill] sm:$0xff] }
 0x2a4   : > { %v1542_v32 = vsel %vm1528_vm8, %v1509_v48, %v3923_v3  ;;  %v4814_v48 = vld [vmem:[#allocation88_spill] sm:$0xff] }
 0x2a6   : > { %1039 = vrot.lane.b32.xlu2 %v579_v29, %s2384_s27  ;;  %v587_v29 = vsel %vm407_vm0, %v585_v2, %v586_v15  ;;  %v4808_v15 = vld [vmem:[#allocation114_spill] sm:$0xff] }
 0x2a7   : > { %1325 = vrot.lane.b32.xlu1 %v581_v13, %s2386_s29  ;;  %1313 = vrot.lane.b32.xlu0 %v2984_v12, %s2386_s29 }
 0x2a8   : > { %v4023_v23 = vpop.permute.xlu2 %1319 }
 0x2a9   : > { %v1032_v24 = vpop.permute.xlu1 %1031 }
 0x2aa   : > { %v1020_v60 = vpop.permute.xlu0 %1019 }
 0x2ae   : > { %1327 = vrot.lane.b32.xlu2 %v592_v8, %s2386_s29  ;;  %v1450_v8 = vsel %vm1429_vm5, %v1417_v50, %v4808_v15  ;;  %v4818_v15 = vld [vmem:[#allocation84_spill] sm:$0xff] }
 0x2af   : > { %1135 = vrot.lane.b32.xlu0 %v356_v33, %s2385_s28  ;;  %v4030_v12 = vpop.f32.mrf.mxu2  ;;  %1231 = vrot.lane.b32.xlu1 %v587_v29, %s2387_s30  ;;  %v1483_v27 = vsel %vm1462_vm7, %v1450_v8, %v4810_v4 }
 0x2b0   : > { %1862 = vst [vmem:[%s3864_s23 + $0x80] sm:$0xff] %v4030_v12  ;;  %v4055_v59 = vpop.permute.xlu2 %1021  ;;  %v1516_v58 = vsel %vm1495_vm6, %v1483_v27, %v1020_v60  ;;  %v4821_v27 = vld [vmem:[#allocation90_spill] sm:$0xff] }
 0x2b1   : > { %v1116_v9 = vpop.permute.xlu1 %1115 }
 0x2b2   : > { %v1198_v35 = vpop.permute.xlu0 %1197  ;;  %v1549_v30 = vsel %vm1528_vm8, %v1516_v58, %v1116_v9 }
 0x2b3   : > { %v1575_v18 = vsel %vm1561_vm9, %v1542_v32, %v1198_v35  ;;  %v1582_v60 = vsel %vm1561_vm9, %v1549_v30, %v4012_v7 }
 0x2b6   : > { %1233 = vrot.lane.b32.xlu2 %v589_v11, %s2387_s30 }
 0x2b7   : > { %1041 = vrot.lane.b32.xlu0 %v581_v13, %s2384_s27  ;;  %1137 = vrot.lane.b32.xlu1 %v357_v61, %s2385_s28  ;;  %v4807_v61 = vld [vmem:[#allocation59_spill] sm:$0xff]  ;;  %s301_s28 = scalar_lea.vmem %s4463_s4, %s4858_s15 }
 0x2b8   : > { %v1390_v3 = vsel %vm1363_vm3, %v3896_v37, %v4807_v61  ;;  %v4811_v37 = vld [vmem:[#allocation115_spill] sm:$0xff]  ;;  %v1118_v35 = vpop.permute.xlu2 %1117  ;;  %v4817_v61 = vld [vmem:[#allocation69_spill] sm:$0xff] }
 0x2b9   : > { %v1294_v33 = vpop.permute.xlu1 %1293  ;;  %v1423_v25 = vsel %vm1396_vm4, %v1390_v3, %v4809_v42 }
 0x2ba   : > { %v1282_v2 = vpop.permute.xlu0 %1281  ;;  %v1608_v13 = vsel %vm1594_vm10, %v1575_v18, %v1294_v33  ;;  %v1456_v62 = vsel %vm1429_vm5, %v1423_v25, %v4811_v37  ;;  %v4820_v25 = vld [vmem:[#allocation113_spill] sm:$0xff]  ;;  %v4822_v37 = vld [vmem:[#allocation126_spill] sm:$0xff] }
 0x2bb   : > { %v1602_v29 = vsel %vm1594_vm10, %v1569_v34, %v1282_v2  ;;  %2250 = vmatmul.msk.f32.gmra.mxu1 %vm1632_vm11, %v1608_v13  ;;  %v1489_v63 = vsel %vm1462_vm7, %v1456_v62, %v4812_v31  ;;  %v2352_v13 = vld [vmem:[%s2438_s22 + $0xf8] sm:$0xff]  ;;  %v4823_v31 = vld [vmem:[#allocation27_spill] sm:$0xff] }
 0x2bc   : > { %2244 = vmatmul.msk.f32.gmra.mxu0 %vm1632_vm11, %v1602_v29  ;;  %v1522_v0 = vsel %vm1495_vm6, %v1489_v63, %v1032_v24  ;;  %v1385_v3 = vsel %vm1363_vm3, %v2352_v13, %v4817_v61  ;;  %v4819_v29 = vld [vmem:[#allocation75_spill] sm:$0xff] }
 0x2bd   : > { %v1555_v24 = vsel %vm1528_vm8, %v1522_v0, %v3991_v55  ;;  %v2351_v55 = vld [vmem:[%s2438_s22 + $0xa8] sm:$0xff]  ;;  %v1418_v8 = vsel %vm1396_vm4, %v1385_v3, %v4818_v15  ;;  %v1391_v42 = vsel %vm1363_vm3, %v3979_v54, %v4819_v29  ;;  %v4824_v0 = vld [vmem:[#allocation128_spill] sm:$0xff] }
 0x2be   : > { %v1378_v52 = vsel %vm1363_vm3, %v2351_v55, %v4813_v44  ;;  %v1451_v4 = vsel %vm1429_vm5, %v1418_v8, %v4820_v25  ;;  %v2354_v15 = vld [vmem:[%s2438_s22 + $0x108] sm:$0xff]  ;;  %v4829_v8 = vld [vmem:[#allocation68_spill] sm:$0xff] }
 0x2bf   : > { %1329 = vrot.lane.b32.xlu0 %v594_v21, %s2386_s29  ;;  %v1411_v20 = vsel %vm1396_vm4, %v1378_v52, %v4814_v48  ;;  %v1424_v21 = vsel %vm1396_vm4, %v1391_v42, %v4821_v27  ;;  %v1484_v62 = vsel %vm1462_vm7, %v1451_v4, %v4822_v37  ;;  %v2353_v52 = vld [vmem:[%s2438_s22 + $0xb0] sm:$0xff]  ;;  %v1386_v29 = vsel %vm1363_vm3, %v2354_v15, %v4829_v8  ;;  %v4830_v42 = vld [vmem:[#allocation99_spill] sm:$0xff] }
 0x2c0   : > { %v4095_v36 = vpop.f32.mrf.mxu0  ;;  %v4097_v49 = vpop.f32.mrf.mxu1  ;;  %v1444_v32 = vsel %vm1429_vm5, %v1411_v20, %v4815_v17  ;;  %v1457_v63 = vsel %vm1429_vm5, %v1424_v21, %v4823_v31  ;;  %v1517_v30 = vsel %vm1495_vm6, %v1484_v62, %v4055_v59  ;;  %v1419_v25 = vsel %vm1396_vm4, %v1386_v29, %v4830_v42  ;;  %v2355_v27 = vld [vmem:[%s2438_s22 + $0x150] sm:$0xff]  ;;  %v4831_v21 = vld [vmem:[#allocation74_spill] sm:$0xff]  ;;  %v4843_v29 = vld [vmem:[#allocation123_spill] sm:$0xff] }
 0x2c1   : > { %1850 = vst [vmem:[%s3864_s23 + $0x20] sm:$0xff] %v4095_v36  ;;  %v1308_v46 = vpop.permute.xlu1 %1307  ;;  %v1214_v28 = vpop.permute.xlu2 %1213  ;;  %v1477_v10 = vsel %vm1462_vm7, %v1444_v32, %v4816_v43  ;;  %v1550_v54 = vsel %vm1528_vm8, %v1517_v30, %v1118_v35  ;;  %v1392_v37 = vsel %vm1363_vm3, %v2355_v27, %v4831_v21  ;;  %v4832_v62 = vld [vmem:[#allocation16_spill] sm:$0xff] }
 0x2c2   : > { %1856 = vst [vmem:[%s3864_s23 + $0x50] sm:$0xff] %v4097_v49  ;;  %v1224_v9 = vpop.permute.xlu0 %1223  ;;  %v1615_v6 = vsel %vm1594_vm10, %v1582_v60, %v1308_v46  ;;  %v1490_v46 = vsel %vm1462_vm7, %v1457_v63, %v4824_v0  ;;  %v1452_v31 = vsel %vm1429_vm5, %v1419_v25, %v4832_v62  ;;  %v4833_v63 = vld [vmem:[#allocation103_spill] sm:$0xff]  ;;  %v4834_v0 = vld [vmem:[#allocation125_spill] sm:$0xff]  ;;  %v4844_v25 = vld [vmem:[#allocation118_spill] sm:$0xff] }
 0x2c3   : > { %v1588_v40 = vsel %vm1561_vm9, %v1555_v24, %v1224_v9  ;;  %2257 = vmatmul.msk.f32.gmra.mxu2 %vm1632_vm11, %v1615_v6  ;;  %v1583_v24 = vsel %vm1561_vm9, %v1550_v54, %v1214_v28  ;;  %v1425_v30 = vsel %vm1396_vm4, %v1392_v37, %v4833_v63  ;;  %v4835_v54 = vld [vmem:[#allocation20_spill] sm:$0xff] }
 0x2c4   : > { %v1621_v11 = vsel %vm1594_vm10, %v1588_v40, %v4023_v23 }
 0x2c5   : > { %2263 = vmatmul.msk.f32.gmra.mxu3 %vm1632_vm11, %v1621_v11 }
 0x2c9   : > { %v1104_v26 = vpop.permute.xlu1 %1103  ;;  %v1322_v19 = vpop.permute.xlu2 %1321 }
 0x2ca   : > { %v1008_v7 = vpop.permute.xlu0 %1007 }
 0x2cb   : > { %v1510_v56 = vsel %vm1495_vm6, %v1477_v10, %v1008_v7  ;;  %v4827_v10 = vld [vmem:[#allocation107_spill] sm:$0xff] }
 0x2cc   : > { %v1543_v18 = vsel %vm1528_vm8, %v1510_v56, %v1104_v26  ;;  %v4828_v56 = vld [vmem:[#allocation122_spill] sm:$0xff] }
 0x2ce   : > { %v4113_v41 = vpop.f32.mrf.mxu2 }
 0x2cf   : > { %1863 = vst [vmem:[%s3864_s23 + $0x88] sm:$0xff] %v4113_v41 }
 0x2d1   : > { %v1200_v53 = vpop.permute.xlu1 %1199  ;;  %v1024_v58 = vpop.permute.xlu2 %1023 }
 0x2d2   : > { %v1034_v23 = vpop.permute.xlu0 %1033  ;;  %v1576_v33 = vsel %vm1561_vm9, %v1543_v18, %v1200_v53  ;;  %v4825_v53 = vld [vmem:[#allocation61_spill] sm:$0xff] }
 0x2d3   : > { %v1523_v9 = vsel %vm1495_vm6, %v1490_v46, %v1034_v23  ;;  %v1379_v48 = vsel %vm1363_vm3, %v2353_v52, %v4825_v53  ;;  %v4826_v23 = vld [vmem:[#allocation79_spill] sm:$0xff]  ;;  %v1485_v46 = vsel %vm1462_vm7, %v1452_v31, %v4834_v0 }
 0x2d4   : > { %v1412_v17 = vsel %vm1396_vm4, %v1379_v48, %v4826_v23 }
 0x2d9   : > { %v1296_v47 = vpop.permute.xlu1 %1295  ;;  %v4129_v50 = vpop.f32.mrf.mxu1 }
 0x2da   : > { %v1130_v2 = vpop.permute.xlu0 %1129  ;;  %v1609_v34 = vsel %vm1594_vm10, %v1576_v33, %v1296_v47  ;;  %1857 = vst [vmem:[%s3864_s23 + $0x58] sm:$0xff] %v4129_v50  ;;  %v1120_v28 = vpop.permute.xlu2 %1119 }
 0x2db   : > { %2251 = vmatmul.msk.f32.gmra.mxu1 %vm1632_vm11, %v1609_v34  ;;  %v1556_v40 = vsel %vm1528_vm8, %v1523_v9, %v1130_v2  ;;  %v1518_v9 = vsel %vm1495_vm6, %v1485_v46, %v1024_v58 }
 0x2e0   : > { %v4156_v60 = vpop.f32.mrf.mxu0 }
 0x2e1   : > { %1851 = vst [vmem:[%s3864_s23 + $0x28] sm:$0xff] %v4156_v60  ;;  %v1310_v6 = vpop.permute.xlu1 %1309 }
 0x2e2   : > { %v1226_v11 = vpop.permute.xlu0 %1225  ;;  %v1616_v59 = vsel %vm1594_vm10, %v1583_v24, %v1310_v6  ;;  %v1216_v32 = vpop.permute.xlu2 %1215  ;;  %v1458_v24 = vsel %vm1429_vm5, %v1425_v30, %v4835_v54  ;;  %v4836_v6 = vld [vmem:[#allocation30_spill] sm:$0xff] }
 0x2e3   : > { %v1589_v26 = vsel %vm1561_vm9, %v1556_v40, %v1226_v11  ;;  %2258 = vmatmul.msk.f32.gmra.mxu2 %vm1632_vm11, %v1616_v59  ;;  %v1491_v40 = vsel %vm1462_vm7, %v1458_v24, %v4836_v6  ;;  %v1551_v11 = vsel %vm1528_vm8, %v1518_v9, %v1120_v28  ;;  %v4845_v24 = vld [vmem:[#allocation77_spill] sm:$0xff] }
 0x2e4   : > { %v1622_v35 = vsel %vm1594_vm10, %v1589_v26, %v1322_v19  ;;  %v1445_v19 = vsel %vm1429_vm5, %v1412_v17, %v4827_v10  ;;  %v1584_v59 = vsel %vm1561_vm9, %v1551_v11, %v1216_v32  ;;  %v4837_v32 = vld [vmem:[#allocation64_spill] sm:$0xff]  ;;  %v1394_v9 = vsel %vm1363_vm3, %v3720_v39, %v4845_v24 }
 0x2e5   : > { %2264 = vmatmul.msk.f32.gmra.mxu3 %vm1632_vm11, %v1622_v35  ;;  %v1478_v18 = vsel %vm1462_vm7, %v1445_v19, %v4828_v56  ;;  %v4838_v56 = vld [vmem:[#allocation54_spill] sm:$0xff] }
 0x2e9   : > { %v1106_v7 = vpop.permute.xlu1 %1105 }
 0x2ea   : > { %v1010_v55 = vpop.permute.xlu0 %1009  ;;  %v1324_v4 = vpop.permute.xlu2 %1323 }
 0x2eb   : > { %v1511_v33 = vsel %vm1495_vm6, %v1478_v18, %v1010_v55  ;;  %v1387_v18 = vsel %vm1363_vm3, %v3637_v22, %v4838_v56  ;;  %v4851_v56 = vld [vmem:[#allocation112_spill] sm:$0xff] }
 0x2ec   : > { %v1544_v2 = vsel %vm1528_vm8, %v1511_v33, %v1106_v7  ;;  %v4839_v33 = vld [vmem:[#allocation2_spill] sm:$0xff] }
 0x2ef   : > { %v4168_v44 = vpop.f32.mrf.mxu2 }
 0x2f0   : > { %1864 = vst [vmem:[%s3864_s23 + $0x90] sm:$0xff] %v4168_v44 }
 0x2f1   : > { %v1202_v20 = vpop.permute.xlu1 %1201 }
 0x2f2   : > { %v1036_v43 = vpop.permute.xlu0 %1035  ;;  %v1577_v34 = vsel %vm1561_vm9, %v1544_v2, %v1202_v20  ;;  %v1122_v48 = vpop.permute.xlu2 %1121 }
 0x2f3   : > { %v1524_v26 = vsel %vm1495_vm6, %v1491_v40, %v1036_v43  ;;  %v1393_v43 = vsel %vm1363_vm3, %v3632_v16, %v4837_v32  ;;  %v4842_v16 = vld [vmem:[#allocation25_spill] sm:$0xff]  ;;  %v4846_v40 = vld [vmem:[#allocation95_spill] sm:$0xff] }
 0x2f4   : > { %v1426_v2 = vsel %vm1396_vm4, %v1393_v43, %v4839_v33  ;;  %v1427_v11 = vsel %vm1396_vm4, %v1394_v9, %v4846_v40  ;;  %v4850_v43 = vld [vmem:[#allocation7_spill] sm:$0xff] }
 0x2f7   : > { %v4182_v47 = vpop.f32.mrf.mxu3 }
 0x2f8   : > { %1870 = vst [vmem:[%s3864_s23 + $0xc0] sm:$0xff] %v4182_v47 }
 0x2f9   : > { %v1298_v13 = vpop.permute.xlu1 %1297 }
 0x2fa   : > { %v1132_v61 = vpop.permute.xlu0 %1131  ;;  %v1610_v3 = vsel %vm1594_vm10, %v1577_v34, %v1298_v13  ;;  %v1230_v17 = vpop.permute.xlu2 %1229  ;;  %v4840_v13 = vld [vmem:[#allocation98_spill] sm:$0xff] }
 0x2fb   : > { %2252 = vmatmul.msk.f32.gmra.mxu1 %vm1632_vm11, %v1610_v3  ;;  %v1557_v7 = vsel %vm1528_vm8, %v1524_v26, %v1132_v61  ;;  %v1420_v61 = vsel %vm1396_vm4, %v1387_v18, %v4840_v13  ;;  %v4841_v3 = vld [vmem:[#allocation117_spill] sm:$0xff]  ;;  %v4847_v26 = vld [vmem:[#allocation116_spill] sm:$0xff] }
 0x2fc   : > { %v1459_v15 = vsel %vm1429_vm5, %v1426_v2, %v4841_v3  ;;  %v1453_v8 = vsel %vm1429_vm5, %v1420_v61, %v4842_v16  ;;  %v4852_v2 = vld [vmem:[#allocation47_spill] sm:$0xff] }
 0x2fd   : > { %v1492_v42 = vsel %vm1462_vm7, %v1459_v15, %v4843_v29  ;;  %v1486_v22 = vsel %vm1462_vm7, %v1453_v8, %v4844_v25 }
 0x301   : > { %v1312_v35 = vpop.permute.xlu1 %1311  ;;  %v4213_v55 = vpop.f32.mrf.mxu0 }
 0x302   : > { %v1228_v52 = vpop.permute.xlu0 %1227  ;;  %v1617_v53 = vsel %vm1594_vm10, %v1584_v59, %v1312_v35  ;;  %1852 = vst [vmem:[%s3864_s23 + $0x30] sm:$0xff] %v4213_v55  ;;  %v1040_v63 = vpop.permute.xlu2 %1039  ;;  %v1460_v35 = vsel %vm1429_vm5, %v1427_v11, %v4847_v26 }
 0x303   : > { %v1590_v58 = vsel %vm1561_vm9, %v1557_v7, %v1228_v52  ;;  %2259 = vmatmul.msk.f32.gmra.mxu2 %vm1632_vm11, %v1617_v53  ;;  %v4848_v7 = vld [vmem:[#allocation129_spill] sm:$0xff] }
 0x304   : > { %v1623_v28 = vsel %vm1594_vm10, %v1590_v58, %v1324_v4  ;;  %v1493_v52 = vsel %vm1462_vm7, %v1460_v35, %v4848_v7 }
 0x305   : > { %2265 = vmatmul.msk.f32.gmra.mxu3 %vm1632_vm11, %v1623_v28  ;;  %v1526_v39 = vsel %vm1495_vm6, %v1493_v52, %v1040_v63 }
 0x309   : > { %v1038_v20 = vpop.permute.xlu1 %1037 }
 0x30a   : > { %v1026_v23 = vpop.permute.xlu0 %1025  ;;  %v1525_v4 = vsel %vm1495_vm6, %v1492_v42, %v1038_v20  ;;  %v1328_v28 = vpop.permute.xlu2 %1327 }
 0x30b   : > { %v1519_v27 = vsel %vm1495_vm6, %v1486_v22, %v1026_v23 }
 0x30c   : > { %v1552_v37 = vsel %vm1528_vm8, %v1519_v27, %v1122_v48  ;;  %v1878_v27 = vadd.f32 %v3884_v51, %v3869_v14 }
 0x311   : > { %v4225_v10 = vpop.f32.mrf.mxu1  ;;  %v1218_v19 = vpop.permute.xlu1 %1217 }
 0x312   : > { %1858 = vst [vmem:[%s3864_s23 + $0x60] sm:$0xff] %v4225_v10  ;;  %v1134_v34 = vpop.permute.xlu0 %1133  ;;  %v1585_v30 = vsel %vm1561_vm9, %v1552_v37, %v1218_v19 }
 0x313   : > { %v1558_v21 = vsel %vm1528_vm8, %v1525_v4, %v1134_v34 }
 0x314   : > { %v1591_v31 = vsel %vm1561_vm9, %v1558_v21, %v1230_v17  ;;  %v4849_v17 = vld [vmem:[#allocation76_spill] sm:$0xff]  ;;  %v1879_v21 = vadd.f32 %v1878_v27, %v3921_v57 }
 0x315   : > { %v1395_v32 = vsel %vm1363_vm3, %v3834_v5, %v4849_v17  ;;  %v1234_v5 = vpop.permute.xlu2 %1233 }
 0x316   : > { %v1428_v19 = vsel %vm1396_vm4, %v1395_v32, %v4850_v43  ;;  %v1880_v37 = vadd.f32 %v1879_v21, %v4007_v38 }
 0x317   : > { %v1461_v18 = vsel %vm1429_vm5, %v1428_v19, %v4851_v56 }
 0x318   : > { %v1494_v34 = vsel %vm1462_vm7, %v1461_v18, %v4852_v2 }
 0x319   : > { %v1326_v62 = vpop.permute.xlu1 %1325 }
 0x31a   : > { %v1314_v0 = vpop.permute.xlu0 %1313  ;;  %v1624_v46 = vsel %vm1594_vm10, %v1591_v31, %v1326_v62  ;;  %v1881_v62 = vadd.f32 %v1880_v37, %v4095_v36 }
 0x31b   : > { %v1618_v54 = vsel %vm1594_vm10, %v1585_v30, %v1314_v0  ;;  %2266 = vmatmul.msk.f32.gmra.mxu3 %vm1632_vm11, %v1624_v46 }
 0x31c   : > { %2260 = vmatmul.msk.f32.gmra.mxu2 %vm1632_vm11, %v1618_v54  ;;  %v1882_v31 = vadd.f32 %v1881_v62, %v4156_v60 }
 0x31e   : > { %v4257_v6 = vpop.f32.mrf.mxu3  ;;  %v1883_v63 = vadd.f32 %v1882_v31, %v4213_v55 }
 0x31f   : > { %v4261_v59 = vpop.f32.mrf.mxu2  ;;  %1871 = vst [vmem:[%s3864_s23 + $0xc8] sm:$0xff] %v4257_v6 }
 0x320   : > { %1865 = vst [vmem:[%s3864_s23 + $0x98] sm:$0xff] %v4261_v59 }
 0x321   : > { %v1232_v53 = vpop.permute.xlu1 %1231 }
 0x322   : > { %v1136_v58 = vpop.permute.xlu0 %1135 }
 0x323   : > { %v1559_v48 = vsel %vm1528_vm8, %v1526_v39, %v1136_v58 }
 0x324   : > { %v1592_v20 = vsel %vm1561_vm9, %v1559_v48, %v1232_v53 }
 0x325   : > { %v1625_v23 = vsel %vm1594_vm10, %v1592_v20, %v1328_v28 }
 0x326   : > { %2267 = vmatmul.msk.f32.gmra.mxu3 %vm1632_vm11, %v1625_v23 }
 0x329   : > { %v1138_v61 = vpop.permute.xlu1 %1137 }
 0x32a   : > { %v1042_v33 = vpop.permute.xlu0 %1041 }
 0x32b   : > { %v1527_v13 = vsel %vm1495_vm6, %v1494_v34, %v1042_v33 }
 0x32c   : > { %v1560_v3 = vsel %vm1528_vm8, %v1527_v13, %v1138_v61  ;;  %v2388_v61 = vmov 256.0  }
 0x32d   : > { %v1593_v15 = vsel %vm1561_vm9, %v1560_v3, %v1234_v5  ;;  %2321 = vrcp.f32 %v2388_v61 }
 0x332   : > { %v1330_v16 = vpop.permute.xlu0 %1329 }
 0x333   : > { %v1626_v8 = vsel %vm1594_vm10, %v1593_v15, %v1330_v16  ;;  %v2322_v5 = vpop.eup %2321 }
 0x334   : > { %2268 = vmatmul.msk.f32.gmra.mxu3 %vm1632_vm11, %v1626_v8  ;;  %v1916_v16 = vmul.f32 256.0, %v2322_v5  ;;  %vm1920_vm12 = vweird.f32 %v2322_v5 }
 0x336   : > { %v1917_v21 = vsub.f32 1.0, %v1916_v16 }
 0x338   : > { %v4290_v29 = vpop.f32.mrf.mxu1  ;;  %v1918_v31 = vmul.f32 %v2322_v5, %v1917_v21 }
 0x339   : > { %v4292_v42 = vpop.f32.mrf.mxu0  ;;  %1859 = vst [vmem:[%s3864_s23 + $0x68] sm:$0xff] %v4290_v29 }
 0x33a   : > { %1853 = vst [vmem:[%s3864_s23 + $0x38] sm:$0xff] %v4292_v42  ;;  %v1884_v30 = vadd.f32 %v1883_v63, %v4292_v42 }
 0x33c   : > { %v1885_v54 = vadd.f32 %v1884_v30, %v3927_v45 }
 0x33e   : > { %v1886_v24 = vadd.f32 %v1885_v54, %v3962_v1  ;;  %v1919_v54 = vadd.f32 %v2322_v5, %v1918_v31 }
 0x340   : > { %v1887_v9 = vadd.f32 %v1886_v24, %v4097_v49 }
 0x342   : > { %v1888_v40 = vadd.f32 %v1887_v9, %v4129_v50 }
 0x344   : > { %v1889_v26 = vadd.f32 %v1888_v40, %v4225_v10  ;;  %v1921_v40 = vsel %vm1920_vm12, %v2322_v5, %v1919_v54 }
 0x346   : > { %v4298_v25 = vpop.f32.mrf.mxu2  ;;  %v1890_v35 = vadd.f32 %v1889_v26, %v4290_v29 }
 0x347   : > { %1866 = vst [vmem:[%s3864_s23 + $0xa0] sm:$0xff] %v4298_v25 }
 0x348   : > { %v4302_v22 = vpop.f32.mrf.mxu3 }
 0x349   : > { %1872 = vst [vmem:[%s3864_s23 + $0xd0] sm:$0xff] %v4302_v22 }
 0x358   : > { %v4306_v4 = vpop.f32.mrf.mxu1 }
 0x359   : > { %1860 = vst [vmem:[%s3864_s23 + $0x70] sm:$0xff] %v4306_v4  ;;  %v1891_v7 = vadd.f32 %v1890_v35, %v4306_v4 }
 0x366   : > { %v4318_v0 = vpop.f32.mrf.mxu2 }
 0x367   : > { %1867 = vst [vmem:[%s3864_s23 + $0xa8] sm:$0xff] %v4318_v0 }
 0x368   : > { %v4322_v46 = vpop.f32.mrf.mxu3 }
 0x369   : > { %1873 = vst [vmem:[%s3864_s23 + $0xd8] sm:$0xff] %v4322_v46 }
 0x378   : > { %v4330_v11 = vpop.f32.mrf.mxu1 }
 0x379   : > { %1861 = vst [vmem:[%s3864_s23 + $0x78] sm:$0xff] %v4330_v11  ;;  %v1892_v52 = vadd.f32 %v1891_v7, %v4330_v11 }
 0x37b   : > { %v1893_v53 = vadd.f32 %v1892_v52, %v4030_v12 }
 0x37d   : > { %v1894_v28 = vadd.f32 %v1893_v53, %v4113_v41 }
 0x37f   : > { %v1895_v48 = vadd.f32 %v1894_v28, %v4168_v44 }
 0x381   : > { %v1896_v20 = vadd.f32 %v1895_v48, %v4261_v59 }
 0x383   : > { %v1897_v23 = vadd.f32 %v1896_v20, %v4298_v25 }
 0x385   : > { %v1898_v17 = vadd.f32 %v1897_v23, %v4318_v0 }
 0x386   : > { %v4339_v39 = vpop.f32.mrf.mxu2 }
 0x387   : > { %1868 = vst [vmem:[%s3864_s23 + $0xb0] sm:$0xff] %v4339_v39  ;;  %v1899_v32 = vadd.f32 %v1898_v17, %v4339_v39 }
 0x388   : > { %v4343_v58 = vpop.f32.mrf.mxu3 }
 0x389   : > { %1874 = vst [vmem:[%s3864_s23 + $0xe0] sm:$0xff] %v4343_v58 }
 0x39e   : > { %v1837_v43 = vpop.f32.mrf.mxu3 }
 0x39f   : > { %v4353_v19 = vpop.f32.mrf.mxu2  ;;  %1875 = vst [vmem:[%s3864_s23 + $0xe8] sm:$0xff] %v1837_v43 }
 0x3a0   : > { %1869 = vst [vmem:[%s3864_s23 + $0xb8] sm:$0xff] %v4353_v19  ;;  %v1900_v56 = vadd.f32 %v1899_v32, %v4353_v19 }
 0x3a2   : > { %v1901_v18 = vadd.f32 %v1900_v56, %v4182_v47 }
 0x3a4   : > { %v1902_v33 = vadd.f32 %v1901_v18, %v4257_v6 }
 0x3a6   : > { %v1903_v2 = vadd.f32 %v1902_v33, %v4302_v22 }
 0x3a8   : > { %v1904_v13 = vadd.f32 %v1903_v2, %v4322_v46 }
 0x3a9   : > { %v1840_v34 = vpop.f32.mrf.mxu3 }
 0x3aa   : > { %1876 = vst [vmem:[%s3864_s23 + $0xf0] sm:$0xff] %v1840_v34  ;;  %v1905_v3 = vadd.f32 %v1904_v13, %v4343_v58 }
 0x3ac   : > { %v1906_v15 = vadd.f32 %v1905_v3, %v1837_v43 }
 0x3ae   : > { %v1907_v8 = vadd.f32 %v1906_v15, %v1840_v34 }
 0x3b7   : > { %v1843_v27 = vpop.f32.mrf.mxu3 }
 0x3b8   : > { %1877 = vst [vmem:[%s3864_s23 + $0xf8] sm:$0xff] %v1843_v27  ;;  %v1908_v37 = vadd.f32 %v1907_v8, %v1843_v27 }
 0x3ba   : > { %v1909_v62 = vrot.slane %v1908_v37, 4 }
 0x3bc   : > { %v1910_v63 = vadd.f32 %v1909_v62, %v1908_v37 }
 0x3be   : > { %v1911_v30 = vrot.slane %v1910_v63, 2 }
 0x3c0   : > { %v1912_v24 = vadd.f32 %v1911_v30, %v1910_v63 }
 0x3c2   : > { %v1913_v9 = vrot.slane %v1912_v24, 1 }
 0x3c4   : > { %v1914_v26 = vadd.f32 %v1913_v9, %v1912_v24 }
 0x3c6   : > { %v4370_v35 = vmul.f32 %v1921_v40, %v1914_v26 }
 0x3c8   : > { %1955 = vst [vmem:[%s292_s25] sm:$0x1] %v4370_v35  ;;  %v4374_v7 = vsub.f32 %v1837_v43, %v4370_v35  ;;  %v4377_v52 = vsub.f32 %v1840_v34, %v4370_v35  ;;  %v4380_v53 = vsub.f32 %v1843_v27, %v4370_v35  ;;  %v1923_v28 = vsub.f32 %v3869_v14, %v4370_v35 }
 0x3c9   : > { %v1924_v48 = vsub.f32 %v3884_v51, %v4370_v35  ;;  %v1925_v20 = vsub.f32 %v3921_v57, %v4370_v35  ;;  %v1926_v32 = vsub.f32 %v4007_v38, %v4370_v35  ;;  %v1927_v43 = vsub.f32 %v4095_v36, %v4370_v35 }
 0x3ca   : > { %v1956_v23 = vmul.f32 %v1923_v28, %v1923_v28  ;;  %v1928_v33 = vsub.f32 %v4156_v60, %v4370_v35  ;;  %v1929_v51 = vsub.f32 %v4213_v55, %v4370_v35  ;;  %v1930_v13 = vsub.f32 %v4292_v42, %v4370_v35 }
 0x3cb   : > { %v1957_v17 = vmul.f32 %v1924_v48, %v1924_v48  ;;  %v1958_v56 = vmul.f32 %v1925_v20, %v1925_v20  ;;  %v1959_v14 = vmul.f32 %v1926_v32, %v1926_v32  ;;  %v1960_v34 = vmul.f32 %v1927_v43, %v1927_v43 }
 0x3cc   : > { %v1961_v61 = vmul.f32 %v1928_v33, %v1928_v33  ;;  %v1931_v36 = vsub.f32 %v3927_v45, %v4370_v35  ;;  %v1962_v3 = vmul.f32 %v1929_v51, %v1929_v51  ;;  %v1932_v60 = vsub.f32 %v3962_v1, %v4370_v35 }
 0x3cd   : > { %v1988_v18 = vadd.f32 %v1957_v17, %v1956_v23  ;;  %v1963_v15 = vmul.f32 %v1930_v13, %v1930_v13  ;;  %v1933_v55 = vsub.f32 %v4097_v49, %v4370_v35  ;;  %v1934_v42 = vsub.f32 %v4129_v50, %v4370_v35 }
 0x3ce   : > { %v1964_v8 = vmul.f32 %v1931_v36, %v1931_v36  ;;  %v1965_v21 = vmul.f32 %v1932_v60, %v1932_v60  ;;  %v1935_v45 = vsub.f32 %v4225_v10, %v4370_v35  ;;  %v1936_v1 = vsub.f32 %v4290_v29, %v4370_v35 }
 0x3cf   : > { %v1989_v2 = vadd.f32 %v1988_v18, %v1958_v56  ;;  %v1966_v62 = vmul.f32 %v1933_v55, %v1933_v55  ;;  %v1967_v63 = vmul.f32 %v1934_v42, %v1934_v42  ;;  %v1937_v49 = vsub.f32 %v4306_v4, %v4370_v35 }
 0x3d0   : > { %v1968_v54 = vmul.f32 %v1935_v45, %v1935_v45  ;;  %v1938_v50 = vsub.f32 %v4330_v11, %v4370_v35  ;;  %v1969_v9 = vmul.f32 %v1936_v1, %v1936_v1  ;;  %v1939_v10 = vsub.f32 %v4030_v12, %v4370_v35 }
 0x3d1   : > { %v1990_v57 = vadd.f32 %v1989_v2, %v1959_v14  ;;  %v1970_v26 = vmul.f32 %v1937_v49, %v1937_v49  ;;  %v1940_v29 = vsub.f32 %v4113_v41, %v4370_v35  ;;  %v1941_v4 = vsub.f32 %v4168_v44, %v4370_v35 }
 0x3d2   : > { %v1971_v48 = vmul.f32 %v1938_v50, %v1938_v50  ;;  %v1972_v23 = vmul.f32 %v1939_v10, %v1939_v10  ;;  %v1942_v11 = vsub.f32 %v4261_v59, %v4370_v35  ;;  %v1943_v12 = vsub.f32 %v4298_v25, %v4370_v35 }
 0x3d3   : > { %v1991_v38 = vadd.f32 %v1990_v57, %v1960_v34  ;;  %v1973_v32 = vmul.f32 %v1940_v29, %v1940_v29  ;;  %v1974_v56 = vmul.f32 %v1941_v4, %v1941_v4  ;;  %v1944_v41 = vsub.f32 %v4318_v0, %v4370_v35 }
 0x3d4   : > { %v1975_v33 = vmul.f32 %v1942_v11, %v1942_v11  ;;  %v1945_v44 = vsub.f32 %v4339_v39, %v4370_v35  ;;  %v1976_v2 = vmul.f32 %v1943_v12, %v1943_v12  ;;  %v1946_v59 = vsub.f32 %v4353_v19, %v4370_v35 }
 0x3d5   : > { %v1992_v5 = vadd.f32 %v1991_v38, %v1961_v61  ;;  %v1977_v34 = vmul.f32 %v1944_v41, %v1944_v41  ;;  %v1947_v25 = vsub.f32 %v4182_v47, %v4370_v35  ;;  %v1948_v0 = vsub.f32 %v4257_v6, %v4370_v35 }
 0x3d6   : > { %v1978_v13 = vmul.f32 %v1945_v44, %v1945_v44  ;;  %v1979_v38 = vmul.f32 %v1946_v59, %v1946_v59  ;;  %v1949_v39 = vsub.f32 %v4302_v22, %v4370_v35  ;;  %v1950_v19 = vsub.f32 %v4322_v46, %v4370_v35 }
 0x3d7   : > { %v1993_v16 = vadd.f32 %v1992_v5, %v1962_v3  ;;  %v1980_v3 = vmul.f32 %v1947_v25, %v1947_v25  ;;  %v1981_v60 = vmul.f32 %v1948_v0, %v1948_v0  ;;  %v1951_v47 = vsub.f32 %v4343_v58, %v4370_v35 }
 0x3d8   : > { %v1985_v22 = vmul.f32 %v4374_v7, %v4374_v7  ;;  %v1987_v45 = vmul.f32 %v4380_v53, %v4380_v53 }
 0x3d9   : > { %v1994_v27 = vadd.f32 %v1993_v16, %v1963_v15  ;;  %v1982_v16 = vmul.f32 %v1949_v39, %v1949_v39 }
 0x3db   : > { %v1995_v37 = vadd.f32 %v1994_v27, %v1964_v8  ;;  %v1983_v8 = vmul.f32 %v1950_v19, %v1950_v19  ;;  %v1984_v27 = vmul.f32 %v1951_v47, %v1951_v47 }
 0x3dd   : > { %v1996_v31 = vadd.f32 %v1995_v37, %v1965_v21  ;;  %v1986_v37 = vmul.f32 %v4377_v52, %v4377_v52 }
 0x3df   : > { %v1997_v30 = vadd.f32 %v1996_v31, %v1966_v62 }
 0x3e1   : > { %v1998_v24 = vadd.f32 %v1997_v30, %v1967_v63 }
 0x3e3   : > { %v1999_v40 = vadd.f32 %v1998_v24, %v1968_v54 }
 0x3e5   : > { %v2000_v28 = vadd.f32 %v1999_v40, %v1969_v9 }
 0x3e7   : > { %v2001_v20 = vadd.f32 %v2000_v28, %v1970_v26 }
 0x3e9   : > { %v2002_v17 = vadd.f32 %v2001_v20, %v1971_v48 }
 0x3eb   : > { %v2003_v43 = vadd.f32 %v2002_v17, %v1972_v23 }
 0x3ed   : > { %v2004_v18 = vadd.f32 %v2003_v43, %v1973_v32 }
 0x3ef   : > { %v2005_v14 = vadd.f32 %v2004_v18, %v1974_v56 }
 0x3f1   : > { %v2006_v51 = vadd.f32 %v2005_v14, %v1975_v33 }
 0x3f3   : > { %v2007_v57 = vadd.f32 %v2006_v51, %v1976_v2 }
 0x3f5   : > { %v2008_v61 = vadd.f32 %v2007_v57, %v1977_v34 }
 0x3f7   : > { %v2009_v36 = vadd.f32 %v2008_v61, %v1978_v13 }
 0x3f9   : > { %v2010_v5 = vadd.f32 %v2009_v36, %v1979_v38 }
 0x3fb   : > { %v2011_v15 = vadd.f32 %v2010_v5, %v1980_v3 }
 0x3fd   : > { %v2012_v55 = vadd.f32 %v2011_v15, %v1981_v60 }
 0x3ff   : > { %v2013_v6 = vadd.f32 %v2012_v55, %v1982_v16 }
 0x401   : > { %v2014_v42 = vadd.f32 %v2013_v6, %v1983_v8 }
 0x403   : > { %v2015_v21 = vadd.f32 %v2014_v42, %v1984_v27 }
 0x405   : > { %v2016_v46 = vadd.f32 %v2015_v21, %v1985_v22 }
 0x407   : > { %v2017_v62 = vadd.f32 %v2016_v46, %v1986_v37 }
 0x409   : > { %v2018_v58 = vadd.f32 %v2017_v62, %v1987_v45 }
 0x40b   : > { %v2019_v35 = vrot.slane %v2018_v58, 4 }
 0x40d   : > { %v2020_v31 = vadd.f32 %v2019_v35, %v2018_v58 }
 0x40f   : > { %v2021_v1 = vrot.slane %v2020_v31, 2 }
 0x411   : > { %v2022_v63 = vadd.f32 %v2021_v1, %v2020_v31 }
 0x413   : > { %v2023_v30 = vrot.slane %v2022_v63, 1 }
 0x415   : > { %v2024_v7 = vadd.f32 %v2023_v30, %v2022_v63 }
 0x417   : > { %2025 = vst [vmem:[%s301_s28] sm:$0x1] %v2024_v7 }
 0x418 PF: > { %s15_s17 = sadd.s32 1, %s2378_s17   ;;  %s4853_s15 = smov %s2374_s16 }
 0x419   : > { %p12_p5 = scmp.ge.s32.totalorder %s15_s17, 4   ;;  %s4854_s16 = smov %s4856_s18 }
 0x41b   :  { %14 = sbr.rel (!%p12_p5) target bundleno = 2 (0x2), region = 86 }

</bundles_post_ra>
